<compile_context>
chip_gen: v6e
topology: v6e:2x2x1
jax: 0.10.0
libtpu: 0.0.40
codegen_flags: <defaults>
</compile_context>

<pallas_src>
import numpy as np

import jax
import jax.numpy as jnp
from jax import lax
from jax.experimental import pallas as pl
from jax.experimental.pallas import tpu as pltpu


# ------------------------------- fused kernel --------------------------------

def _lenet_ensemble_kernel(img_ref, t1_ref, b1_ref, t2_ref, b2_ref,
                           f1w_ref, f1b_ref, f2w_ref, f2b_ref, f3w_ref, f3b_ref,
                           logits_ref, feat_ref):
    """Full LeNet5 forward for `models_per_step` ensemble members."""
    H, B, W = img_ref.shape              # (32, batch, 32); batch % 8 == 0
    mps = t1_ref.shape[0]                # models handled by this grid step
    npad2 = t1_ref.shape[-1]             # 2 * 128 pool-phase-padded GEMM columns
    pad = npad2 // 2
    kh = t1_ref.shape[1] // W            # 5
    oh1 = H - kh + 1                     # 28 conv1 output rows
    p1 = oh1 // 2                        # 14 pooled rows
    c1l = b1_ref.shape[-1]               # 84 = C1 * p1 pooled conv1 lanes
    oh2 = p1 - kh + 1                    # 10 conv2 output rows
    p2 = oh2 // 2                        # 5 pooled rows
    c2l = b2_ref.shape[-1]               # 80 = C2 * p2 pooled conv2 lanes

    # conv1 im2col rows are model independent (shared input image): built once
    # per grid step.  Rows are (i, b); contraction axis is (di, input column).
    img = img_ref[...]                                                 # (H,B,W) f32
    x1 = jnp.concatenate([img[di:di + oh1] for di in range(kh)], axis=-1)
    x1 = x1.reshape(oh1 * B, kh * W).astype(jnp.bfloat16)              # (224, 160)

    for j in range(mps):                 # static unroll over models in this step
        # -------- conv1 + bias + ReLU + 2x2/s2 maxpool (one banded GEMM) -----
        y1 = jnp.dot(x1, t1_ref[j], preferred_element_type=jnp.float32)  # (224, 256)
        y1 = y1.reshape(p1, 2, B, npad2)
        y1 = jnp.maximum(y1[:, 0], y1[:, 1])             # pool over row phase
        y1 = jnp.maximum(y1[..., :pad], y1[..., pad:])   # pool over column phase
        # per-channel bias + ReLU commute with the max -> exact conv->ReLU->pool
        a1 = jnp.maximum(y1[..., :c1l] + b1_ref[j], 0.0)                # (14, B, 84)

        # -------- conv2: in-kernel im2col (leading slices + lane concat) ------
        x2 = jnp.concatenate([a1[di:di + oh2] for di in range(kh)], axis=-1)
        x2 = x2.reshape(oh2 * B, kh * c1l).astype(jnp.bfloat16)         # (80, 420)
        y2 = jnp.dot(x2, t2_ref[j], preferred_element_type=jnp.float32)  # (80, 256)
        y2 = y2.reshape(p2, 2, B, npad2)
        y2 = jnp.maximum(y2[:, 0], y2[:, 1])
        y2 = jnp.maximum(y2[..., :pad], y2[..., pad:])
        a2 = jnp.maximum(y2[..., :c2l] + b2_ref[j], 0.0)                # (5, B, 80)

        # -------- flatten + fc1/fc2/fc3 head (all operands stay in VMEM) ------
        flat = jnp.concatenate([a2[r] for r in range(p2)], axis=-1)     # (B, 400)
        h = jnp.dot(flat.astype(jnp.bfloat16), f1w_ref[j],
                    preferred_element_type=jnp.float32) + f1b_ref[j]
        h = jnp.maximum(h, 0.0)
        feat = jnp.dot(h.astype(jnp.bfloat16), f2w_ref[j],
                       preferred_element_type=jnp.float32) + f2b_ref[j]
        logits = jnp.dot(feat.astype(jnp.bfloat16), f3w_ref[j],
                         preferred_element_type=jnp.float32) + f3b_ref[j]
        feat_ref[j] = feat
        logits_ref[j] = logits


# -------------------------------- forward ------------------------------------

def ensemble_forward(image_nchw, params, *, models_per_step=None):
    """EnsembleModel.forward: (logits, features) stacked over ensemble members."""
    num_models = params["t1"].shape[0]
    if models_per_step is None:
        # >= 2 parallel grid steps keep both v7x TensorCores fed; grouping 2
        # models per step halves the per-step overhead on single-TC v5e/v6e.
        models_per_step = 2 if (num_models % 2 == 0 and num_models > 1) else 1
    assert num_models % models_per_step == 0
    steps = num_models // models_per_step

    b0, cin, h, w = image_nchw.shape
    assert (cin, h, w) == (1, 32, 32), "LeNet5 expects 1x32x32 inputs"
    # TODO(synk): for ImageNet-scale inputs add row/K tiling of the banded GEMMs
    # and an explicit vmem_limit_bytes (v7x's 64 MiB VMEM binds first).
    bp = ((b0 + 7) // 8) * 8                    # pad batch to a sublane multiple
    img = image_nchw[:, 0].astype(jnp.float32)
    if bp != b0:
        img = jnp.pad(img, ((0, bp - b0), (0, 0), (0, 0)))
    img = jnp.transpose(img, (1, 0, 2))         # (H, B, W): rows (i, b) in the GEMM

    num_classes = params["f3w"].shape[-1]
    feat_dim = params["f2w"].shape[-1]

    def per_model(tail):
        assert len(tail) == 2
        return pl.BlockSpec((models_per_step,) + tuple(tail), lambda s: (s, 0, 0))

    grid_spec = pltpu.PrefetchScalarGridSpec(
        num_scalar_prefetch=0,
        grid=(steps,),
        in_specs=[
            pl.BlockSpec(img.shape, lambda s: (0, 0, 0)),    # shared image
            per_model(params["t1"].shape[1:]),
            per_model(params["b1"].shape[1:]),
            per_model(params["t2"].shape[1:]),
            per_model(params["b2"].shape[1:]),
            per_model(params["f1w"].shape[1:]),
            per_model(params["f1b"].shape[1:]),
            per_model(params["f2w"].shape[1:]),
            per_model(params["f2b"].shape[1:]),
            per_model(params["f3w"].shape[1:]),
            per_model(params["f3b"].shape[1:]),
        ],
        out_specs=(per_model((bp, num_classes)), per_model((bp, feat_dim))),
    )
    logits, features = pl.pallas_call(
        _lenet_ensemble_kernel,
        out_shape=(jax.ShapeDtypeStruct((num_models, bp, num_classes), jnp.float32),
                   jax.ShapeDtypeStruct((num_models, bp, feat_dim), jnp.float32)),
        grid_spec=grid_spec,
        compiler_params=pltpu.CompilerParams(dimension_semantics=("parallel",)),
    )(img, params["t1"], params["b1"], params["t2"], params["b2"],
      params["f1w"], params["f1b"], params["f2w"], params["f2b"],
      params["f3w"], params["f3b"])
    return logits[:, :b0], features[:, :b0]


# ---------------------- param packing (torch -> kernel) ----------------------

def pack_params(raw):
    """Convert per-model PyTorch-layout LeNet5 weights into the kernel format.

    Conv weights become "banded" GEMM matrices whose output columns are ordered
    (pool column phase [padded to 128 lanes], channel, pooled column), so the
    2x2/s2 maxpool is two aligned vreg maxes on the f32 accumulator.  The fc1
    weight rows are permuted to the kernel's (row', channel, col') flatten order
    (exactly matching torch's NCHW flatten).
    """
    M, C1 = raw["c1b"].shape
    C2 = raw["c2b"].shape[1]
    H = W = 32
    OH1, P1 = H - 4, (H - 4) // 2          # 28, 14
    OH2, P2 = P1 - 4, (P1 - 4) // 2        # 10, 5
    PAD = 128

    # conv1 -> T1: (M, 5*W, 2*PAD)
    di, dj, c, j = np.meshgrid(np.arange(5), np.arange(5), np.arange(C1),
                               np.arange(OH1), indexing="ij")
    di, dj, c, j = (a.ravel() for a in (di, dj, c, j))
    k1 = di * W + j + dj
    col1 = (j % 2) * PAD + c * P1 + (j // 2)
    vals1 = raw["c1w"][:, :, 0][:, c, di, dj]              # torch (M, C1, 1, 5, 5)
    t1 = jnp.zeros((M, 5 * W, 2 * PAD), jnp.float32).at[:, k1, col1].set(vals1)

    # conv2 -> T2: (M, 5*C1*P1, 2*PAD)
    di, dj, ci, co, j2 = np.meshgrid(np.arange(5), np.arange(5), np.arange(C1),
                                     np.arange(C2), np.arange(OH2), indexing="ij")
    di, dj, ci, co, j2 = (a.ravel() for a in (di, dj, ci, co, j2))
    k2 = di * (C1 * P1) + ci * P1 + (j2 + dj)
    col2 = (j2 % 2) * PAD + co * P2 + (j2 // 2)
    vals2 = raw["c2w"][:, co, ci, di, dj]                  # torch (M, C2, C1, 5, 5)
    t2 = jnp.zeros((M, 5 * C1 * P1, 2 * PAD), jnp.float32).at[:, k2, col2].set(vals2)

    # fc1: map torch (cout, h, w)-flatten columns onto the kernel (h', cout, w') order
    i2p, cop, j2p = np.meshgrid(np.arange(P2), np.arange(C2), np.arange(P2),
                                indexing="ij")
    perm = (cop * (P2 * P2) + i2p * P2 + j2p).ravel()      # kernel flat -> torch flat
    f1w = jnp.transpose(raw["f1w"][:, :, perm], (0, 2, 1))  # (M, 400, 120)

    def lane_bias(b, rep):
        return jnp.repeat(b, rep, axis=1).reshape(b.shape[0], 1, b.shape[1] * rep)

    return dict(
        t1=t1.astype(jnp.bfloat16),
        b1=lane_bias(raw["c1b"], P1).astype(jnp.float32),          # (M, 1, 84)
        t2=t2.astype(jnp.bfloat16),
        b2=lane_bias(raw["c2b"], P2).astype(jnp.float32),          # (M, 1, 80)
        f1w=f1w.astype(jnp.bfloat16),
        f1b=raw["f1b"].reshape(M, 1, -1).astype(jnp.float32),
        f2w=jnp.transpose(raw["f2w"], (0, 2, 1)).astype(jnp.bfloat16),
        f2b=raw["f2b"].reshape(M, 1, -1).astype(jnp.float32),
        f3w=jnp.transpose(raw["f3w"], (0, 2, 1)).astype(jnp.bfloat16),
        f3b=raw["f3b"].reshape(M, 1, -1).astype(jnp.float32),
    )


def init_raw_params(key, num_models, num_classes):
    """Deterministic per-model LeNet5 weights in PyTorch layouts."""
    ks = jax.random.split(key, 10)

    def u(k, shape, fan_in):
        bound = 1.0 / float(np.sqrt(fan_in))
        return jax.random.uniform(k, shape, jnp.float32, -bound, bound)

    M = num_models
    return dict(
        c1w=u(ks[0], (M, 6, 1, 5, 5), 25),      c1b=u(ks[1], (M, 6), 25),
        c2w=u(ks[2], (M, 16, 6, 5, 5), 150),    c2b=u(ks[3], (M, 16), 150),
        f1w=u(ks[4], (M, 120, 400), 400),       f1b=u(ks[5], (M, 120), 400),
        f2w=u(ks[6], (M, 84, 120), 120),        f2b=u(ks[7], (M, 84), 120),
        f3w=u(ks[8], (M, num_classes, 84), 84), f3b=u(ks[9], (M, num_classes), 84),
    )


# --------------------------- pure-JAX reference ------------------------------

def _reference_forward(image_nchw, raw):
    """f32 reference LeNet5 ensemble (for numerical validation of the kernel)."""
    dn = ("NCHW", "OIHW", "NCHW")

    def one_model(wts):
        c1w, c1b, c2w, c2b, f1w, f1b, f2w, f2b, f3w, f3b = wts
        x = lax.conv_general_dilated(image_nchw, c1w, (1, 1), "VALID",
                                     dimension_numbers=dn)
        x = jnp.maximum(x + c1b[None, :, None, None], 0.0)
        x = lax.reduce_window(x, -jnp.inf, lax.max, (1, 1, 2, 2), (1, 1, 2, 2), "VALID")
        x = lax.conv_general_dilated(x, c2w, (1, 1), "VALID", dimension_numbers=dn)
        x = jnp.maximum(x + c2b[None, :, None, None], 0.0)
        x = lax.reduce_window(x, -jnp.inf, lax.max, (1, 1, 2, 2), (1, 1, 2, 2), "VALID")
        x = x.reshape(x.shape[0], -1)
        h = jnp.maximum(x @ f1w.T + f1b, 0.0)
        feat = h @ f2w.T + f2b
        logits = feat @ f3w.T + f3b
        return logits, feat

    wts = (raw["c1w"], raw["c1b"], raw["c2w"], raw["c2b"], raw["f1w"], raw["f1b"],
           raw["f2w"], raw["f2b"], raw["f3w"], raw["f3b"])
    return jax.vmap(one_model)(wts)


# ----------------------------------- main -------------------------------------

if __name__ == "__main__":
    NUM_MODELS = 4
    NUM_CLASSES = 10
    BATCH = 8          # multiple of 8 keeps all in-kernel reshapes tile-aligned
    FEAT_DIM = 84

    root = jax.random.PRNGKey(0)
    k_img, k_par = jax.random.split(root)
    image = jax.random.normal(k_img, (BATCH, 1, 32, 32), jnp.float32)  # NCHW LeNet5 input
    raw = init_raw_params(k_par, NUM_MODELS, NUM_CLASSES)
    params = pack_params(raw)

    fwd = jax.jit(ensemble_forward)
    logits, features = jax.block_until_ready(fwd(image, params))

    assert logits.shape == (NUM_MODELS, BATCH, NUM_CLASSES), logits.shape
    assert features.shape == (NUM_MODELS, BATCH, FEAT_DIM), features.shape
    assert bool(jnp.all(jnp.isfinite(logits)))
    assert bool(jnp.all(jnp.isfinite(features)))

    # numerical check vs f32 reference (loose tolerance: bf16 GEMM operands)
    ref_logits, ref_features = _reference_forward(image, raw)
    tol_l = 5e-2 + 5e-2 * float(jnp.max(jnp.abs(ref_logits)))
    tol_f = 5e-2 + 5e-2 * float(jnp.max(jnp.abs(ref_features)))
    assert float(jnp.max(jnp.abs(logits - ref_logits))) <= tol_l
    assert float(jnp.max(jnp.abs(features - ref_features))) <= tol_f

    print("KERNEL_OK")
</pallas_src>

<mosaic_0001>
module attributes {stable_mosaic.version = 11 : i64} {
  func.func @_lenet_ensemble_kernel(%arg0: i32, %arg1: memref<32x8x32xf32, #tpu.memory_space<vmem>>, %arg2: memref<2x160x256xbf16, #tpu.memory_space<vmem>>, %arg3: memref<2x1x84xf32, #tpu.memory_space<vmem>>, %arg4: memref<2x420x256xbf16, #tpu.memory_space<vmem>>, %arg5: memref<2x1x80xf32, #tpu.memory_space<vmem>>, %arg6: memref<2x400x120xbf16, #tpu.memory_space<vmem>>, %arg7: memref<2x1x120xf32, #tpu.memory_space<vmem>>, %arg8: memref<2x120x84xbf16, #tpu.memory_space<vmem>>, %arg9: memref<2x1x84xf32, #tpu.memory_space<vmem>>, %arg10: memref<2x84x10xbf16, #tpu.memory_space<vmem>>, %arg11: memref<2x1x10xf32, #tpu.memory_space<vmem>>, %arg12: memref<2x8x10xf32, #tpu.memory_space<vmem>>, %arg13: memref<2x8x84xf32, #tpu.memory_space<vmem>>) attributes {dimension_semantics = [#tpu.dimension_semantics<parallel>], iteration_bounds = array<i64: 2>, scalar_prefetch = 0 : i64, scratch_operands = 0 : i64, tpu.core_type = #tpu.core_type<tc>, window_params = [{pipeline_mode = #tpu.pipeline_mode<synchronous>, transform_indices = @transform_0, window_bounds = array<i64: 32, 8, 32>}, {transform_indices = @transform_1, window_bounds = array<i64: 2, 160, 256>}, {transform_indices = @transform_2, window_bounds = array<i64: 2, 1, 84>}, {transform_indices = @transform_3, window_bounds = array<i64: 2, 420, 256>}, {transform_indices = @transform_4, window_bounds = array<i64: 2, 1, 80>}, {transform_indices = @transform_5, window_bounds = array<i64: 2, 400, 120>}, {transform_indices = @transform_6, window_bounds = array<i64: 2, 1, 120>}, {transform_indices = @transform_7, window_bounds = array<i64: 2, 120, 84>}, {transform_indices = @transform_8, window_bounds = array<i64: 2, 1, 84>}, {transform_indices = @transform_9, window_bounds = array<i64: 2, 84, 10>}, {transform_indices = @transform_10, window_bounds = array<i64: 2, 1, 10>}, {transform_indices = @transform_11, window_bounds = array<i64: 2, 8, 10>}, {transform_indices = @transform_12, window_bounds = array<i64: 2, 8, 84>}]} {
    %c0 = arith.constant 0 : index
    %c0_0 = arith.constant 0 : index
    %c0_1 = arith.constant 0 : index
    %0 = vector.load %arg1[%c0, %c0_0, %c0_1] : memref<32x8x32xf32, #tpu.memory_space<vmem>>, vector<32x8x32xf32>
    %1 = vector.extract_strided_slice %0 {offsets = [0, 0, 0], sizes = [28, 8, 32], strides = [1, 1, 1]} : vector<32x8x32xf32> to vector<28x8x32xf32>
    %2 = vector.extract_strided_slice %0 {offsets = [1, 0, 0], sizes = [28, 8, 32], strides = [1, 1, 1]} : vector<32x8x32xf32> to vector<28x8x32xf32>
    %3 = vector.extract_strided_slice %0 {offsets = [2, 0, 0], sizes = [28, 8, 32], strides = [1, 1, 1]} : vector<32x8x32xf32> to vector<28x8x32xf32>
    %4 = vector.extract_strided_slice %0 {offsets = [3, 0, 0], sizes = [28, 8, 32], strides = [1, 1, 1]} : vector<32x8x32xf32> to vector<28x8x32xf32>
    %5 = vector.extract_strided_slice %0 {offsets = [4, 0, 0], sizes = [28, 8, 32], strides = [1, 1, 1]} : vector<32x8x32xf32> to vector<28x8x32xf32>
    %6 = tpu.concatenate %1, %2, %3, %4, %5 in 2 : vector<28x8x32xf32>, vector<28x8x32xf32>, vector<28x8x32xf32>, vector<28x8x32xf32>, vector<28x8x32xf32> -> vector<28x8x160xf32>
    %7 = vector.shape_cast %6 : vector<28x8x160xf32> to vector<224x160xf32>
    %8 = arith.truncf %7 : vector<224x160xf32> to vector<224x160xbf16>
    %c0_2 = arith.constant 0 : index
    %c0_3 = arith.constant 0 : index
    %c0_4 = arith.constant 0 : index
    %9 = vector.load %arg2[%c0_2, %c0_3, %c0_4] : memref<2x160x256xbf16, #tpu.memory_space<vmem>>, vector<1x160x256xbf16>
    %10 = vector.shape_cast %9 : vector<1x160x256xbf16> to vector<160x256xbf16>
    %cst = arith.constant dense<0.000000e+00> : vector<224x256xf32>
    %11 = tpu.matmul %8, %10, %cst {dimension_numbers = #tpu.dot_dimension_numbers<[1], [0], [0], [1], [0, 0, 1, 1], [], []>} : vector<224x160xbf16>, vector<160x256xbf16>, vector<224x256xf32> -> vector<224x256xf32>
    %12 = vector.shape_cast %11 : vector<224x256xf32> to vector<14x2x8x256xf32>
    %13 = vector.extract_strided_slice %12 {offsets = [0, 0, 0, 0], sizes = [14, 1, 8, 256], strides = [1, 1, 1, 1]} : vector<14x2x8x256xf32> to vector<14x1x8x256xf32>
    %14 = vector.shape_cast %13 : vector<14x1x8x256xf32> to vector<14x8x256xf32>
    %15 = vector.extract_strided_slice %12 {offsets = [0, 1, 0, 0], sizes = [14, 1, 8, 256], strides = [1, 1, 1, 1]} : vector<14x2x8x256xf32> to vector<14x1x8x256xf32>
    %16 = vector.shape_cast %15 : vector<14x1x8x256xf32> to vector<14x8x256xf32>
    %17 = arith.maximumf %14, %16 : vector<14x8x256xf32>
    %18 = vector.extract_strided_slice %17 {offsets = [0, 0, 0], sizes = [14, 8, 128], strides = [1, 1, 1]} : vector<14x8x256xf32> to vector<14x8x128xf32>
    %19 = vector.extract_strided_slice %17 {offsets = [0, 0, 128], sizes = [14, 8, 128], strides = [1, 1, 1]} : vector<14x8x256xf32> to vector<14x8x128xf32>
    %20 = arith.maximumf %18, %19 : vector<14x8x128xf32>
    %21 = vector.extract_strided_slice %20 {offsets = [0, 0, 0], sizes = [14, 8, 84], strides = [1, 1, 1]} : vector<14x8x128xf32> to vector<14x8x84xf32>
    %c0_5 = arith.constant 0 : index
    %c0_6 = arith.constant 0 : index
    %c0_7 = arith.constant 0 : index
    %22 = vector.load %arg3[%c0_5, %c0_6, %c0_7] : memref<2x1x84xf32, #tpu.memory_space<vmem>>, vector<1x1x84xf32>
    %23 = vector.shape_cast %22 : vector<1x1x84xf32> to vector<1x84xf32>
    %24 = vector.shape_cast %23 : vector<1x84xf32> to vector<1x1x84xf32>
    %25 = vector.broadcast %24 : vector<1x1x84xf32> to vector<14x8x84xf32>
    %26 = arith.addf %21, %25 : vector<14x8x84xf32>
    %cst_8 = arith.constant 0.000000e+00 : f32
    %27 = vector.broadcast %cst_8 : f32 to vector<14x8x84xf32>
    %28 = arith.maximumf %26, %27 : vector<14x8x84xf32>
    %29 = vector.extract_strided_slice %28 {offsets = [0, 0, 0], sizes = [10, 8, 84], strides = [1, 1, 1]} : vector<14x8x84xf32> to vector<10x8x84xf32>
    %30 = vector.extract_strided_slice %28 {offsets = [1, 0, 0], sizes = [10, 8, 84], strides = [1, 1, 1]} : vector<14x8x84xf32> to vector<10x8x84xf32>
    %31 = vector.extract_strided_slice %28 {offsets = [2, 0, 0], sizes = [10, 8, 84], strides = [1, 1, 1]} : vector<14x8x84xf32> to vector<10x8x84xf32>
    %32 = vector.extract_strided_slice %28 {offsets = [3, 0, 0], sizes = [10, 8, 84], strides = [1, 1, 1]} : vector<14x8x84xf32> to vector<10x8x84xf32>
    %33 = vector.extract_strided_slice %28 {offsets = [4, 0, 0], sizes = [10, 8, 84], strides = [1, 1, 1]} : vector<14x8x84xf32> to vector<10x8x84xf32>
    %34 = tpu.concatenate %29, %30, %31, %32, %33 in 2 : vector<10x8x84xf32>, vector<10x8x84xf32>, vector<10x8x84xf32>, vector<10x8x84xf32>, vector<10x8x84xf32> -> vector<10x8x420xf32>
    %35 = vector.shape_cast %34 : vector<10x8x420xf32> to vector<80x420xf32>
    %36 = arith.truncf %35 : vector<80x420xf32> to vector<80x420xbf16>
    %c0_9 = arith.constant 0 : index
    %c0_10 = arith.constant 0 : index
    %c0_11 = arith.constant 0 : index
    %37 = vector.load %arg4[%c0_9, %c0_10, %c0_11] : memref<2x420x256xbf16, #tpu.memory_space<vmem>>, vector<1x420x256xbf16>
    %38 = vector.shape_cast %37 : vector<1x420x256xbf16> to vector<420x256xbf16>
    %cst_12 = arith.constant dense<0.000000e+00> : vector<80x256xf32>
    %39 = tpu.matmul %36, %38, %cst_12 {dimension_numbers = #tpu.dot_dimension_numbers<[1], [0], [0], [1], [0, 0, 1, 1], [], []>} : vector<80x420xbf16>, vector<420x256xbf16>, vector<80x256xf32> -> vector<80x256xf32>
    %40 = vector.shape_cast %39 : vector<80x256xf32> to vector<5x2x8x256xf32>
    %41 = vector.extract_strided_slice %40 {offsets = [0, 0, 0, 0], sizes = [5, 1, 8, 256], strides = [1, 1, 1, 1]} : vector<5x2x8x256xf32> to vector<5x1x8x256xf32>
    %42 = vector.shape_cast %41 : vector<5x1x8x256xf32> to vector<5x8x256xf32>
    %43 = vector.extract_strided_slice %40 {offsets = [0, 1, 0, 0], sizes = [5, 1, 8, 256], strides = [1, 1, 1, 1]} : vector<5x2x8x256xf32> to vector<5x1x8x256xf32>
    %44 = vector.shape_cast %43 : vector<5x1x8x256xf32> to vector<5x8x256xf32>
    %45 = arith.maximumf %42, %44 : vector<5x8x256xf32>
    %46 = vector.extract_strided_slice %45 {offsets = [0, 0, 0], sizes = [5, 8, 128], strides = [1, 1, 1]} : vector<5x8x256xf32> to vector<5x8x128xf32>
    %47 = vector.extract_strided_slice %45 {offsets = [0, 0, 128], sizes = [5, 8, 128], strides = [1, 1, 1]} : vector<5x8x256xf32> to vector<5x8x128xf32>
    %48 = arith.maximumf %46, %47 : vector<5x8x128xf32>
    %49 = vector.extract_strided_slice %48 {offsets = [0, 0, 0], sizes = [5, 8, 80], strides = [1, 1, 1]} : vector<5x8x128xf32> to vector<5x8x80xf32>
    %c0_13 = arith.constant 0 : index
    %c0_14 = arith.constant 0 : index
    %c0_15 = arith.constant 0 : index
    %50 = vector.load %arg5[%c0_13, %c0_14, %c0_15] : memref<2x1x80xf32, #tpu.memory_space<vmem>>, vector<1x1x80xf32>
    %51 = vector.shape_cast %50 : vector<1x1x80xf32> to vector<1x80xf32>
    %52 = vector.shape_cast %51 : vector<1x80xf32> to vector<1x1x80xf32>
    %53 = vector.broadcast %52 : vector<1x1x80xf32> to vector<5x8x80xf32>
    %54 = arith.addf %49, %53 : vector<5x8x80xf32>
    %cst_16 = arith.constant 0.000000e+00 : f32
    %55 = vector.broadcast %cst_16 : f32 to vector<5x8x80xf32>
    %56 = arith.maximumf %54, %55 : vector<5x8x80xf32>
    %57 = vector.extract_strided_slice %56 {offsets = [0, 0, 0], sizes = [1, 8, 80], strides = [1, 1, 1]} : vector<5x8x80xf32> to vector<1x8x80xf32>
    %58 = vector.shape_cast %57 : vector<1x8x80xf32> to vector<8x80xf32>
    %59 = vector.extract_strided_slice %56 {offsets = [1, 0, 0], sizes = [1, 8, 80], strides = [1, 1, 1]} : vector<5x8x80xf32> to vector<1x8x80xf32>
    %60 = vector.shape_cast %59 : vector<1x8x80xf32> to vector<8x80xf32>
    %61 = vector.extract_strided_slice %56 {offsets = [2, 0, 0], sizes = [1, 8, 80], strides = [1, 1, 1]} : vector<5x8x80xf32> to vector<1x8x80xf32>
    %62 = vector.shape_cast %61 : vector<1x8x80xf32> to vector<8x80xf32>
    %63 = vector.extract_strided_slice %56 {offsets = [3, 0, 0], sizes = [1, 8, 80], strides = [1, 1, 1]} : vector<5x8x80xf32> to vector<1x8x80xf32>
    %64 = vector.shape_cast %63 : vector<1x8x80xf32> to vector<8x80xf32>
    %65 = vector.extract_strided_slice %56 {offsets = [4, 0, 0], sizes = [1, 8, 80], strides = [1, 1, 1]} : vector<5x8x80xf32> to vector<1x8x80xf32>
    %66 = vector.shape_cast %65 : vector<1x8x80xf32> to vector<8x80xf32>
    %67 = tpu.concatenate %58, %60, %62, %64, %66 in 1 : vector<8x80xf32>, vector<8x80xf32>, vector<8x80xf32>, vector<8x80xf32>, vector<8x80xf32> -> vector<8x400xf32>
    %68 = arith.truncf %67 : vector<8x400xf32> to vector<8x400xbf16>
    %c0_17 = arith.constant 0 : index
    %c0_18 = arith.constant 0 : index
    %c0_19 = arith.constant 0 : index
    %69 = vector.load %arg6[%c0_17, %c0_18, %c0_19] : memref<2x400x120xbf16, #tpu.memory_space<vmem>>, vector<1x400x120xbf16>
    %70 = vector.shape_cast %69 : vector<1x400x120xbf16> to vector<400x120xbf16>
    %cst_20 = arith.constant dense<0.000000e+00> : vector<8x120xf32>
    %71 = tpu.matmul %68, %70, %cst_20 {dimension_numbers = #tpu.dot_dimension_numbers<[1], [0], [0], [1], [0, 0, 1, 1], [], []>} : vector<8x400xbf16>, vector<400x120xbf16>, vector<8x120xf32> -> vector<8x120xf32>
    %c0_21 = arith.constant 0 : index
    %c0_22 = arith.constant 0 : index
    %c0_23 = arith.constant 0 : index
    %72 = vector.load %arg7[%c0_21, %c0_22, %c0_23] : memref<2x1x120xf32, #tpu.memory_space<vmem>>, vector<1x1x120xf32>
    %73 = vector.shape_cast %72 : vector<1x1x120xf32> to vector<1x120xf32>
    %74 = vector.broadcast %73 : vector<1x120xf32> to vector<8x120xf32>
    %75 = arith.addf %71, %74 : vector<8x120xf32>
    %cst_24 = arith.constant 0.000000e+00 : f32
    %76 = vector.broadcast %cst_24 : f32 to vector<8x120xf32>
    %77 = arith.maximumf %75, %76 : vector<8x120xf32>
    %78 = arith.truncf %77 : vector<8x120xf32> to vector<8x120xbf16>
    %c0_25 = arith.constant 0 : index
    %c0_26 = arith.constant 0 : index
    %c0_27 = arith.constant 0 : index
    %79 = vector.load %arg8[%c0_25, %c0_26, %c0_27] : memref<2x120x84xbf16, #tpu.memory_space<vmem>>, vector<1x120x84xbf16>
    %80 = vector.shape_cast %79 : vector<1x120x84xbf16> to vector<120x84xbf16>
    %cst_28 = arith.constant dense<0.000000e+00> : vector<8x84xf32>
    %81 = tpu.matmul %78, %80, %cst_28 {dimension_numbers = #tpu.dot_dimension_numbers<[1], [0], [0], [1], [0, 0, 1, 1], [], []>} : vector<8x120xbf16>, vector<120x84xbf16>, vector<8x84xf32> -> vector<8x84xf32>
    %c0_29 = arith.constant 0 : index
    %c0_30 = arith.constant 0 : index
    %c0_31 = arith.constant 0 : index
    %82 = vector.load %arg9[%c0_29, %c0_30, %c0_31] : memref<2x1x84xf32, #tpu.memory_space<vmem>>, vector<1x1x84xf32>
    %83 = vector.shape_cast %82 : vector<1x1x84xf32> to vector<1x84xf32>
    %84 = vector.broadcast %83 : vector<1x84xf32> to vector<8x84xf32>
    %85 = arith.addf %81, %84 : vector<8x84xf32>
    %86 = arith.truncf %85 : vector<8x84xf32> to vector<8x84xbf16>
    %c0_32 = arith.constant 0 : index
    %c0_33 = arith.constant 0 : index
    %c0_34 = arith.constant 0 : index
    %87 = vector.load %arg10[%c0_32, %c0_33, %c0_34] : memref<2x84x10xbf16, #tpu.memory_space<vmem>>, vector<1x84x10xbf16>
    %88 = vector.shape_cast %87 : vector<1x84x10xbf16> to vector<84x10xbf16>
    %cst_35 = arith.constant dense<0.000000e+00> : vector<8x10xf32>
    %89 = tpu.matmul %86, %88, %cst_35 {dimension_numbers = #tpu.dot_dimension_numbers<[1], [0], [0], [1], [0, 0, 1, 1], [], []>} : vector<8x84xbf16>, vector<84x10xbf16>, vector<8x10xf32> -> vector<8x10xf32>
    %c0_36 = arith.constant 0 : index
    %c0_37 = arith.constant 0 : index
    %c0_38 = arith.constant 0 : index
    %90 = vector.load %arg11[%c0_36, %c0_37, %c0_38] : memref<2x1x10xf32, #tpu.memory_space<vmem>>, vector<1x1x10xf32>
    %91 = vector.shape_cast %90 : vector<1x1x10xf32> to vector<1x10xf32>
    %92 = vector.broadcast %91 : vector<1x10xf32> to vector<8x10xf32>
    %93 = arith.addf %89, %92 : vector<8x10xf32>
    %c0_39 = arith.constant 0 : index
    %c0_40 = arith.constant 0 : index
    %c0_41 = arith.constant 0 : index
    %94 = vector.load %arg13[%c0_39, %c0_40, %c0_41] : memref<2x8x84xf32, #tpu.memory_space<vmem>>, vector<1x8x84xf32>
    %95 = vector.shape_cast %94 : vector<1x8x84xf32> to vector<8x84xf32>
    %96 = vector.shape_cast %85 : vector<8x84xf32> to vector<1x8x84xf32>
    tpu.vector_store %arg13[%c0_39, %c0_40, %c0_41], %96 {strides = array<i32>} : memref<2x8x84xf32, #tpu.memory_space<vmem>>, vector<1x8x84xf32>,
    %c0_42 = arith.constant 0 : index
    %c0_43 = arith.constant 0 : index
    %c0_44 = arith.constant 0 : index
    %97 = vector.load %arg12[%c0_42, %c0_43, %c0_44] : memref<2x8x10xf32, #tpu.memory_space<vmem>>, vector<1x8x10xf32>
    %98 = vector.shape_cast %97 : vector<1x8x10xf32> to vector<8x10xf32>
    %99 = vector.shape_cast %93 : vector<8x10xf32> to vector<1x8x10xf32>
    tpu.vector_store %arg12[%c0_42, %c0_43, %c0_44], %99 {strides = array<i32>} : memref<2x8x10xf32, #tpu.memory_space<vmem>>, vector<1x8x10xf32>,
    %c1 = arith.constant 1 : index
    %c0_45 = arith.constant 0 : index
    %c0_46 = arith.constant 0 : index
    %100 = vector.load %arg2[%c1, %c0_45, %c0_46] : memref<2x160x256xbf16, #tpu.memory_space<vmem>>, vector<1x160x256xbf16>
    %101 = vector.shape_cast %100 : vector<1x160x256xbf16> to vector<160x256xbf16>
    %cst_47 = arith.constant dense<0.000000e+00> : vector<224x256xf32>
    %102 = tpu.matmul %8, %101, %cst_47 {dimension_numbers = #tpu.dot_dimension_numbers<[1], [0], [0], [1], [0, 0, 1, 1], [], []>} : vector<224x160xbf16>, vector<160x256xbf16>, vector<224x256xf32> -> vector<224x256xf32>
    %103 = vector.shape_cast %102 : vector<224x256xf32> to vector<14x2x8x256xf32>
    %104 = vector.extract_strided_slice %103 {offsets = [0, 0, 0, 0], sizes = [14, 1, 8, 256], strides = [1, 1, 1, 1]} : vector<14x2x8x256xf32> to vector<14x1x8x256xf32>
    %105 = vector.shape_cast %104 : vector<14x1x8x256xf32> to vector<14x8x256xf32>
    %106 = vector.extract_strided_slice %103 {offsets = [0, 1, 0, 0], sizes = [14, 1, 8, 256], strides = [1, 1, 1, 1]} : vector<14x2x8x256xf32> to vector<14x1x8x256xf32>
    %107 = vector.shape_cast %106 : vector<14x1x8x256xf32> to vector<14x8x256xf32>
    %108 = arith.maximumf %105, %107 : vector<14x8x256xf32>
    %109 = vector.extract_strided_slice %108 {offsets = [0, 0, 0], sizes = [14, 8, 128], strides = [1, 1, 1]} : vector<14x8x256xf32> to vector<14x8x128xf32>
    %110 = vector.extract_strided_slice %108 {offsets = [0, 0, 128], sizes = [14, 8, 128], strides = [1, 1, 1]} : vector<14x8x256xf32> to vector<14x8x128xf32>
    %111 = arith.maximumf %109, %110 : vector<14x8x128xf32>
    %112 = vector.extract_strided_slice %111 {offsets = [0, 0, 0], sizes = [14, 8, 84], strides = [1, 1, 1]} : vector<14x8x128xf32> to vector<14x8x84xf32>
    %c1_48 = arith.constant 1 : index
    %c0_49 = arith.constant 0 : index
    %c0_50 = arith.constant 0 : index
    %113 = vector.load %arg3[%c1_48, %c0_49, %c0_50] : memref<2x1x84xf32, #tpu.memory_space<vmem>>, vector<1x1x84xf32>
    %114 = vector.shape_cast %113 : vector<1x1x84xf32> to vector<1x84xf32>
    %115 = vector.shape_cast %114 : vector<1x84xf32> to vector<1x1x84xf32>
    %116 = vector.broadcast %115 : vector<1x1x84xf32> to vector<14x8x84xf32>
    %117 = arith.addf %112, %116 : vector<14x8x84xf32>
    %cst_51 = arith.constant 0.000000e+00 : f32
    %118 = vector.broadcast %cst_51 : f32 to vector<14x8x84xf32>
    %119 = arith.maximumf %117, %118 : vector<14x8x84xf32>
    %120 = vector.extract_strided_slice %119 {offsets = [0, 0, 0], sizes = [10, 8, 84], strides = [1, 1, 1]} : vector<14x8x84xf32> to vector<10x8x84xf32>
    %121 = vector.extract_strided_slice %119 {offsets = [1, 0, 0], sizes = [10, 8, 84], strides = [1, 1, 1]} : vector<14x8x84xf32> to vector<10x8x84xf32>
    %122 = vector.extract_strided_slice %119 {offsets = [2, 0, 0], sizes = [10, 8, 84], strides = [1, 1, 1]} : vector<14x8x84xf32> to vector<10x8x84xf32>
    %123 = vector.extract_strided_slice %119 {offsets = [3, 0, 0], sizes = [10, 8, 84], strides = [1, 1, 1]} : vector<14x8x84xf32> to vector<10x8x84xf32>
    %124 = vector.extract_strided_slice %119 {offsets = [4, 0, 0], sizes = [10, 8, 84], strides = [1, 1, 1]} : vector<14x8x84xf32> to vector<10x8x84xf32>
    %125 = tpu.concatenate %120, %121, %122, %123, %124 in 2 : vector<10x8x84xf32>, vector<10x8x84xf32>, vector<10x8x84xf32>, vector<10x8x84xf32>, vector<10x8x84xf32> -> vector<10x8x420xf32>
    %126 = vector.shape_cast %125 : vector<10x8x420xf32> to vector<80x420xf32>
    %127 = arith.truncf %126 : vector<80x420xf32> to vector<80x420xbf16>
    %c1_52 = arith.constant 1 : index
    %c0_53 = arith.constant 0 : index
    %c0_54 = arith.constant 0 : index
    %128 = vector.load %arg4[%c1_52, %c0_53, %c0_54] : memref<2x420x256xbf16, #tpu.memory_space<vmem>>, vector<1x420x256xbf16>
    %129 = vector.shape_cast %128 : vector<1x420x256xbf16> to vector<420x256xbf16>
    %cst_55 = arith.constant dense<0.000000e+00> : vector<80x256xf32>
    %130 = tpu.matmul %127, %129, %cst_55 {dimension_numbers = #tpu.dot_dimension_numbers<[1], [0], [0], [1], [0, 0, 1, 1], [], []>} : vector<80x420xbf16>, vector<420x256xbf16>, vector<80x256xf32> -> vector<80x256xf32>
    %131 = vector.shape_cast %130 : vector<80x256xf32> to vector<5x2x8x256xf32>
    %132 = vector.extract_strided_slice %131 {offsets = [0, 0, 0, 0], sizes = [5, 1, 8, 256], strides = [1, 1, 1, 1]} : vector<5x2x8x256xf32> to vector<5x1x8x256xf32>
    %133 = vector.shape_cast %132 : vector<5x1x8x256xf32> to vector<5x8x256xf32>
    %134 = vector.extract_strided_slice %131 {offsets = [0, 1, 0, 0], sizes = [5, 1, 8, 256], strides = [1, 1, 1, 1]} : vector<5x2x8x256xf32> to vector<5x1x8x256xf32>
    %135 = vector.shape_cast %134 : vector<5x1x8x256xf32> to vector<5x8x256xf32>
    %136 = arith.maximumf %133, %135 : vector<5x8x256xf32>
    %137 = vector.extract_strided_slice %136 {offsets = [0, 0, 0], sizes = [5, 8, 128], strides = [1, 1, 1]} : vector<5x8x256xf32> to vector<5x8x128xf32>
    %138 = vector.extract_strided_slice %136 {offsets = [0, 0, 128], sizes = [5, 8, 128], strides = [1, 1, 1]} : vector<5x8x256xf32> to vector<5x8x128xf32>
    %139 = arith.maximumf %137, %138 : vector<5x8x128xf32>
    %140 = vector.extract_strided_slice %139 {offsets = [0, 0, 0], sizes = [5, 8, 80], strides = [1, 1, 1]} : vector<5x8x128xf32> to vector<5x8x80xf32>
    %c1_56 = arith.constant 1 : index
    %c0_57 = arith.constant 0 : index
    %c0_58 = arith.constant 0 : index
    %141 = vector.load %arg5[%c1_56, %c0_57, %c0_58] : memref<2x1x80xf32, #tpu.memory_space<vmem>>, vector<1x1x80xf32>
    %142 = vector.shape_cast %141 : vector<1x1x80xf32> to vector<1x80xf32>
    %143 = vector.shape_cast %142 : vector<1x80xf32> to vector<1x1x80xf32>
    %144 = vector.broadcast %143 : vector<1x1x80xf32> to vector<5x8x80xf32>
    %145 = arith.addf %140, %144 : vector<5x8x80xf32>
    %cst_59 = arith.constant 0.000000e+00 : f32
    %146 = vector.broadcast %cst_59 : f32 to vector<5x8x80xf32>
    %147 = arith.maximumf %145, %146 : vector<5x8x80xf32>
    %148 = vector.extract_strided_slice %147 {offsets = [0, 0, 0], sizes = [1, 8, 80], strides = [1, 1, 1]} : vector<5x8x80xf32> to vector<1x8x80xf32>
    %149 = vector.shape_cast %148 : vector<1x8x80xf32> to vector<8x80xf32>
    %150 = vector.extract_strided_slice %147 {offsets = [1, 0, 0], sizes = [1, 8, 80], strides = [1, 1, 1]} : vector<5x8x80xf32> to vector<1x8x80xf32>
    %151 = vector.shape_cast %150 : vector<1x8x80xf32> to vector<8x80xf32>
    %152 = vector.extract_strided_slice %147 {offsets = [2, 0, 0], sizes = [1, 8, 80], strides = [1, 1, 1]} : vector<5x8x80xf32> to vector<1x8x80xf32>
    %153 = vector.shape_cast %152 : vector<1x8x80xf32> to vector<8x80xf32>
    %154 = vector.extract_strided_slice %147 {offsets = [3, 0, 0], sizes = [1, 8, 80], strides = [1, 1, 1]} : vector<5x8x80xf32> to vector<1x8x80xf32>
    %155 = vector.shape_cast %154 : vector<1x8x80xf32> to vector<8x80xf32>
    %156 = vector.extract_strided_slice %147 {offsets = [4, 0, 0], sizes = [1, 8, 80], strides = [1, 1, 1]} : vector<5x8x80xf32> to vector<1x8x80xf32>
    %157 = vector.shape_cast %156 : vector<1x8x80xf32> to vector<8x80xf32>
    %158 = tpu.concatenate %149, %151, %153, %155, %157 in 1 : vector<8x80xf32>, vector<8x80xf32>, vector<8x80xf32>, vector<8x80xf32>, vector<8x80xf32> -> vector<8x400xf32>
    %159 = arith.truncf %158 : vector<8x400xf32> to vector<8x400xbf16>
    %c1_60 = arith.constant 1 : index
    %c0_61 = arith.constant 0 : index
    %c0_62 = arith.constant 0 : index
    %160 = vector.load %arg6[%c1_60, %c0_61, %c0_62] : memref<2x400x120xbf16, #tpu.memory_space<vmem>>, vector<1x400x120xbf16>
    %161 = vector.shape_cast %160 : vector<1x400x120xbf16> to vector<400x120xbf16>
    %cst_63 = arith.constant dense<0.000000e+00> : vector<8x120xf32>
    %162 = tpu.matmul %159, %161, %cst_63 {dimension_numbers = #tpu.dot_dimension_numbers<[1], [0], [0], [1], [0, 0, 1, 1], [], []>} : vector<8x400xbf16>, vector<400x120xbf16>, vector<8x120xf32> -> vector<8x120xf32>
    %c1_64 = arith.constant 1 : index
    %c0_65 = arith.constant 0 : index
    %c0_66 = arith.constant 0 : index
    %163 = vector.load %arg7[%c1_64, %c0_65, %c0_66] : memref<2x1x120xf32, #tpu.memory_space<vmem>>, vector<1x1x120xf32>
    %164 = vector.shape_cast %163 : vector<1x1x120xf32> to vector<1x120xf32>
    %165 = vector.broadcast %164 : vector<1x120xf32> to vector<8x120xf32>
    %166 = arith.addf %162, %165 : vector<8x120xf32>
    %cst_67 = arith.constant 0.000000e+00 : f32
    %167 = vector.broadcast %cst_67 : f32 to vector<8x120xf32>
    %168 = arith.maximumf %166, %167 : vector<8x120xf32>
    %169 = arith.truncf %168 : vector<8x120xf32> to vector<8x120xbf16>
    %c1_68 = arith.constant 1 : index
    %c0_69 = arith.constant 0 : index
    %c0_70 = arith.constant 0 : index
    %170 = vector.load %arg8[%c1_68, %c0_69, %c0_70] : memref<2x120x84xbf16, #tpu.memory_space<vmem>>, vector<1x120x84xbf16>
    %171 = vector.shape_cast %170 : vector<1x120x84xbf16> to vector<120x84xbf16>
    %cst_71 = arith.constant dense<0.000000e+00> : vector<8x84xf32>
    %172 = tpu.matmul %169, %171, %cst_71 {dimension_numbers = #tpu.dot_dimension_numbers<[1], [0], [0], [1], [0, 0, 1, 1], [], []>} : vector<8x120xbf16>, vector<120x84xbf16>, vector<8x84xf32> -> vector<8x84xf32>
    %c1_72 = arith.constant 1 : index
    %c0_73 = arith.constant 0 : index
    %c0_74 = arith.constant 0 : index
    %173 = vector.load %arg9[%c1_72, %c0_73, %c0_74] : memref<2x1x84xf32, #tpu.memory_space<vmem>>, vector<1x1x84xf32>
    %174 = vector.shape_cast %173 : vector<1x1x84xf32> to vector<1x84xf32>
    %175 = vector.broadcast %174 : vector<1x84xf32> to vector<8x84xf32>
    %176 = arith.addf %172, %175 : vector<8x84xf32>
    %177 = arith.truncf %176 : vector<8x84xf32> to vector<8x84xbf16>
    %c1_75 = arith.constant 1 : index
    %c0_76 = arith.constant 0 : index
    %c0_77 = arith.constant 0 : index
    %178 = vector.load %arg10[%c1_75, %c0_76, %c0_77] : memref<2x84x10xbf16, #tpu.memory_space<vmem>>, vector<1x84x10xbf16>
    %179 = vector.shape_cast %178 : vector<1x84x10xbf16> to vector<84x10xbf16>
    %cst_78 = arith.constant dense<0.000000e+00> : vector<8x10xf32>
    %180 = tpu.matmul %177, %179, %cst_78 {dimension_numbers = #tpu.dot_dimension_numbers<[1], [0], [0], [1], [0, 0, 1, 1], [], []>} : vector<8x84xbf16>, vector<84x10xbf16>, vector<8x10xf32> -> vector<8x10xf32>
    %c1_79 = arith.constant 1 : index
    %c0_80 = arith.constant 0 : index
    %c0_81 = arith.constant 0 : index
    %181 = vector.load %arg11[%c1_79, %c0_80, %c0_81] : memref<2x1x10xf32, #tpu.memory_space<vmem>>, vector<1x1x10xf32>
    %182 = vector.shape_cast %181 : vector<1x1x10xf32> to vector<1x10xf32>
    %183 = vector.broadcast %182 : vector<1x10xf32> to vector<8x10xf32>
    %184 = arith.addf %180, %183 : vector<8x10xf32>
    %c1_82 = arith.constant 1 : index
    %c0_83 = arith.constant 0 : index
    %c0_84 = arith.constant 0 : index
    %185 = vector.load %arg13[%c1_82, %c0_83, %c0_84] : memref<2x8x84xf32, #tpu.memory_space<vmem>>, vector<1x8x84xf32>
    %186 = vector.shape_cast %185 : vector<1x8x84xf32> to vector<8x84xf32>
    %187 = vector.shape_cast %176 : vector<8x84xf32> to vector<1x8x84xf32>
    tpu.vector_store %arg13[%c1_82, %c0_83, %c0_84], %187 {strides = array<i32>} : memref<2x8x84xf32, #tpu.memory_space<vmem>>, vector<1x8x84xf32>,
    %c1_85 = arith.constant 1 : index
    %c0_86 = arith.constant 0 : index
    %c0_87 = arith.constant 0 : index
    %188 = vector.load %arg12[%c1_85, %c0_86, %c0_87] : memref<2x8x10xf32, #tpu.memory_space<vmem>>, vector<1x8x10xf32>
    %189 = vector.shape_cast %188 : vector<1x8x10xf32> to vector<8x10xf32>
    %190 = vector.shape_cast %184 : vector<8x10xf32> to vector<1x8x10xf32>
    tpu.vector_store %arg12[%c1_85, %c0_86, %c0_87], %190 {strides = array<i32>} : memref<2x8x10xf32, #tpu.memory_space<vmem>>, vector<1x8x10xf32>,
    return
  }
  func.func @transform_0(%arg0: i32) -> (i32, i32, i32) {
    %c0_i32 = arith.constant 0 : i32
    %c0_i32_0 = arith.constant 0 : i32
    %c0_i32_1 = arith.constant 0 : i32
    %c0_i32_2 = arith.constant 0 : i32
    return %c0_i32, %c0_i32_0, %c0_i32_1 : i32, i32, i32
  }
  func.func @transform_1(%arg0: i32) -> (i32, i32, i32) {
    %c0_i32 = arith.constant 0 : i32
    %c0_i32_0 = arith.constant 0 : i32
    %c0_i32_1 = arith.constant 0 : i32
    return %arg0, %c0_i32, %c0_i32_0 : i32, i32, i32
  }
  func.func @transform_2(%arg0: i32) -> (i32, i32, i32) {
    %c0_i32 = arith.constant 0 : i32
    %c0_i32_0 = arith.constant 0 : i32
    %c0_i32_1 = arith.constant 0 : i32
    return %arg0, %c0_i32, %c0_i32_0 : i32, i32, i32
  }
  func.func @transform_3(%arg0: i32) -> (i32, i32, i32) {
    %c0_i32 = arith.constant 0 : i32
    %c0_i32_0 = arith.constant 0 : i32
    %c0_i32_1 = arith.constant 0 : i32
    return %arg0, %c0_i32, %c0_i32_0 : i32, i32, i32
  }
  func.func @transform_4(%arg0: i32) -> (i32, i32, i32) {
    %c0_i32 = arith.constant 0 : i32
    %c0_i32_0 = arith.constant 0 : i32
    %c0_i32_1 = arith.constant 0 : i32
    return %arg0, %c0_i32, %c0_i32_0 : i32, i32, i32
  }
  func.func @transform_5(%arg0: i32) -> (i32, i32, i32) {
    %c0_i32 = arith.constant 0 : i32
    %c0_i32_0 = arith.constant 0 : i32
    %c0_i32_1 = arith.constant 0 : i32
    return %arg0, %c0_i32, %c0_i32_0 : i32, i32, i32
  }
  func.func @transform_6(%arg0: i32) -> (i32, i32, i32) {
    %c0_i32 = arith.constant 0 : i32
    %c0_i32_0 = arith.constant 0 : i32
    %c0_i32_1 = arith.constant 0 : i32
    return %arg0, %c0_i32, %c0_i32_0 : i32, i32, i32
  }
  func.func @transform_7(%arg0: i32) -> (i32, i32, i32) {
    %c0_i32 = arith.constant 0 : i32
    %c0_i32_0 = arith.constant 0 : i32
    %c0_i32_1 = arith.constant 0 : i32
    return %arg0, %c0_i32, %c0_i32_0 : i32, i32, i32
  }
  func.func @transform_8(%arg0: i32) -> (i32, i32, i32) {
    %c0_i32 = arith.constant 0 : i32
    %c0_i32_0 = arith.constant 0 : i32
    %c0_i32_1 = arith.constant 0 : i32
    return %arg0, %c0_i32, %c0_i32_0 : i32, i32, i32
  }
  func.func @transform_9(%arg0: i32) -> (i32, i32, i32) {
    %c0_i32 = arith.constant 0 : i32
    %c0_i32_0 = arith.constant 0 : i32
    %c0_i32_1 = arith.constant 0 : i32
    return %arg0, %c0_i32, %c0_i32_0 : i32, i32, i32
  }
  func.func @transform_10(%arg0: i32) -> (i32, i32, i32) {
    %c0_i32 = arith.constant 0 : i32
    %c0_i32_0 = arith.constant 0 : i32
    %c0_i32_1 = arith.constant 0 : i32
    return %arg0, %c0_i32, %c0_i32_0 : i32, i32, i32
  }
  func.func @transform_11(%arg0: i32) -> (i32, i32, i32) {
    %c0_i32 = arith.constant 0 : i32
    %c0_i32_0 = arith.constant 0 : i32
    %c0_i32_1 = arith.constant 0 : i32
    return %arg0, %c0_i32, %c0_i32_0 : i32, i32, i32
  }
  func.func @transform_12(%arg0: i32) -> (i32, i32, i32) {
    %c0_i32 = arith.constant 0 : i32
    %c0_i32_0 = arith.constant 0 : i32
    %c0_i32_1 = arith.constant 0 : i32
    return %arg0, %c0_i32, %c0_i32_0 : i32, i32, i32
  }
}

</mosaic_0001>

<bundles_post_ra>
// kernel: ensemble_forward.1
= control target key start
LH: loop header
LB: loop body
LE: loop exit
PB: predicated region body
PF: predicated region fallthrough
CT: control target
= control target key end

     0   :  { %s7672_s0 = inlined_call_operand.vmem [shape: f32[32,8,32], index: 0, kind: input, shape index: {}]   ;;  %s7673_s1 = inlined_call_operand.vmem [shape: bf16[4,160,256], index: 1, kind: input, shape index: {}]   ;;  %s7674_s2 = inlined_call_operand.vmem [shape: f32[4,1,84], index: 2, kind: input, shape index: {}]   ;;  %s7675_s3 = inlined_call_operand.vmem [shape: bf16[4,420,256], index: 3, kind: input, shape index: {}]   ;;  %s7676_s4 = inlined_call_operand.vmem [shape: f32[4,1,80], index: 4, kind: input, shape index: {}]   ;;  %s7677_s5 = inlined_call_operand.vmem [shape: bf16[4,400,120], index: 5, kind: input, shape index: {}]   ;;  %s7678_s6 = inlined_call_operand.vmem [shape: f32[4,1,120], index: 6, kind: input, shape index: {}]   ;;  %s7679_s7 = inlined_call_operand.vmem [shape: bf16[4,120,84], index: 7, kind: input, shape index: {}]   ;;  %s7680_s8 = inlined_call_operand.vmem [shape: f32[4,1,84], index: 8, kind: input, shape index: {}]   ;;  %s7681_s9 = inlined_call_operand.vmem [shape: bf16[4,84,10], index: 9, kind: input, shape index: {}]   ;;  %s7682_s10 = inlined_call_operand.vmem [shape: f32[4,1,10], index: 10, kind: input, shape index: {}]   ;;  %s7683_s11 = inlined_call_operand.hbm [shape: f32[4,8,10], index: 11, kind: output, shape index: {0}]   ;;  %s7684_s12 = inlined_call_operand.hbm [shape: f32[4,8,84], index: 12, kind: output, shape index: {1}]  }
   0x1   :  { %7703 = sst [smem:[#allocation10_spill]] %s7672_s0 }
   0x2   :  { %7704 = sst [smem:[#allocation11_spill]] %s7673_s1 }
   0x3   :  { %7705 = sst [smem:[#allocation12_spill]] %s7674_s2 }
   0x4   :  { %7706 = sst [smem:[#allocation13_spill]] %s7675_s3 }
   0x5   :  { %7707 = sst [smem:[#allocation14_spill]] %s7676_s4 }
   0x6   :  { %7708 = sst [smem:[#allocation15_spill]] %s7677_s5 }
   0x7   :  { %7709 = sst [smem:[#allocation16_spill]] %s7678_s6 }
   0x8   :  { %18 = vsyncpa [#allocation3], 0 }
   0x9   :  { %20 = vsyncpa [#allocation3 + $0x1], 0 }
   0xa   :  { %21 = vsyncpa [#allocation5], 0 }
   0xb   :  { %23 = vsyncpa [#allocation5 + $0x1], 0  ;;  %s6159_s21 = smov 0   ;;  %s6161_s22 = smov 0  }
   0xc   :  { %s6163_s23 = smov 0   ;;  %s6165_s24 = smov 0  }
   0xd LB: > { %7710 = sst [smem:[#allocation8_spill]] %s6073_s23  ;;  %s6180_s25 = sadd.s32 4294967295, %s6077_s24   ;;  %s6077_s24 = sphi %s6165_s24, %s7734_s24   ;;  %s6073_s23 = sphi %s6163_s23, %s7731_s23   ;;  %s6069_s22 = sphi %s6161_s22, %s7733_s22   ;;  %s6065_s21 = sphi %s6159_s21, %s7732_s21  }
   0xe   : > { %s4600_s26 = sadd.s32 4294967294, %s6077_s24   ;;  %s6184_s27 = sadd.s32 1, %s6077_s24  }
   0xf   : > { %s317_s28 = sadd.s32 1, %s6073_s23  ;;  %s314_s29 = ssub.s32 %s6077_s24, %s6184_s27 }
  0x10   : > { %p327_p0 = scmp.ne.s32.totalorder %s6073_s23, %s6069_s22  ;;  %p315_p1 = scmp.eq.s32.totalorder %s314_s29, 0 }
  0x11   : > { %p328_p2 = scmp.eq.s32.totalorder %s6180_s25, 1  ;;  %p333_p3 = scmp.ne.s32.totalorder %s6069_s22, %s6065_s21 }
  0x12   : > { %p334_p4 = scmp.eq.s32.totalorder %s4600_s26, 1  ;;  %p4603_p7 = scmp.ge.s32.totalorder %s6077_s24, 1 }
  0x13   : > { %s6195_s30 = scalar_select %p315_p1, %s6073_s23, %s317_s28  }
  0x14   : > { %p6197_p5 = por %p328_p2, %p327_p0  ;;  %p6201_p6 = por %p334_p4, %p333_p3 }
  0x15   : > { %7711 = sst [smem:[#allocation9_spill]] %s6195_s30  ;;  %p471_p8 = scmp.lt.s32.totalorder %s6077_s24, 3 }
  0x17   : > { %p472_p9 = pnand %p4603_p7, %p471_p8 }
  0x18   : > { %s7714_s0 = sld [smem:[#allocation10_spill]] (!%p472_p9)  ;;  %s4606_s29 = sshll.u32 (!%p472_p9), %s6180_s25, 1 }
  0x19   : > { %475 = sbr.rel (%p472_p9) target bundleno = 2785 (0xae1), region = 64  ;;  %p564_p10 = scmp.lt.s32.totalorder (!%p472_p9), %s4606_s29, 3 }
  0x1a   : > { %s7689_s15 = smov (!%p472_p9), 32   ;;  %s7685_s16 = smov (!%p472_p9), 96  }
  0x1b   : > { %s7687_s28 = smov (!%p472_p9), 64   ;;  %s7715_s1 = sld [smem:[#allocation11_spill]] (!%p472_p9) }
  0x1c   : > { %s7716_s17 = smov (!%p472_p9), 96   ;;  %s7718_s3 = sld [smem:[#allocation13_spill]] (!%p472_p9) }
  0x1d   : > { %s7720_s5 = sld [smem:[#allocation15_spill]] (!%p472_p9)  ;;  %s7698_s18 = smov (!%p472_p9), 40  }
  0x1e   : > { %v6210_v0 = vld [vmem:[%s7714_s0 + $0x8] sm:$0xff]  ;;  %v6215_v1 = vld [vmem:[%s7714_s0 + $0x10] sm:$0xff]  ;;  %v6220_v2 = vld [vmem:[%s7714_s0 + $0x18] sm:$0xff]  ;;  %s7736_s29 = smov (!%p564_p10, %s4606_s29), 3  ;;  %vm940_vm0 = vcmask 261120   ;;  %vm969_vm1 = vcmask 523264  }
  0x1f   : > { %v5279_v3 = vpack.i.bf16 %v6215_v1, %v6210_v0  ;;  %v6227_v4 = vld [vmem:[%s7714_s0 + $0x20] sm:$0xff]  ;;  %v5284_v6 = vpack.i.bf16 %v6220_v2, %v6215_v1  ;;  %v6239_v7 = vld [vmem:[%s7714_s0 + $0x28] sm:$0xff]  ;;  %v6246_v8 = vld [vmem:[%s7714_s0 + $0x30] sm:$0xff]  ;;  %s5217_s26 = smul.u32 160, %s7736_s29  ;;  %vm998_vm2 = vcmask 785408   ;;  %s7721_s2 = sld [smem:[#allocation12_spill]] }
  0x20   : > { %v5289_v5 = vpack.i.bf16 %v6227_v4, %v6220_v2  ;;  %v5299_v9 = vpack.i.bf16 %v6239_v7, %v6227_v4  ;;  %v5304_v10 = vpack.i.bf16 %v6246_v8, %v6239_v7  ;;  %v6258_v11 = vld [vmem:[%s7714_s0 + $0x38] sm:$0xff]  ;;  %v6271_v15 = vpack.c.bf16 %v6239_v7, %v6227_v4  ;;  %v6279_v17 = vld [vmem:[%s7714_s0 + $0x40] sm:$0xff]  ;;  %v6291_v21 = vld [vmem:[%s7714_s0 + $0x48] sm:$0xff]  ;;  %s5218_s19 = smul.u32 424, %s7736_s29  ;;  %s7722_s4 = sld [smem:[#allocation14_spill]] }
  0x21   : > { %5280 = vrot.lane.b32.xlu0 %v5279_v3, %s7689_s15  ;;  %v5314_v16 = vpack.i.bf16 %v6258_v11, %v6246_v8  ;;  %v5319_v20 = vpack.i.bf16 %v6279_v17, %v6258_v11  ;;  %v6298_v23 = vld [vmem:[%s7714_s0 + $0x50] sm:$0xff]  ;;  %v5329_v25 = vpack.i.bf16 %v6291_v21, %v6279_v17  ;;  %v6311_v27 = vld [vmem:[%s7714_s0 + $0x58] sm:$0xff]  ;;  %v6318_v30 = vld [vmem:[%s7714_s0 + $0x60] sm:$0xff]  ;;  %s5219_s30 = smul.u32 200, %s7736_s29  ;;  %vm1611_vm3 = vcmask 326656   ;;  %s7723_s6 = sld [smem:[#allocation16_spill]] }
  0x22   : > { %5290 = vrot.lane.b32.xlu1 %v5289_v5, %s7685_s16  ;;  %s6263_s16 = scalar_lea.vmem %s7715_s1, %s5217_s26  ;;  %4641 = vmatprep.mubr.msk.bf16.mxu0 %vm940_vm0, %v6271_v15  ;;  %v5334_v26 = vpack.i.bf16 %v6298_v23, %v6291_v21  ;;  %s6324_s23 = scalar_lea.vmem %s7718_s3, %s5218_s19  ;;  %v5344_v33 = vpack.i.bf16 %v6311_v27, %v6298_v23  ;;  %v6334_v34 = vld [vmem:[%s7714_s0 + $0x68] sm:$0xff]  ;;  %v5349_v36 = vpack.i.bf16 %v6318_v30, %v6311_v27  ;;  %v6343_v37 = vld [vmem:[%s7714_s0 + $0x70] sm:$0xff]  ;;  %v6354_v41 = vld [vmem:[%s7714_s0 + $0x78] sm:$0xff]  ;;  %vm1600_vm4 = vcmask 687104  }
  0x23   : > { %v5689_v12 = vld [vmem:[%s6263_s16 + $0x74] ss:$8 sps:$4 sm:$0xff]   ;;  %v5691_v13 = vld [vmem:[%s6263_s16 + $0x70] ss:$8 sps:$4 sm:$0xff]   ;;  %v5692_v14 = vld [vmem:[%s6263_s16 + $0x64] ss:$8 sps:$4 sm:$0xff]   ;;  %v5359_v40 = vpack.i.bf16 %v6334_v34, %v6318_v30  ;;  %v5364_v43 = vpack.i.bf16 %v6343_v37, %v6334_v34  ;;  %v5374_v47 = vpack.i.bf16 %v6354_v41, %v6343_v37  ;;  %s6391_s19 = scalar_lea.vmem %s7720_s5, %s5219_s30 }
  0x24   : > { %1217 = vmatprep.subr.bf16.mxu0 %v5689_v12  ;;  %v5694_v18 = vld [vmem:[%s6263_s16 + $0x60] ss:$8 sps:$4 sm:$0xff]   ;;  %v5695_v19 = vld [vmem:[%s6263_s16 + $0x54] ss:$8 sps:$4 sm:$0xff]   ;;  %v5697_v22 = vld [vmem:[%s6263_s16 + $0x50] ss:$8 sps:$4 sm:$0xff]  }
  0x25   : > { %5285 = vrot.lane.b32.xlu0 %v5284_v6, %s7687_s28  ;;  %1218 = vmatpush1.bf16.msra.mxu0 %v5691_v13  ;;  %v5698_v24 = vld [vmem:[%s6263_s16 + $0x44] ss:$8 sps:$4 sm:$0xff]   ;;  %v5700_v28 = vld [vmem:[%s6263_s16 + $0x40] ss:$8 sps:$4 sm:$0xff]   ;;  %v5701_v29 = vld [vmem:[%s6263_s16 + $0x34] ss:$8 sps:$4 sm:$0xff]   ;;  %s6771_s20 = scalar_lea.vmem %s7721_s2, %s7736_s29  ;;  %s7135_s2 = scalar_lea.vmem %s7680_s8, %s7736_s29 }
  0x26   : > { %5295 = vrot.lane.b32.xlu1 %v5289_v5, %s7689_s15  ;;  %1219 = vmatprep.subr.bf16.mxu0 %v5692_v14  ;;  %v5703_v31 = vld [vmem:[%s6263_s16 + $0x30] ss:$8 sps:$4 sm:$0xff]   ;;  %v5704_v32 = vld [vmem:[%s6263_s16 + $0x24] ss:$8 sps:$4 sm:$0xff]   ;;  %v5706_v35 = vld [vmem:[%s6263_s16 + $0x20] ss:$8 sps:$4 sm:$0xff]  }
  0x27   : > { %s7719_s1 = smov 32   ;;  %v5707_v38 = vld [vmem:[%s6263_s16 + $0x14] ss:$8 sps:$4 sm:$0xff]   ;;  %v5709_v39 = vld [vmem:[%s6263_s16 + $0x10] ss:$8 sps:$4 sm:$0xff]   ;;  %v6363_v44 = vld [vmem:[%s7714_s0 + $0x80] sm:$0xff] }
  0x28   : > { %v5710_v42 = vld [vmem:[%s6263_s16 + $0x4] ss:$8 sps:$4 sm:$0xff]   ;;  %v5712_v45 = vld [vmem:[%s6263_s16] ss:$8 sps:$4 sm:$0xff]   ;;  %v5713_v46 = vld [vmem:[%s6263_s16 + $0x94] ss:$8 sps:$4 sm:$0xff]   ;;  %v5379_v50 = vpack.i.bf16 %v6363_v44, %v6354_v41 }
  0x29   : > { %5300 = vrot.lane.b32.xlu0 %v5299_v9, %s7687_s28  ;;  %1220 = vmatpush1.bf16.msra.mxu0 %v5694_v18  ;;  %v6375_v48 = vld [vmem:[%s7714_s0 + $0x88] sm:$0xff]  ;;  %v5715_v49 = vld [vmem:[%s6263_s16 + $0x90] ss:$8 sps:$4 sm:$0xff]   ;;  %v6408_v57 = vld [vmem:[%s7714_s0 + $0xa0] sm:$0xff]  ;;  %s7700_s26 = smov 84   ;;  %s7696_s3 = smov 80  }
  0x2a   : > { %5305 = vrot.lane.b32.xlu1 %v5304_v10, %s7716_s17  ;;  %1221 = vmatprep.subr.bf16.mxu0 %v5695_v19  ;;  %v6384_v51 = vld [vmem:[%s7714_s0 + $0x90] sm:$0xff]  ;;  %v5716_v52 = vld [vmem:[%s6263_s16 + $0x84] ss:$8 sps:$4 sm:$0xff]   ;;  %v5718_v53 = vld [vmem:[%s6263_s16 + $0x80] ss:$8 sps:$4 sm:$0xff]   ;;  %v5389_v54 = vpack.i.bf16 %v6375_v48, %v6363_v44  ;;  %vm1622_vm5 = vcmask 1014784  }
  0x2b   : > { %v6400_v55 = vld [vmem:[%s7714_s0 + $0x98] sm:$0xff]  ;;  %v5394_v56 = vpack.i.bf16 %v6384_v51, %v6375_v48  ;;  %v6417_v59 = vld [vmem:[%s7714_s0 + $0xa8] sm:$0xff]  ;;  %v6425_v61 = vld [vmem:[%s7714_s0 + $0xb0] sm:$0xff]  ;;  %vm1998_vm6 = vcmask 1041408   ;;  %vm1633_vm7 = vcmask 654336   ;;  %vm1982_vm8 = vcmask 293888  }
  0x2c   : > { %v5404_v58 = vpack.i.bf16 %v6400_v55, %v6384_v51  ;;  %v5409_v60 = vpack.i.bf16 %v6408_v57, %v6400_v55  ;;  %v5419_v62 = vpack.i.bf16 %v6417_v59, %v6408_v57  ;;  %v6434_v63 = vld [vmem:[%s7714_s0 + $0xb8] sm:$0xff]  ;;  %v5424_v3 = vpack.i.bf16 %v6425_v61, %v6417_v59  ;;  %v6442_v5 = vld [vmem:[%s7714_s0 + $0xc0] sm:$0xff]  ;;  %v6451_v9 = vld [vmem:[%s7714_s0 + $0xc8] sm:$0xff]  ;;  %s5220_s30 = smul.u32 60, %s7736_s29 }
  0x2d   : > { %5310 = vrot.lane.b32.xlu0 %v5304_v10, %s7689_s15  ;;  %1222 = vmatpush1.bf16.msra.mxu0 %v5697_v22  ;;  %v5434_v6 = vpack.i.bf16 %v6434_v63, %v6425_v61  ;;  %v5439_v10 = vpack.i.bf16 %v6442_v5, %v6434_v63  ;;  %v6459_v12 = vld [vmem:[%s7714_s0 + $0xd0] sm:$0xff]  ;;  %v5449_v13 = vpack.i.bf16 %v6451_v9, %v6442_v5  ;;  %v6468_v14 = vld [vmem:[%s7714_s0 + $0xd8] sm:$0xff]  ;;  %v6476_v18 = vld [vmem:[%s7714_s0 + $0xe0] sm:$0xff]  ;;  %vm2221_vm9 = vcmask 916480  }
  0x2e   : > { %5315 = vrot.lane.b32.xlu1 %v5314_v16, %s7687_s28  ;;  %1223 = vmatprep.subr.bf16.mxu0 %v5698_v24  ;;  %v5454_v16 = vpack.i.bf16 %v6459_v12, %v6451_v9  ;;  %v5464_v19 = vpack.i.bf16 %v6468_v14, %v6459_v12  ;;  %v5469_v22 = vpack.i.bf16 %v6476_v18, %v6468_v14  ;;  %v6493_v24 = vld [vmem:[%s7714_s0 + $0xf0] sm:$0xff]  ;;  %s7702_s28 = smov 112   ;;  %vm2592_vm10 = vcmask 1043456  }
  0x2f   : > { %vm2435_vm11 = vcmask 130048   ;;  %vm6089_vm12 = vmmov 0   ;;  %vm2588_vm13 = vcmask 982016   ;;  %vm2735_vm14 = vcmask 80896  }
  0x31   : > { %5320 = vrot.lane.b32.xlu0 %v5319_v20, %s7716_s17  ;;  %1224 = vmatpush1.bf16.msra.mxu0 %v5700_v28 }
  0x32   : > { %5325 = vrot.lane.b32.xlu1 %v5319_v20, %s7689_s15  ;;  %s7717_s15 = smov 64   ;;  %1225 = vmatprep.subr.bf16.mxu0 %v5701_v29  ;;  %v6485_v20 = vld [vmem:[%s7714_s0 + $0xe8] sm:$0xff] }
  0x35   : > { %5330 = vrot.lane.b32.xlu0 %v5329_v25, %s7717_s15  ;;  %1226 = vmatpush1.bf16.msra.mxu0 %v5703_v31  ;;  %v5479_v25 = vpack.i.bf16 %v6485_v20, %v6476_v18 }
  0x36   : > { %5335 = vrot.lane.b32.xlu1 %v5334_v26, %s7716_s17  ;;  %1227 = vmatprep.subr.bf16.mxu0 %v5704_v32 }
  0x39   : > { %5340 = vrot.lane.b32.xlu0 %v5334_v26, %s7719_s1  ;;  %1228 = vmatpush1.bf16.msra.mxu0 %v5706_v35  ;;  %v5484_v26 = vpack.i.bf16 %v6493_v24, %v6485_v20 }
  0x3a   : > { %5345 = vrot.lane.b32.xlu1 %v5344_v33, %s7717_s15  ;;  %1229 = vmatprep.subr.bf16.mxu0 %v5707_v38  ;;  %v626_v33 = vld [vmem:[%s7714_s0] sm:$0xff] }
  0x3d   : > { %5350 = vrot.lane.b32.xlu0 %v5349_v36, %s7716_s17  ;;  %1230 = vmatpush1.bf16.msra.mxu0 %v5709_v39 }
  0x3e   : > { %5355 = vrot.lane.b32.xlu1 %v5349_v36, %s7719_s1  ;;  %1231 = vmatprep.subr.bf16.mxu0 %v5710_v42 }
  0x41   : > { %5360 = vrot.lane.b32.xlu0 %v5359_v40, %s7717_s15  ;;  %1232 = vmatpush1.bf16.msra.mxu0 %v5712_v45 }
  0x42   : > { %5365 = vrot.lane.b32.xlu1 %v5364_v43, %s7716_s17  ;;  %1245 = vmatprep.subr.bf16.mxu0 %v5713_v46 }
  0x45   : > { %5370 = vrot.lane.b32.xlu0 %v5364_v43, %s7719_s1  ;;  %1246 = vmatpush2.bf16.msra.mxu0 %v5715_v49 }
  0x46   : > { %5375 = vrot.lane.b32.xlu1 %v5374_v47, %s7717_s15  ;;  %1247 = vmatprep.subr.bf16.mxu0 %v5716_v52  ;;  %v6514_v52 = vpack.c.bf16 %v6258_v11, %v6246_v8 }
  0x49   : > { %5380 = vrot.lane.b32.xlu0 %v5379_v50, %s7716_s17  ;;  %1248 = vmatpush2.bf16.msra.mxu0 %v5718_v53 }
  0x4a   : > { %5385 = vrot.lane.b32.xlu1 %v5379_v50, %s7719_s1 }
  0x4d   : > { %5390 = vrot.lane.b32.xlu0 %v5389_v54, %s7717_s15 }
  0x4e   : > { %5395 = vrot.lane.b32.xlu1 %v5394_v56, %s7716_s17 }
  0x51   : > { %5400 = vrot.lane.b32.xlu0 %v5394_v56, %s7719_s1 }
  0x52   : > { %5405 = vrot.lane.b32.xlu1 %v5404_v58, %s7717_s15 }
  0x55   : > { %5410 = vrot.lane.b32.xlu0 %v5409_v60, %s7716_s17 }
  0x56   : > { %5415 = vrot.lane.b32.xlu1 %v5409_v60, %s7719_s1 }
  0x59   : > { %5420 = vrot.lane.b32.xlu0 %v5419_v62, %s7717_s15 }
  0x5a   : > { %5425 = vrot.lane.b32.xlu1 %v5424_v3, %s7716_s17 }
  0x5d   : > { %5430 = vrot.lane.b32.xlu0 %v5424_v3, %s7719_s1 }
  0x5e   : > { %5435 = vrot.lane.b32.xlu1 %v5434_v6, %s7717_s15 }
  0x61   : > { %5440 = vrot.lane.b32.xlu0 %v5439_v10, %s7716_s17 }
  0x62   : > { %5445 = vrot.lane.b32.xlu1 %v5439_v10, %s7719_s1 }
  0x65   : > { %5450 = vrot.lane.b32.xlu0 %v5449_v13, %s7717_s15 }
  0x66   : > { %5455 = vrot.lane.b32.xlu1 %v5454_v16, %s7716_s17 }
  0x69   : > { %5460 = vrot.lane.b32.xlu0 %v5454_v16, %s7719_s1 }
  0x6a   : > { %5465 = vrot.lane.b32.xlu1 %v5464_v19, %s7717_s15 }
  0x6d   : > { %5470 = vrot.lane.b32.xlu0 %v5469_v22, %s7716_s17 }
  0x6e   : > { %5475 = vrot.lane.b32.xlu1 %v5469_v22, %s7719_s1 }
  0x71   : > { %5480 = vrot.lane.b32.xlu0 %v5479_v25, %s7717_s15 }
  0x72   : > { %5485 = vrot.lane.b32.xlu1 %v5484_v26, %s7716_s17  ;;  %s7692_s17 = smov 124  }
  0x93   : > { %v5281_v28 = vpop.permute.xlu0 %5280 }
  0x94   : > { %v5291_v29 = vpop.permute.xlu1 %5290  ;;  %v5283_v31 = vunpack.i.h.bf16 %v5281_v28  ;;  %v5282_v32 = vunpack.i.l.bf16 %v5281_v28 }
  0x95   : > { %v5293_v35 = vunpack.i.h.bf16 %v5291_v29  ;;  %v5292_v36 = vunpack.i.l.bf16 %v5291_v29 }
  0x96   : > { %v942_v43 = vsel %vm940_vm0, %v6210_v0, %v5283_v31  ;;  %v941_v45 = vsel %vm940_vm0, %v626_v33, %v5282_v32 }
  0x97   : > { %v5286_v38 = vpop.permute.xlu0 %5285 }
  0x98   : > { %v5288_v39 = vunpack.i.h.bf16 %v5286_v38  ;;  %v5287_v40 = vunpack.i.l.bf16 %v5286_v38  ;;  %v5296_v42 = vpop.permute.xlu1 %5295 }
  0x99   : > { %v5298_v46 = vunpack.i.h.bf16 %v5296_v42  ;;  %v5297_v47 = vunpack.i.l.bf16 %v5296_v42 }
  0x9a   : > { %v970_v49 = vsel %vm969_vm1, %v941_v45, %v5287_v40  ;;  %v971_v50 = vsel %vm969_vm1, %v942_v43, %v5288_v39 }
  0x9b   : > { %v944_v53 = vsel %vm940_vm0, %v6220_v2, %v5298_v46  ;;  %v943_v54 = vsel %vm940_vm0, %v6215_v1, %v5297_v47  ;;  %v5301_v56 = vpop.permute.xlu0 %5300  ;;  %v999_v0 = vsel %vm998_vm2, %v970_v49, %v5292_v36  ;;  %v1000_v58 = vsel %vm998_vm2, %v971_v50, %v5293_v35 }
  0x9c   : > { %v5303_v60 = vunpack.i.h.bf16 %v5301_v56  ;;  %v5302_v62 = vunpack.i.l.bf16 %v5301_v56  ;;  %v5306_v3 = vpop.permute.xlu1 %5305  ;;  %v6522_v6 = vpack.c.bf16 %v1000_v58, %v999_v0  ;;  %v6537_v36 = vpack.c.bf16 %v6291_v21, %v6279_v17 }
  0x9d   : > { %v5308_v10 = vunpack.i.h.bf16 %v5306_v3  ;;  %v5307_v13 = vunpack.i.l.bf16 %v5306_v3 }
  0x9e   : > { %v973_v16 = vsel %vm969_vm1, %v944_v53, %v5303_v60  ;;  %v972_v19 = vsel %vm969_vm1, %v943_v54, %v5302_v62  ;;  %1250 = vmatmul.mubr.bf16.vlgmr.msra.gmra.mxu0 %v6522_v6  ;;  %v6554_v60 = vpack.c.bf16 %v6311_v27, %v6298_v23 }
  0x9f   : > { %v5311_v2 = vpop.permute.xlu0 %5310  ;;  %4642 = vmatprep.mubr.msk.bf16.mxu0 %vm940_vm0, %v6514_v52  ;;  %v1001_v26 = vsel %vm998_vm2, %v972_v19, %v5307_v13  ;;  %v1002_v28 = vsel %vm998_vm2, %v973_v16, %v5308_v10 }
  0xa0   : > { %v5313_v1 = vunpack.i.h.bf16 %v5311_v2  ;;  %v5312_v22 = vunpack.i.l.bf16 %v5311_v2  ;;  %v5316_v25 = vpop.permute.xlu1 %5315  ;;  %v6539_v38 = vpack.c.bf16 %v1002_v28, %v1001_v26 }
  0xa1   : > { %v5318_v29 = vunpack.i.h.bf16 %v5316_v25  ;;  %v5317_v31 = vunpack.i.l.bf16 %v5316_v25 }
  0xa2   : > { %v946_v32 = vsel %vm940_vm0, %v6239_v7, %v5313_v1  ;;  %v945_v33 = vsel %vm940_vm0, %v6227_v4, %v5312_v22 }
  0xa3   : > { %v5321_v35 = vpop.permute.xlu0 %5320  ;;  %v974_v43 = vsel %vm969_vm1, %v945_v33, %v5317_v31  ;;  %v975_v45 = vsel %vm969_vm1, %v946_v32, %v5318_v29  ;;  %v6571_v31 = vpack.c.bf16 %v6334_v34, %v6318_v30 }
  0xa4   : > { %v5326_v39 = vpop.permute.xlu1 %5325  ;;  %v5323_v40 = vunpack.i.h.bf16 %v5321_v35  ;;  %v5322_v42 = vunpack.i.l.bf16 %v5321_v35 }
  0xa5   : > { %v5328_v7 = vunpack.i.h.bf16 %v5326_v39  ;;  %v5327_v46 = vunpack.i.l.bf16 %v5326_v39 }
  0xa6   : > { %1260 = vmatmul.mubr.bf16.gmra.mxu0 %v6539_v38  ;;  %v1003_v4 = vsel %vm998_vm2, %v974_v43, %v5322_v42  ;;  %v1004_v49 = vsel %vm998_vm2, %v975_v45, %v5323_v40 }
  0xa7   : > { %v5331_v47 = vpop.permute.xlu0 %5330  ;;  %4643 = vmatprep.mubr.msk.bf16.mxu0 %vm940_vm0, %v6537_v36  ;;  %v948_v56 = vsel %vm940_vm0, %v6258_v11, %v5328_v7  ;;  %v947_v0 = vsel %vm940_vm0, %v6246_v8, %v5327_v46  ;;  %v6556_v62 = vpack.c.bf16 %v1004_v49, %v1003_v4 }
  0xa8   : > { %v5333_v50 = vunpack.i.h.bf16 %v5331_v47  ;;  %v5332_v53 = vunpack.i.l.bf16 %v5331_v47  ;;  %v5336_v54 = vpop.permute.xlu1 %5335 }
  0xa9   : > { %v5338_v3 = vunpack.i.h.bf16 %v5336_v54  ;;  %v5337_v10 = vunpack.i.l.bf16 %v5336_v54  ;;  %v6588_v54 = vpack.c.bf16 %v6354_v41, %v6343_v37 }
  0xaa   : > { %v977_v13 = vsel %vm969_vm1, %v948_v56, %v5333_v50  ;;  %v976_v16 = vsel %vm969_vm1, %v947_v0, %v5332_v53 }
  0xab   : > { %v5341_v58 = vpop.permute.xlu0 %5340  ;;  %v1005_v1 = vsel %vm998_vm2, %v976_v16, %v5337_v10  ;;  %v1006_v22 = vsel %vm998_vm2, %v977_v13, %v5338_v3 }
  0xac   : > { %v5346_v19 = vpop.permute.xlu1 %5345  ;;  %v5343_v11 = vunpack.i.h.bf16 %v5341_v58  ;;  %v5342_v2 = vunpack.i.l.bf16 %v5341_v58  ;;  %v6573_v32 = vpack.c.bf16 %v1006_v22, %v1005_v1 }
  0xad   : > { %v5348_v25 = vunpack.i.h.bf16 %v5346_v19  ;;  %v5347_v26 = vunpack.i.l.bf16 %v5346_v19 }
  0xae   : > { %1270 = vmatmul.mubr.bf16.gmra.mxu0 %v6556_v62  ;;  %v950_v28 = vsel %vm940_vm0, %v6291_v21, %v5343_v11  ;;  %v949_v29 = vsel %vm940_vm0, %v6279_v17, %v5342_v2 }
  0xaf   : > { %4644 = vmatprep.mubr.msk.bf16.mxu0 %vm940_vm0, %v6554_v60  ;;  %v5351_v8 = vpop.permute.xlu0 %5350  ;;  %v978_v42 = vsel %vm969_vm1, %v949_v29, %v5347_v26  ;;  %v979_v43 = vsel %vm969_vm1, %v950_v28, %v5348_v25  ;;  %v6605_v25 = vpack.c.bf16 %v6375_v48, %v6363_v44 }
  0xb0   : > { %v5356_v33 = vpop.permute.xlu1 %5355  ;;  %v5353_v35 = vunpack.i.h.bf16 %v5351_v8  ;;  %v5352_v39 = vunpack.i.l.bf16 %v5351_v8 }
  0xb1   : > { %v5358_v21 = vunpack.i.h.bf16 %v5356_v33  ;;  %v5357_v45 = vunpack.i.l.bf16 %v5356_v33 }
  0xb2   : > { %v1007_v17 = vsel %vm998_vm2, %v978_v42, %v5352_v39  ;;  %v1008_v7 = vsel %vm998_vm2, %v979_v43, %v5353_v35 }
  0xb3   : > { %v5361_v40 = vpop.permute.xlu0 %5360  ;;  %v952_v49 = vsel %vm940_vm0, %v6311_v27, %v5358_v21  ;;  %v951_v50 = vsel %vm940_vm0, %v6298_v23, %v5357_v45  ;;  %v6590_v56 = vpack.c.bf16 %v1008_v7, %v1007_v17 }
  0xb4   : > { %v5363_v46 = vunpack.i.h.bf16 %v5361_v40  ;;  %v5362_v47 = vunpack.i.l.bf16 %v5361_v40  ;;  %v5366_v4 = vpop.permute.xlu1 %5365 }
  0xb5   : > { %v5368_v0 = vunpack.i.h.bf16 %v5366_v4  ;;  %v5367_v58 = vunpack.i.l.bf16 %v5366_v4  ;;  %v6622_v4 = vpack.c.bf16 %v6400_v55, %v6384_v51 }
  0xb6   : > { %1280 = vmatmul.mubr.bf16.gmra.mxu0 %v6573_v32  ;;  %v981_v3 = vsel %vm969_vm1, %v952_v49, %v5363_v46  ;;  %v980_v10 = vsel %vm969_vm1, %v951_v50, %v5362_v47 }
  0xb7   : > { %4645 = vmatprep.mubr.msk.bf16.mxu0 %vm940_vm0, %v6571_v31  ;;  %v5371_v53 = vpop.permute.xlu0 %5370  ;;  %v1009_v19 = vsel %vm998_vm2, %v980_v10, %v5367_v58  ;;  %v1010_v11 = vsel %vm998_vm2, %v981_v3, %v5368_v0 }
  0xb8   : > { %v5376_v13 = vpop.permute.xlu1 %5375  ;;  %v5373_v27 = vunpack.i.h.bf16 %v5371_v53  ;;  %v5372_v16 = vunpack.i.l.bf16 %v5371_v53  ;;  %v6607_v26 = vpack.c.bf16 %v1010_v11, %v1009_v19 }
  0xb9   : > { %v5378_v2 = vunpack.i.h.bf16 %v5376_v13  ;;  %v5377_v8 = vunpack.i.l.bf16 %v5376_v13 }
  0xba   : > { %v954_v1 = vsel %vm940_vm0, %v6334_v34, %v5373_v27  ;;  %v953_v22 = vsel %vm940_vm0, %v6318_v30, %v5372_v16 }
  0xbb   : > { %v5381_v23 = vpop.permute.xlu0 %5380  ;;  %v982_v39 = vsel %vm969_vm1, %v953_v22, %v5377_v8  ;;  %v983_v40 = vsel %vm969_vm1, %v954_v1, %v5378_v2  ;;  %v6639_v2 = vpack.c.bf16 %v6417_v59, %v6408_v57 }
  0xbc   : > { %v5386_v28 = vpop.permute.xlu1 %5385  ;;  %v5383_v29 = vunpack.i.h.bf16 %v5381_v23  ;;  %v5382_v33 = vunpack.i.l.bf16 %v5381_v23 }
  0xbd   : > { %v5388_v34 = vunpack.i.h.bf16 %v5386_v28  ;;  %v5387_v42 = vunpack.i.l.bf16 %v5386_v28 }
  0xbe   : > { %1290 = vmatmul.mubr.bf16.gmra.mxu0 %v6590_v56  ;;  %v1011_v30 = vsel %vm998_vm2, %v982_v39, %v5382_v33  ;;  %v1012_v43 = vsel %vm998_vm2, %v983_v40, %v5383_v29 }
  0xbf   : > { %4646 = vmatprep.mubr.msk.bf16.mxu0 %vm940_vm0, %v6588_v54  ;;  %v5391_v35 = vpop.permute.xlu0 %5390  ;;  %v956_v7 = vsel %vm940_vm0, %v6354_v41, %v5388_v34  ;;  %v955_v46 = vsel %vm940_vm0, %v6343_v37, %v5387_v42  ;;  %v6624_v49 = vpack.c.bf16 %v1012_v43, %v1011_v30 }
  0xc0   : > { %v5393_v21 = vunpack.i.h.bf16 %v5391_v35  ;;  %v5392_v45 = vunpack.i.l.bf16 %v5391_v35  ;;  %v5396_v17 = vpop.permute.xlu1 %5395 }
  0xc1   : > { %v5398_v50 = vunpack.i.h.bf16 %v5396_v17  ;;  %v5397_v53 = vunpack.i.l.bf16 %v5396_v17  ;;  %v6656_v17 = vpack.c.bf16 %v6434_v63, %v6425_v61 }
  0xc2   : > { %v985_v0 = vsel %vm969_vm1, %v956_v7, %v5393_v21  ;;  %v984_v58 = vsel %vm969_vm1, %v955_v46, %v5392_v45 }
  0xc3   : > { %v5401_v47 = vpop.permute.xlu0 %5400  ;;  %v1013_v13 = vsel %vm998_vm2, %v984_v58, %v5397_v53  ;;  %v1014_v27 = vsel %vm998_vm2, %v985_v0, %v5398_v50 }
  0xc4   : > { %v5406_v3 = vpop.permute.xlu1 %5405  ;;  %v5403_v41 = vunpack.i.h.bf16 %v5401_v47  ;;  %v5402_v10 = vunpack.i.l.bf16 %v5401_v47  ;;  %v6641_v8 = vpack.c.bf16 %v1014_v27, %v1013_v13 }
  0xc5   : > { %v5408_v16 = vunpack.i.h.bf16 %v5406_v3  ;;  %v5407_v23 = vunpack.i.l.bf16 %v5406_v3 }
  0xc6   : > { %1300 = vmatmul.mubr.bf16.gmra.mxu0 %v6607_v26  ;;  %v958_v19 = vsel %vm940_vm0, %v6375_v48, %v5403_v41  ;;  %v957_v11 = vsel %vm940_vm0, %v6363_v44, %v5402_v10 }
  0xc7   : > { %4647 = vmatprep.mubr.msk.bf16.mxu0 %vm940_vm0, %v6605_v25  ;;  %v5411_v37 = vpop.permute.xlu0 %5410  ;;  %v986_v33 = vsel %vm969_vm1, %v957_v11, %v5407_v23  ;;  %v987_v35 = vsel %vm969_vm1, %v958_v19, %v5408_v16  ;;  %v6673_v16 = vpack.c.bf16 %v6451_v9, %v6442_v5 }
  0xc8   : > { %v5416_v1 = vpop.permute.xlu1 %5415  ;;  %v5413_v22 = vunpack.i.h.bf16 %v5411_v37  ;;  %v5412_v28 = vunpack.i.l.bf16 %v5411_v37 }
  0xc9   : > { %v5418_v48 = vunpack.i.h.bf16 %v5416_v1  ;;  %v5417_v39 = vunpack.i.l.bf16 %v5416_v1 }
  0xca   : > { %v1015_v44 = vsel %vm998_vm2, %v986_v33, %v5412_v28  ;;  %v1016_v40 = vsel %vm998_vm2, %v987_v35, %v5413_v22 }
  0xcb   : > { %v5421_v29 = vpop.permute.xlu0 %5420  ;;  %v960_v43 = vsel %vm940_vm0, %v6400_v55, %v5418_v48  ;;  %v959_v21 = vsel %vm940_vm0, %v6384_v51, %v5417_v39  ;;  %v6658_v7 = vpack.c.bf16 %v1016_v40, %v1015_v44 }
  0xcc   : > { %v5423_v34 = vunpack.i.h.bf16 %v5421_v29  ;;  %v5422_v42 = vunpack.i.l.bf16 %v5421_v29  ;;  %v5426_v30 = vpop.permute.xlu1 %5425 }
  0xcd   : > { %v5428_v46 = vunpack.i.h.bf16 %v5426_v30  ;;  %v5427_v47 = vunpack.i.l.bf16 %v5426_v30  ;;  %v6690_v30 = vpack.c.bf16 %v6468_v14, %v6459_v12 }
  0xce   : > { %1310 = vmatmul.mubr.bf16.gmra.mxu0 %v6624_v49  ;;  %v989_v50 = vsel %vm969_vm1, %v960_v43, %v5423_v34  ;;  %v988_v53 = vsel %vm969_vm1, %v959_v21, %v5422_v42 }
  0xcf   : > { %4648 = vmatprep.mubr.msk.bf16.mxu0 %vm940_vm0, %v6622_v4  ;;  %v5431_v45 = vpop.permute.xlu0 %5430  ;;  %v1017_v3 = vsel %vm998_vm2, %v988_v53, %v5427_v47  ;;  %v1018_v41 = vsel %vm998_vm2, %v989_v50, %v5428_v46 }
  0xd0   : > { %v5436_v0 = vpop.permute.xlu1 %5435  ;;  %v5433_v55 = vunpack.i.h.bf16 %v5431_v45  ;;  %v5432_v58 = vunpack.i.l.bf16 %v5431_v45  ;;  %v6675_v23 = vpack.c.bf16 %v1018_v41, %v1017_v3 }
  0xd1   : > { %v5438_v10 = vunpack.i.h.bf16 %v5436_v0  ;;  %v5437_v37 = vunpack.i.l.bf16 %v5436_v0 }
  0xd2   : > { %v962_v13 = vsel %vm940_vm0, %v6417_v59, %v5433_v55  ;;  %v961_v27 = vsel %vm940_vm0, %v6408_v57, %v5432_v58 }
  0xd3   : > { %v5441_v51 = vpop.permute.xlu0 %5440  ;;  %v990_v28 = vsel %vm969_vm1, %v961_v27, %v5437_v37  ;;  %v991_v29 = vsel %vm969_vm1, %v962_v13, %v5438_v10  ;;  %v6707_v37 = vpack.c.bf16 %v6485_v20, %v6476_v18 }
  0xd4   : > { %v5446_v19 = vpop.permute.xlu1 %5445  ;;  %v5443_v11 = vunpack.i.h.bf16 %v5441_v51  ;;  %v5442_v1 = vunpack.i.l.bf16 %v5441_v51 }
  0xd5   : > { %v5448_v59 = vunpack.i.h.bf16 %v5446_v19  ;;  %v5447_v33 = vunpack.i.l.bf16 %v5446_v19 }
  0xd6   : > { %1320 = vmatmul.mubr.bf16.gmra.mxu0 %v6641_v8  ;;  %v1019_v57 = vsel %vm998_vm2, %v990_v28, %v5442_v1  ;;  %v1020_v35 = vsel %vm998_vm2, %v991_v29, %v5443_v11 }
  0xd7   : > { %4649 = vmatprep.mubr.msk.bf16.mxu0 %vm940_vm0, %v6639_v2  ;;  %v5451_v22 = vpop.permute.xlu0 %5450  ;;  %v964_v40 = vsel %vm940_vm0, %v6434_v63, %v5448_v59  ;;  %v963_v34 = vsel %vm940_vm0, %v6425_v61, %v5447_v33  ;;  %v6692_v43 = vpack.c.bf16 %v1020_v35, %v1019_v57 }
  0xd8   : > { %v5453_v48 = vunpack.i.h.bf16 %v5451_v22  ;;  %v5452_v39 = vunpack.i.l.bf16 %v5451_v22  ;;  %v5456_v44 = vpop.permute.xlu1 %5455 }
  0xd9   : > { %v5458_v21 = vunpack.i.h.bf16 %v5456_v44  ;;  %v5457_v45 = vunpack.i.l.bf16 %v5456_v44 }
  0xda   : > { %v993_v46 = vsel %vm969_vm1, %v964_v40, %v5453_v48  ;;  %v992_v47 = vsel %vm969_vm1, %v963_v34, %v5452_v39 }
  0xdb   : > { %v5461_v42 = vpop.permute.xlu0 %5460  ;;  %v1021_v0 = vsel %vm998_vm2, %v992_v47, %v5457_v45  ;;  %v1022_v55 = vsel %vm998_vm2, %v993_v46, %v5458_v21  ;;  %v5719_v21 = vld [vmem:[%s6324_s23 + $0x74] ss:$8 sps:$4 sm:$0xff]   ;;  %v5721_v45 = vld [vmem:[%s6324_s23 + $0x70] ss:$8 sps:$4 sm:$0xff]   ;;  %v5722_v46 = vld [vmem:[%s6324_s23 + $0x64] ss:$8 sps:$4 sm:$0xff]  }
  0xdc   : > { %v5466_v50 = vpop.permute.xlu1 %5465  ;;  %v5463_v63 = vunpack.i.h.bf16 %v5461_v42  ;;  %v5462_v53 = vunpack.i.l.bf16 %v5461_v42  ;;  %v6709_v13 = vpack.c.bf16 %v1022_v55, %v1021_v0  ;;  %2005 = vmatprep.subr.bf16.mxu1 %v5719_v21  ;;  %v5724_v47 = vld [vmem:[%s6324_s23 + $0x60] ss:$8 sps:$4 sm:$0xff]   ;;  %v5731_v0 = vld [vmem:[%s6324_s23 + $0x34] ss:$8 sps:$4 sm:$0xff]   ;;  %v5733_v55 = vld [vmem:[%s6324_s23 + $0x30] ss:$8 sps:$4 sm:$0xff]  }
  0xdd   : > { %v5468_v58 = vunpack.i.h.bf16 %v5466_v50  ;;  %v5467_v51 = vunpack.i.l.bf16 %v5466_v50  ;;  %2006 = vmatpush1.bf16.msra.mxu1 %v5721_v45  ;;  %v5725_v50 = vld [vmem:[%s6324_s23 + $0x54] ss:$8 sps:$4 sm:$0xff]  }
  0xde   : > { %1330 = vmatmul.mubr.bf16.gmra.mxu0 %v6658_v7  ;;  %v966_v41 = vsel %vm940_vm0, %v6451_v9, %v5463_v63  ;;  %v965_v10 = vsel %vm940_vm0, %v6442_v5, %v5462_v53  ;;  %v657_v5 = vld [vmem:[%s7714_s0 + $0xf8] sm:$0xff]  ;;  %2007 = vmatprep.subr.bf16.mxu1 %v5722_v46  ;;  %v5728_v53 = vld [vmem:[%s6324_s23 + $0x44] ss:$8 sps:$4 sm:$0xff]   ;;  %s7727_s0 = smov 80  }
  0xdf   : > { %4650 = vmatprep.mubr.msk.bf16.mxu0 %vm940_vm0, %v6656_v17  ;;  %v5471_v61 = vpop.permute.xlu0 %5470  ;;  %v994_v28 = vsel %vm969_vm1, %v965_v10, %v5467_v51  ;;  %v995_v29 = vsel %vm969_vm1, %v966_v41, %v5468_v58  ;;  %v6726_v48 = vpack.c.bf16 %v657_v5, %v6493_v24  ;;  %v5727_v63 = vld [vmem:[%s6324_s23 + $0x50] ss:$8 sps:$4 sm:$0xff]   ;;  %v5734_v58 = vld [vmem:[%s6324_s23 + $0x24] ss:$8 sps:$4 sm:$0xff]   ;;  %v5736_v51 = vld [vmem:[%s6324_s23 + $0x20] ss:$8 sps:$4 sm:$0xff]  }
  0xe0   : > { %v5476_v3 = vpop.permute.xlu1 %5475  ;;  %v5473_v27 = vunpack.i.h.bf16 %v5471_v61  ;;  %v5472_v19 = vunpack.i.l.bf16 %v5471_v61  ;;  %v5730_v61 = vld [vmem:[%s6324_s23 + $0x40] ss:$8 sps:$4 sm:$0xff]   ;;  %v5739_v41 = vld [vmem:[%s6324_s23 + $0x10] ss:$8 sps:$4 sm:$0xff]   ;;  %v5752_v46 = vld [vmem:[%s6324_s23 + $0xc4] ss:$8 sps:$4 sm:$0xff]  }
  0xe1   : > { %v5478_v11 = vunpack.i.h.bf16 %v5476_v3  ;;  %v5477_v1 = vunpack.i.l.bf16 %v5476_v3  ;;  %2008 = vmatpush1.bf16.msra.mxu1 %v5724_v47  ;;  %v5737_v3 = vld [vmem:[%s6324_s23 + $0x14] ss:$8 sps:$4 sm:$0xff]   ;;  %v5754_v47 = vld [vmem:[%s6324_s23 + $0xc0] ss:$8 sps:$4 sm:$0xff]  }
  0xe2   : > { %v1023_v57 = vsel %vm998_vm2, %v994_v28, %v5472_v19  ;;  %v1024_v35 = vsel %vm998_vm2, %v995_v29, %v5473_v27  ;;  %2009 = vmatprep.subr.bf16.mxu1 %v5725_v50  ;;  %v5740_v27 = vld [vmem:[%s6324_s23 + $0x4] ss:$8 sps:$4 sm:$0xff]   ;;  %v5755_v50 = vld [vmem:[%s6324_s23 + $0xb4] ss:$8 sps:$4 sm:$0xff]  }
  0xe3   : > { %v5481_v22 = vpop.permute.xlu0 %5480  ;;  %v968_v59 = vsel %vm940_vm0, %v6468_v14, %v5478_v11  ;;  %v967_v33 = vsel %vm940_vm0, %v6459_v12, %v5477_v1  ;;  %v6728_v40 = vpack.c.bf16 %v1024_v35, %v1023_v57  ;;  %v5742_v11 = vld [vmem:[%s6324_s23] ss:$8 sps:$4 sm:$0xff]  }
  0xe4   : > { %v5483_v9 = vunpack.i.h.bf16 %v5481_v22  ;;  %v5482_v18 = vunpack.i.l.bf16 %v5481_v22  ;;  %v5486_v20 = vpop.permute.xlu1 %5485  ;;  %v5743_v22 = vld [vmem:[%s6324_s23 + $0xf4] ss:$8 sps:$4 sm:$0xff]   ;;  %v5748_v57 = vld [vmem:[%s6324_s23 + $0xe0] ss:$8 sps:$4 sm:$0xff]  }
  0xe5   : > { %v5488_v39 = vunpack.i.h.bf16 %v5486_v20  ;;  %v5487_v44 = vunpack.i.l.bf16 %v5486_v20  ;;  %2010 = vmatpush1.bf16.msra.mxu1 %v5727_v63  ;;  %v5746_v20 = vld [vmem:[%s6324_s23 + $0xe4] ss:$8 sps:$4 sm:$0xff]  }
  0xe6   : > { %1340 = vmatmul.mubr.bf16.gmra.mxu0 %v6675_v23  ;;  %v997_v14 = vsel %vm969_vm1, %v968_v59, %v5483_v9  ;;  %v996_v34 = vsel %vm969_vm1, %v967_v33, %v5482_v18  ;;  %2011 = vmatprep.subr.bf16.mxu1 %v5728_v53  ;;  %v5745_v9 = vld [vmem:[%s6324_s23 + $0xf0] ss:$8 sps:$4 sm:$0xff]  }
  0xe7   : > { %4651 = vmatprep.mubr.msk.bf16.mxu0 %vm940_vm0, %v6673_v16  ;;  %v1025_v12 = vsel %vm998_vm2, %v996_v34, %v5487_v44  ;;  %v1026_v24 = vsel %vm998_vm2, %v997_v14, %v5488_v39  ;;  %v5749_v39 = vld [vmem:[%s6324_s23 + $0xd4] ss:$8 sps:$4 sm:$0xff]   ;;  %v5751_v14 = vld [vmem:[%s6324_s23 + $0xd0] ss:$8 sps:$4 sm:$0xff]  }
  0xe8   : > { %v6737_v42 = vpack.c.bf16 %v1026_v24, %v1025_v12 }
  0xe9   : > { %2012 = vmatpush1.bf16.msra.mxu1 %v5730_v61 }
  0xea   : > { %2013 = vmatprep.subr.bf16.mxu1 %v5731_v0 }
  0xed   : > { %2014 = vmatpush1.bf16.msra.mxu1 %v5733_v55  ;;  %v5757_v55 = vld [vmem:[%s6324_s23 + $0xb0] ss:$8 sps:$4 sm:$0xff]  }
  0xee   : > { %1350 = vmatmul.mubr.bf16.gmra.mxu0 %v6692_v43  ;;  %2015 = vmatprep.subr.bf16.mxu1 %v5734_v58  ;;  %v6775_v58 = vld [vmem:[%s6771_s20] ss:$0 sm:$0xff] }
  0xef   : > { %4652 = vmatprep.mubr.msk.bf16.mxu0 %vm940_vm0, %v6690_v30 }
  0xf1   : > { %2016 = vmatpush1.bf16.msra.mxu1 %v5736_v51 }
  0xf2   : > { %2017 = vmatprep.subr.bf16.mxu1 %v5737_v3 }
  0xf5   : > { %2018 = vmatpush1.bf16.msra.mxu1 %v5739_v41 }
  0xf6   : > { %1360 = vmatmul.mubr.bf16.gmra.mxu0 %v6709_v13  ;;  %2019 = vmatprep.subr.bf16.mxu1 %v5740_v27 }
  0xf7   : > { %4653 = vmatprep.mubr.msk.bf16.mxu0 %vm940_vm0, %v6707_v37 }
  0xf9   : > { %2020 = vmatpush1.bf16.msra.mxu1 %v5742_v11  ;;  %v5758_v11 = vld [vmem:[%s6324_s23 + $0xa4] ss:$8 sps:$4 sm:$0xff]  }
  0xfa   : > { %2021 = vmatprep.subr.bf16.mxu1 %v5743_v22  ;;  %v5761_v22 = vld [vmem:[%s6324_s23 + $0x94] ss:$8 sps:$4 sm:$0xff]  }
  0xfd   : > { %2022 = vmatpush2.bf16.msra.mxu1 %v5745_v9 }
  0xfe   : > { %1370 = vmatmul.mubr.bf16.gmra.mxu0 %v6728_v40  ;;  %2023 = vmatprep.subr.bf16.mxu1 %v5746_v20 }
  0xff   : > { %4654 = vmatprep.mubr.msk.bf16.mxu0 %vm940_vm0, %v6726_v48 }
 0x101   : > { %2024 = vmatpush2.bf16.msra.mxu1 %v5748_v57 }
 0x102   : > { %2025 = vmatprep.subr.bf16.mxu1 %v5749_v39 }
 0x105   : > { %2026 = vmatpush2.bf16.msra.mxu1 %v5751_v14 }
 0x106   : > { %1380 = vmatmul.mubr.bf16.gmra.mxu0 %v6737_v42  ;;  %2027 = vmatprep.subr.bf16.mxu1 %v5752_v46 }
 0x109   : > { %2028 = vmatpush2.bf16.msra.mxu1 %v5754_v47 }
 0x10a   : > { %2029 = vmatprep.subr.bf16.mxu1 %v5755_v50 }
 0x10d   : > { %2030 = vmatpush2.bf16.msra.mxu1 %v5757_v55 }
 0x10e   : > { %2031 = vmatprep.subr.bf16.mxu1 %v5758_v11 }
 0x15e   : > { %v1251_v10 = vpop.f32.mrf.mxu0 }
 0x160   : > { %v1253_v19 = vpop.f32.mrf.mxu0 }
 0x162   : > { %v1255_v1 = vpop.f32.mrf.mxu0 }
 0x163   : > { %v1390_v28 = vmax.f32 %v1251_v10, %v1255_v1  ;;  %v5760_v1 = vld [vmem:[%s6324_s23 + $0xa0] ss:$8 sps:$4 sm:$0xff]  }
 0x164   : > { %v1257_v29 = vpop.f32.mrf.mxu0  ;;  %2032 = vmatpush2.bf16.msra.mxu1 %v5760_v1 }
 0x165   : > { %v1391_v5 = vmax.f32 %v1253_v19, %v1257_v29  ;;  %2033 = vmatprep.subr.bf16.mxu1 %v5761_v22 }
 0x166   : > { %v1261_v18 = vpop.f32.mrf.mxu0 }
 0x167   : > { %v6759_v59 = vmax.f32 %v1390_v28, %v1391_v5 }
 0x168   : > { %v1263_v33 = vpop.f32.mrf.mxu0 }
 0x16a   : > { %v1265_v35 = vpop.f32.mrf.mxu0 }
 0x16b   : > { %v1392_v21 = vmax.f32 %v1261_v18, %v1265_v35 }
 0x16c   : > { %v1267_v44 = vpop.f32.mrf.mxu0 }
 0x16d   : > { %v1393_v12 = vmax.f32 %v1263_v33, %v1267_v44  ;;  %v5763_v33 = vld [vmem:[%s6324_s23 + $0x90] ss:$8 sps:$4 sm:$0xff]  }
 0x16e   : > { %v1271_v34 = vpop.f32.mrf.mxu0  ;;  %2034 = vmatpush2.bf16.msra.mxu1 %v5763_v33 }
 0x16f   : > { %v1419_v63 = vmax.f32 %v1392_v21, %v1393_v12  ;;  %v5766_v12 = vld [vmem:[%s6324_s23 + $0x80] ss:$8 sps:$4 sm:$0xff]  }
 0x170   : > { %v1273_v24 = vpop.f32.mrf.mxu0 }
 0x171   : > { %v6778_v3 = vadd.f32 %v6775_v58, %v1419_v63 }
 0x172   : > { %v1275_v45 = vpop.f32.mrf.mxu0 }
 0x173   : > { %v1394_v61 = vmax.f32 %v1271_v34, %v1275_v45  ;;  %v1454_v29 = vmax.f32 %v6778_v3, 0.0  ;;  %v5764_v34 = vld [vmem:[%s6324_s23 + $0x84] ss:$8 sps:$4 sm:$0xff]   ;;  %v5770_v3 = vld [vmem:[%s6324_s23 + $0x160] ss:$8 sps:$4 sm:$0xff]  }
 0x174   : > { %v1277_v53 = vpop.f32.mrf.mxu0  ;;  %2035 = vmatprep.subr.bf16.mxu1 %v5764_v34 }
 0x175   : > { %v1395_v0 = vmax.f32 %v1273_v24, %v1277_v53  ;;  %2036 = vmatpush2.bf16.msra.mxu1 %v5766_v12 }
 0x176   : > { %v1281_v51 = vpop.f32.mrf.mxu0 }
 0x177   : > { %v1420_v41 = vmax.f32 %v1394_v61, %v1395_v0 }
 0x178   : > { %v1283_v10 = vpop.f32.mrf.mxu0 }
 0x179   : > { %v1441_v27 = vadd.f32 %v6775_v58, %v1420_v41 }
 0x17a   : > { %v1285_v19 = vpop.f32.mrf.mxu0 }
 0x17b   : > { %v6784_v28 = vmax.f32 %v1441_v27, 0.0  ;;  %v1396_v9 = vmax.f32 %v1281_v51, %v1285_v19 }
 0x17c   : > { %v1287_v5 = vpop.f32.mrf.mxu0 }
 0x17d   : > { %v1397_v18 = vmax.f32 %v1283_v10, %v1287_v5  ;;  %v5489_v20 = vpack.i.bf16 %v6784_v28, %v1454_v29 }
 0x17e   : > { %v1291_v57 = vpop.f32.mrf.mxu0 }
 0x17f   : > { %v1421_v35 = vmax.f32 %v1396_v9, %v1397_v18  ;;  %5490 = vrot.lane.b32.xlu0 %v5489_v20, %s7700_s26 }
 0x180   : > { %v1293_v39 = vpop.f32.mrf.mxu0 }
 0x181   : > { %v1442_v44 = vadd.f32 %v6775_v58, %v1421_v35 }
 0x182   : > { %v1295_v14 = vpop.f32.mrf.mxu0 }
 0x183   : > { %v6795_v24 = vmax.f32 %v1442_v44, 0.0  ;;  %v1398_v45 = vmax.f32 %v1291_v57, %v1295_v14 }
 0x184   : > { %v1297_v21 = vpop.f32.mrf.mxu0 }
 0x185   : > { %v1399_v46 = vmax.f32 %v1293_v39, %v1297_v21  ;;  %v5494_v47 = vpack.i.bf16 %v6795_v24, %v6784_v28 }
 0x186   : > { %v1301_v50 = vpop.f32.mrf.mxu0 }
 0x187   : > { %v1422_v63 = vmax.f32 %v1398_v45, %v1399_v46  ;;  %5495 = vrot.lane.b32.xlu1 %v5494_v47, %s7698_s18 }
 0x188   : > { %v1303_v53 = vpop.f32.mrf.mxu0 }
 0x189   : > { %v1443_v61 = vadd.f32 %v6775_v58, %v1422_v63 }
 0x18a   : > { %v1305_v0 = vpop.f32.mrf.mxu0 }
 0x18b   : > { %v6801_v55 = vmax.f32 %v1443_v61, 0.0  ;;  %v1400_v41 = vmax.f32 %v1301_v50, %v1305_v0 }
 0x18c   : > { %v1307_v51 = vpop.f32.mrf.mxu0 }
 0x18d   : > { %v1401_v10 = vmax.f32 %v1303_v53, %v1307_v51  ;;  %v5504_v27 = vpack.i.bf16 %v6801_v55, %v6795_v24  ;;  %v5769_v51 = vld [vmem:[%s6324_s23 + $0x174] ss:$8 sps:$4 sm:$0xff]  }
 0x18e   : > { %v1311_v19 = vpop.f32.mrf.mxu0  ;;  %2088 = vmatprep.subr.bf16.mxu1 %v5769_v51 }
 0x18f   : > { %v1423_v11 = vmax.f32 %v1400_v41, %v1401_v10  ;;  %5505 = vrot.lane.b32.xlu1 %v5504_v27, %s7700_s26  ;;  %5500 = vrot.lane.b32.xlu0 %v5504_v27, %s7692_s17 }
 0x190   : > { %v1313_v1 = vpop.f32.mrf.mxu0 }
 0x191   : > { %v1444_v22 = vadd.f32 %v6775_v58, %v1423_v11 }
 0x192   : > { %v1315_v5 = vpop.f32.mrf.mxu0 }
 0x193   : > { %v6808_v9 = vmax.f32 %v1444_v22, 0.0  ;;  %v1402_v20 = vmax.f32 %v1311_v19, %v1315_v5 }
 0x194   : > { %v1317_v18 = vpop.f32.mrf.mxu0 }
 0x195   : > { %v1403_v33 = vmax.f32 %v1313_v1, %v1317_v18  ;;  %v6812_v57 = vpack.i.bf16 %v6808_v9, %v6801_v55 }
 0x196   : > { %v1321_v35 = vpop.f32.mrf.mxu0 }
 0x197   : > { %v1424_v39 = vmax.f32 %v1402_v20, %v1403_v33  ;;  %5510 = vrot.lane.b32.xlu0 %v6812_v57, %s7698_s18 }
 0x198   : > { %v1323_v44 = vpop.f32.mrf.mxu0 }
 0x199   : > { %v1445_v14 = vadd.f32 %v6775_v58, %v1424_v39 }
 0x19a   : > { %v1325_v34 = vpop.f32.mrf.mxu0 }
 0x19b   : > { %v6817_v12 = vmax.f32 %v1445_v14, 0.0  ;;  %v1404_v45 = vmax.f32 %v1321_v35, %v1325_v34 }
 0x19c   : > { %v1327_v21 = vpop.f32.mrf.mxu0 }
 0x19d   : > { %v1405_v46 = vmax.f32 %v1323_v44, %v1327_v21  ;;  %v5519_v47 = vpack.i.bf16 %v6817_v12, %v6808_v9 }
 0x19e   : > { %v1331_v50 = vpop.f32.mrf.mxu0 }
 0x19f   : > { %v1425_v63 = vmax.f32 %v1404_v45, %v1405_v46  ;;  %5520 = vrot.lane.b32.xlu0 %v5519_v47, %s7700_s26  ;;  %5515 = vrot.lane.b32.xlu1 %v5519_v47, %s7692_s17 }
 0x1a0   : > { %v1333_v53 = vpop.f32.mrf.mxu0 }
 0x1a1   : > { %v1446_v61 = vadd.f32 %v6775_v58, %v1425_v63 }
 0x1a2   : > { %v1335_v0 = vpop.f32.mrf.mxu0 }
 0x1a3   : > { %v6825_v41 = vmax.f32 %v1446_v61, 0.0  ;;  %v1406_v27 = vmax.f32 %v1331_v50, %v1335_v0 }
 0x1a4   : > { %v1337_v10 = vpop.f32.mrf.mxu0 }
 0x1a5   : > { %v1407_v19 = vmax.f32 %v1333_v53, %v1337_v10  ;;  %v6829_v11 = vpack.i.bf16 %v6825_v41, %v6817_v12 }
 0x1a6   : > { %v1341_v1 = vpop.f32.mrf.mxu0 }
 0x1a7   : > { %v1426_v22 = vmax.f32 %v1406_v27, %v1407_v19  ;;  %5525 = vrot.lane.b32.xlu1 %v6829_v11, %s7698_s18 }
 0x1a8   : > { %v1343_v5 = vpop.f32.mrf.mxu0 }
 0x1a9   : > { %v1447_v18 = vadd.f32 %v6775_v58, %v1426_v22 }
 0x1aa   : > { %v1345_v20 = vpop.f32.mrf.mxu0 }
 0x1ab   : > { %v6834_v33 = vmax.f32 %v1447_v18, 0.0  ;;  %v1408_v39 = vmax.f32 %v1341_v1, %v1345_v20 }
 0x1ac   : > { %v1347_v35 = vpop.f32.mrf.mxu0 }
 0x1ad   : > { %v1409_v44 = vmax.f32 %v1343_v5, %v1347_v35  ;;  %v5534_v14 = vpack.i.bf16 %v6834_v33, %v6825_v41 }
 0x1ae   : > { %v1351_v34 = vpop.f32.mrf.mxu0 }
 0x1af   : > { %v1427_v21 = vmax.f32 %v1408_v39, %v1409_v44  ;;  %5535 = vrot.lane.b32.xlu1 %v5534_v14, %s7700_s26  ;;  %5530 = vrot.lane.b32.xlu0 %v5534_v14, %s7692_s17 }
 0x1b0   : > { %v1353_v45 = vpop.f32.mrf.mxu0 }
 0x1b1   : > { %v1448_v46 = vadd.f32 %v6775_v58, %v1427_v21 }
 0x1b2   : > { %v1355_v47 = vpop.f32.mrf.mxu0 }
 0x1b3   : > { %v6841_v50 = vmax.f32 %v1448_v46, 0.0  ;;  %v1410_v53 = vmax.f32 %v1351_v34, %v1355_v47 }
 0x1b4   : > { %v1357_v63 = vpop.f32.mrf.mxu0 }
 0x1b5   : > { %v1411_v61 = vmax.f32 %v1353_v45, %v1357_v63  ;;  %v5539_v0 = vpack.i.bf16 %v6841_v50, %v6834_v33 }
 0x1b6   : > { %v1361_v51 = vpop.f32.mrf.mxu0 }
 0x1b7   : > { %v1428_v10 = vmax.f32 %v1410_v53, %v1411_v61  ;;  %5540 = vrot.lane.b32.xlu0 %v5539_v0, %s7698_s18 }
 0x1b8   : > { %v1363_v27 = vpop.f32.mrf.mxu0 }
 0x1b9   : > { %v1449_v19 = vadd.f32 %v6775_v58, %v1428_v10 }
 0x1ba   : > { %v1365_v1 = vpop.f32.mrf.mxu0 }
 0x1bb   : > { %v1463_v22 = vmax.f32 %v1449_v19, 0.0  ;;  %v1412_v18 = vmax.f32 %v1361_v51, %v1365_v1 }
 0x1bc   : > { %v1367_v5 = vpop.f32.mrf.mxu0 }
 0x1bd   : > { %v1413_v20 = vmax.f32 %v1363_v27, %v1367_v5  ;;  %v5549_v35 = vpack.i.bf16 %v1463_v22, %v6841_v50 }
 0x1be   : > { %v1371_v39 = vpop.f32.mrf.mxu0 }
 0x1bf   : > { %v1429_v44 = vmax.f32 %v1412_v18, %v1413_v20  ;;  %5550 = vrot.lane.b32.xlu0 %v5549_v35, %s7700_s26  ;;  %5545 = vrot.lane.b32.xlu1 %v5549_v35, %s7692_s17  ;;  %s7071_s26 = scalar_lea.vmem %s7679_s7, %s5220_s30  ;;  %s7122_s30 = scalar_lea.vmem %s7723_s6, %s7736_s29 }
 0x1c0   : > { %v1373_v14 = vpop.f32.mrf.mxu0 }
 0x1c1   : > { %v1450_v34 = vadd.f32 %v6775_v58, %v1429_v44 }
 0x1c2   : > { %v1375_v21 = vpop.f32.mrf.mxu0 }
 0x1c3   : > { %v1464_v45 = vmax.f32 %v1450_v34, 0.0  ;;  %v1414_v47 = vmax.f32 %v1371_v39, %v1375_v21  ;;  %v1439_v21 = vadd.f32 %v6775_v58, %v6759_v59 }
 0x1c4   : > { %v1377_v46 = vpop.f32.mrf.mxu0 }
 0x1c5   : > { %v1415_v63 = vmax.f32 %v1373_v14, %v1377_v46  ;;  %v5554_v53 = vpack.i.bf16 %v1464_v45, %v1463_v22 }
 0x1c6   : > { %v1381_v61 = vpop.f32.mrf.mxu0 }
 0x1c7   : > { %v1430_v51 = vmax.f32 %v1414_v47, %v1415_v63  ;;  %5555 = vrot.lane.b32.xlu1 %v5554_v53, %s7698_s18  ;;  %v1453_v63 = vmax.f32 %v1439_v21, 0.0  ;;  %s5221_s18 = smul.u32 44, %s7736_s29 }
 0x1c8   : > { %v1383_v10 = vpop.f32.mrf.mxu0 }
 0x1c9   : > { %v1451_v27 = vadd.f32 %v6775_v58, %v1430_v51 }
 0x1ca   : > { %v1385_v19 = vpop.f32.mrf.mxu0 }
 0x1cb   : > { %v1465_v1 = vmax.f32 %v1451_v27, 0.0  ;;  %v1416_v5 = vmax.f32 %v1381_v61, %v1385_v19  ;;  %5565 = vrot.lane.b32.xlu1 %v6812_v57, %s7696_s3 }
 0x1cc   : > { %v1387_v18 = vpop.f32.mrf.mxu0 }
 0x1cd   : > { %v1417_v20 = vmax.f32 %v1383_v10, %v1387_v18  ;;  %v5559_v35 = vpack.i.bf16 %v1465_v1, %v1464_v45 }
 0x1cf   : > { %v1431_v39 = vmax.f32 %v1416_v5, %v1417_v20  ;;  %5575 = vrot.lane.b32.xlu1 %v5539_v0, %s7696_s3  ;;  %5560 = vrot.lane.b32.xlu0 %v5559_v35, %s7692_s17  ;;  %v5767_v5 = vld [vmem:[%s6324_s23 + $0x170] ss:$8 sps:$4 sm:$0xff]   ;;  %v5772_v20 = vld [vmem:[%s6324_s23 + $0x164] ss:$8 sps:$4 sm:$0xff]   ;;  %s7032_s17 = scalar_lea.vmem %s7722_s4, %s7736_s29 }
 0x1d1   : > { %v1452_v22 = vadd.f32 %v6775_v58, %v1431_v39 }
 0x1d3   : > { %v1466_v44 = vmax.f32 %v1452_v22, 0.0  ;;  %5570 = vrot.lane.b32.xlu0 %v6829_v11, %s7696_s3  ;;  %v5773_v22 = vld [vmem:[%s6324_s23 + $0x150] ss:$8 sps:$4 sm:$0xff]  }
 0x1d5   : > { %v5584_v14 = vpack.i.bf16 %v1466_v44, %v1465_v1  ;;  %v5778_v44 = vld [vmem:[%s6324_s23 + $0x144] ss:$8 sps:$4 sm:$0xff]  }
 0x1d7   : > { %5580 = vrot.lane.b32.xlu0 %v5554_v53, %s7696_s3  ;;  %5585 = vrot.lane.b32.xlu1 %v5584_v14, %s7696_s3 }
 0x1f1   : > { %v5491_v57 = vpop.permute.xlu0 %5490 }
 0x1f2   : > { %v5493_v45 = vunpack.i.h.bf16 %v5491_v57  ;;  %v5492_v0 = vunpack.i.l.bf16 %v5491_v57 }
 0x1f4   : > { %v1601_v51 = vsel %vm1600_vm4, %v1453_v63, %v5492_v0  ;;  %v1602_v10 = vsel %vm1600_vm4, %v1454_v29, %v5493_v45  ;;  %v5775_v29 = vld [vmem:[%s6324_s23 + $0x154] ss:$8 sps:$4 sm:$0xff]  }
 0x1f5   : > { %v1644_v18 = vpack.c.bf16 %v1602_v10, %v1601_v51  ;;  %v5781_v63 = vld [vmem:[%s6324_s23 + $0x134] ss:$8 sps:$4 sm:$0xff]  }
 0x1f9   : > { %v5496_v34 = vpop.permute.xlu1 %5495 }
 0x1fa   : > { %v5498_v46 = vunpack.i.h.bf16 %v5496_v34  ;;  %v5497_v47 = vunpack.i.l.bf16 %v5496_v34 }
 0x1fc   : > { %v1612_v59 = vsel %vm1611_vm3, %v5492_v0, %v5497_v47  ;;  %v1613_v58 = vsel %vm1611_vm3, %v5493_v45, %v5498_v46  ;;  %v5776_v0 = vld [vmem:[%s6324_s23 + $0x140] ss:$8 sps:$4 sm:$0xff]  }
 0x201   : > { %v6864_v11 = vpop.permute.xlu0 %5500  ;;  %v5506_v35 = vpop.permute.xlu1 %5505 }
 0x202   : > { %v5503_v53 = vunpack.i.h.bf16 %v6864_v11  ;;  %v5502_v61 = vunpack.i.l.bf16 %v6864_v11  ;;  %v5508_v14 = vunpack.i.h.bf16 %v5506_v35  ;;  %v5507_v57 = vunpack.i.l.bf16 %v5506_v35  ;;  %v5785_v35 = vld [vmem:[%s6324_s23 + $0x110] ss:$8 sps:$4 sm:$0xff]  }
 0x204   : > { %v1623_v27 = vsel %vm1622_vm5, %v1612_v59, %v5502_v61  ;;  %v1624_v19 = vsel %vm1622_vm5, %v1613_v58, %v5503_v53  ;;  %v1603_v51 = vsel %vm1600_vm4, %v6784_v28, %v5507_v57  ;;  %v1604_v10 = vsel %vm1600_vm4, %v6795_v24, %v5508_v14  ;;  %v5784_v28 = vld [vmem:[%s6324_s23 + $0x124] ss:$8 sps:$4 sm:$0xff]   ;;  %v5782_v24 = vld [vmem:[%s6324_s23 + $0x120] ss:$8 sps:$4 sm:$0xff]  }
 0x205   : > { %v1645_v1 = vpack.c.bf16 %v1624_v19, %v1623_v27 }
 0x207   : > { %2037 = vmatprep.mubr.bf16.mxu1 %v1645_v1 }
 0x208   : > { %2038 = vmatmul.mubr.bf16.vlgmr.msra.gmra.mxu1 %v1644_v18  ;;  %v1648_v18 = vpack.c.bf16 %v1604_v10, %v1603_v51 }
 0x209   : > { %2089 = vmatpush1.bf16.msra.mxu1 %v5767_v5  ;;  %v5511_v39 = vpop.permute.xlu0 %5510  ;;  %v5779_v5 = vld [vmem:[%s6324_s23 + $0x130] ss:$8 sps:$4 sm:$0xff]  }
 0x20a   : > { %2090 = vmatprep.subr.bf16.mxu1 %v5772_v20  ;;  %v5513_v34 = vunpack.i.h.bf16 %v5511_v39  ;;  %v5512_v21 = vunpack.i.l.bf16 %v5511_v39  ;;  %v5787_v20 = vld [vmem:[%s6324_s23 + $0x114] ss:$8 sps:$4 sm:$0xff]   ;;  %v5790_v39 = vld [vmem:[%s6324_s23 + $0x104] ss:$8 sps:$4 sm:$0xff]  }
 0x20c   : > { %v1615_v59 = vsel %vm1611_vm3, %v5508_v14, %v5513_v34  ;;  %v1614_v58 = vsel %vm1611_vm3, %v5507_v57, %v5512_v21 }
 0x20d   : > { %2091 = vmatpush1.bf16.msra.mxu1 %v5770_v3 }
 0x20e   : > { %2092 = vmatprep.subr.bf16.mxu1 %v5775_v29 }
 0x211   : > { %v6886_v45 = vpop.permute.xlu1 %5515  ;;  %2093 = vmatpush1.bf16.msra.mxu1 %v5773_v22  ;;  %v5521_v3 = vpop.permute.xlu0 %5520  ;;  %v1716_v22 = vld [vmem:[%s6324_s23 + $0x1a0] sm:$0x33] }
 0x212   : > { %v5518_v46 = vunpack.i.h.bf16 %v6886_v45  ;;  %v5517_v47 = vunpack.i.l.bf16 %v6886_v45  ;;  %2094 = vmatprep.subr.bf16.mxu1 %v5778_v44  ;;  %v5523_v44 = vunpack.i.h.bf16 %v5521_v3  ;;  %v5522_v14 = vunpack.i.l.bf16 %v5521_v3  ;;  %v5798_v3 = vld [vmem:[%s6324_s23 + $0x184] ss:$8 sps:$4 sm:$0xff]  }
 0x213   : > { %v4708_v51 = vcombine.low %v1716_v22, %v1716_v22 }
 0x214   : > { %v1625_v27 = vsel %vm1622_vm5, %v1614_v58, %v5517_v47  ;;  %v1626_v19 = vsel %vm1622_vm5, %v1615_v59, %v5518_v46 }
 0x215   : > { %v1649_v1 = vpack.c.bf16 %v1626_v19, %v1625_v27  ;;  %2095 = vmatpush1.bf16.msra.mxu1 %v5776_v0  ;;  %v5788_v0 = vld [vmem:[%s6324_s23 + $0x100] ss:$8 sps:$4 sm:$0xff]   ;;  %v1605_v19 = vsel %vm1600_vm4, %v6801_v55, %v5522_v14  ;;  %v5795_v55 = vld [vmem:[%s6324_s23 + $0x194] ss:$8 sps:$4 sm:$0xff]  }
 0x216   : > { %2096 = vmatprep.subr.bf16.mxu1 %v5781_v63  ;;  %v4709_v63 = vcombine.high %v1716_v22, %v1716_v22 }
 0x217   : > { %2047 = vmatprep.mubr.bf16.mxu1 %v1649_v1  ;;  %v1606_v1 = vsel %vm1600_vm4, %v6808_v9, %v5523_v44  ;;  %v5793_v9 = vld [vmem:[%s6324_s23 + $0x190] ss:$8 sps:$4 sm:$0xff]  }
 0x218   : > { %2048 = vmatmul.mubr.bf16.gmra.mxu1 %v1648_v18 }
 0x219   : > { %2097 = vmatpush1.bf16.msra.mxu1 %v5779_v5  ;;  %v5526_v29 = vpop.permute.xlu1 %5525 }
 0x21a   : > { %2098 = vmatprep.subr.bf16.mxu1 %v5784_v28  ;;  %v5528_v57 = vunpack.i.h.bf16 %v5526_v29  ;;  %v5527_v34 = vunpack.i.l.bf16 %v5526_v29 }
 0x21c   : > { %v1617_v10 = vsel %vm1611_vm3, %v5523_v44, %v5528_v57  ;;  %v1616_v27 = vsel %vm1611_vm3, %v5522_v14, %v5527_v34 }
 0x21d   : > { %2099 = vmatpush1.bf16.msra.mxu1 %v5782_v24  ;;  %v1652_v24 = vpack.c.bf16 %v1606_v1, %v1605_v19 }
 0x21e   : > { %2100 = vmatprep.subr.bf16.mxu1 %v5787_v20  ;;  %v2000_v20 = vsel %vm1998_vm6, %v4708_v51, 0 }
 0x221   : > { %v6911_v21 = vpop.permute.xlu0 %5530  ;;  %2101 = vmatpush1.bf16.msra.mxu1 %v5785_v35  ;;  %v5536_v29 = vpop.permute.xlu1 %5535 }
 0x222   : > { %v5533_v59 = vunpack.i.h.bf16 %v6911_v21  ;;  %v5532_v58 = vunpack.i.l.bf16 %v6911_v21  ;;  %2102 = vmatprep.subr.bf16.mxu1 %v5790_v39  ;;  %v5796_v39 = vld [vmem:[%s6324_s23 + $0x180] ss:$8 sps:$4 sm:$0xff]   ;;  %v5538_v22 = vunpack.i.h.bf16 %v5536_v29  ;;  %v5537_v44 = vunpack.i.l.bf16 %v5536_v29 }
 0x224   : > { %v1627_v5 = vsel %vm1622_vm5, %v1616_v27, %v5532_v58  ;;  %v1628_v18 = vsel %vm1622_vm5, %v1617_v10, %v5533_v59  ;;  %v1607_v27 = vsel %vm1600_vm4, %v6817_v12, %v5537_v44  ;;  %v1608_v19 = vsel %vm1600_vm4, %v6825_v41, %v5538_v22 }
 0x225   : > { %v1653_v28 = vpack.c.bf16 %v1628_v18, %v1627_v5  ;;  %2103 = vmatpush1.bf16.msra.mxu1 %v5788_v0 }
 0x226   : > { %4710 = vmatprep.subr.msk.bf16.mxu1 %vm1998_vm6, %v4709_v63 }
 0x227   : > { %2057 = vmatprep.mubr.bf16.mxu1 %v1653_v28  ;;  %v1656_v28 = vpack.c.bf16 %v1608_v19, %v1607_v27 }
 0x228   : > { %2058 = vmatmul.mubr.bf16.gmra.mxu1 %v1652_v24 }
 0x229   : > { %2115 = vmatpush2.bf16.msra.mxu1 %v2000_v20  ;;  %v5541_v35 = vpop.permute.xlu0 %5540 }
 0x22a   : > { %2116 = vmatprep.subr.bf16.mxu1 %v5795_v55  ;;  %v5543_v14 = vunpack.i.h.bf16 %v5541_v35  ;;  %v5542_v57 = vunpack.i.l.bf16 %v5541_v35 }
 0x22c   : > { %v1619_v51 = vsel %vm1611_vm3, %v5538_v22, %v5543_v14  ;;  %v1618_v10 = vsel %vm1611_vm3, %v5537_v44, %v5542_v57 }
 0x22d   : > { %2117 = vmatpush2.bf16.msra.mxu1 %v5793_v9 }
 0x22e   : > { %2118 = vmatprep.subr.bf16.mxu1 %v5798_v3 }
 0x231   : > { %v6934_v34 = vpop.permute.xlu1 %5545  ;;  %2119 = vmatpush2.bf16.msra.mxu1 %v5796_v39  ;;  %v5551_v20 = vpop.permute.xlu0 %5550 }
 0x232   : > { %v5548_v0 = vunpack.i.h.bf16 %v6934_v34  ;;  %v5547_v63 = vunpack.i.l.bf16 %v6934_v34  ;;  %v5553_v3 = vunpack.i.h.bf16 %v5551_v20  ;;  %v5552_v41 = vunpack.i.l.bf16 %v5551_v20 }
 0x233   : > { %v7694_v34 = vmov 0  }
 0x234   : > { %v1629_v1 = vsel %vm1622_vm5, %v1618_v10, %v5547_v63  ;;  %v1630_v5 = vsel %vm1622_vm5, %v1619_v51, %v5548_v0  ;;  %v1609_v19 = vsel %vm1600_vm4, %v6834_v33, %v5552_v41  ;;  %2479 = vmatprep.subr.bf16.mxu0 %v7694_v34 }
 0x235   : > { %v1657_v18 = vpack.c.bf16 %v1630_v5, %v1629_v1  ;;  %v1610_v1 = vsel %vm1600_vm4, %v6841_v50, %v5553_v3 }
 0x237   : > { %2067 = vmatprep.mubr.bf16.mxu1 %v1657_v18 }
 0x238   : > { %2068 = vmatmul.mubr.bf16.gmra.mxu1 %v1656_v28 }
 0x239   : > { %v5556_v24 = vpop.permute.xlu1 %5555 }
 0x23a   : > { %v5558_v29 = vunpack.i.h.bf16 %v5556_v24  ;;  %v5557_v35 = vunpack.i.l.bf16 %v5556_v24  ;;  %v1660_v24 = vpack.c.bf16 %v1610_v1, %v1609_v19 }
 0x23c   : > { %v1621_v10 = vsel %vm1611_vm3, %v5553_v3, %v5558_v29  ;;  %v1620_v27 = vsel %vm1611_vm3, %v5552_v41, %v5557_v35 }
 0x23d   : > { %v5566_v55 = vpop.permute.xlu1 %5565 }
 0x23e   : > { %v5568_v12 = vunpack.i.h.bf16 %v5566_v55  ;;  %v5567_v9 = vunpack.i.l.bf16 %v5566_v55 }
 0x240   : > { %v1635_v39 = vsel %vm1633_vm7, %v5503_v53, %v5568_v12  ;;  %v1634_v22 = vsel %vm1633_vm7, %v5502_v61, %v5567_v9  ;;  %v1647_v20 = vpack.c.bf16 %v5568_v12, %v5567_v9 }
 0x241   : > { %v1646_v44 = vpack.c.bf16 %v1635_v39, %v1634_v22  ;;  %v5561_v14 = vpop.permute.xlu0 %5560  ;;  %v5576_v41 = vpop.permute.xlu1 %5575 }
 0x242   : > { %v5563_v57 = vunpack.i.h.bf16 %v5561_v14  ;;  %v5562_v51 = vunpack.i.l.bf16 %v5561_v14  ;;  %v5578_v29 = vunpack.i.h.bf16 %v5576_v41  ;;  %v5577_v12 = vunpack.i.l.bf16 %v5576_v41  ;;  %v5804_v41 = vld [vmem:[%s6391_s19 + $0x90] sm:$0xff]  }
 0x244   : > { %v1631_v53 = vsel %vm1622_vm5, %v1620_v27, %v5562_v51  ;;  %v1632_v11 = vsel %vm1622_vm5, %v1621_v10, %v5563_v57  ;;  %v1655_v9 = vpack.c.bf16 %v5578_v29, %v5577_v12  ;;  %v1638_v45 = vsel %vm1633_vm7, %v5532_v58, %v5577_v12  ;;  %v5810_v12 = vld [vmem:[%s6391_s19 + $0x88] sm:$0xff]  }
 0x245   : > { %v5571_v5 = vpop.permute.xlu0 %5570  ;;  %v1661_v61 = vpack.c.bf16 %v1632_v11, %v1631_v53 }
 0x246   : > { %v5573_v18 = vunpack.i.h.bf16 %v5571_v5  ;;  %v5572_v28 = vunpack.i.l.bf16 %v5571_v5  ;;  %v5805_v5 = vld [vmem:[%s6391_s19 + $0x78] sm:$0xff]  }
 0x247   : > { %2077 = vmatprep.mubr.bf16.mxu1 %v1661_v61  ;;  %v5806_v61 = vld [vmem:[%s6391_s19 + $0x38] sm:$0xff]   ;;  %5069 = vmatprep.subr.bf16.mxu1 %v5805_v5 }
 0x248   : > { %2078 = vmatmul.mubr.bf16.gmra.mxu1 %v1660_v24  ;;  %v1636_v33 = vsel %vm1633_vm7, %v5517_v47, %v5572_v28  ;;  %v1637_v50 = vsel %vm1633_vm7, %v5518_v46, %v5573_v18  ;;  %v1651_v3 = vpack.c.bf16 %v5573_v18, %v5572_v28  ;;  %v1639_v46 = vsel %vm1633_vm7, %v5533_v59, %v5578_v29  ;;  %v5807_v18 = vld [vmem:[%s6391_s19 + $0x70] sm:$0xff]   ;;  %v5809_v28 = vld [vmem:[%s6391_s19 + $0x68] sm:$0xff]  }
 0x249   : > { %4711 = vmatprep.mubr.msk.bf16.mxu1 %vm1982_vm8, %v1647_v20  ;;  %v1650_v55 = vpack.c.bf16 %v1637_v50, %v1636_v33  ;;  %v5581_v35 = vpop.permute.xlu0 %5580  ;;  %v1654_v22 = vpack.c.bf16 %v1639_v46, %v1638_v45  ;;  %v5586_v14 = vpop.permute.xlu1 %5585  ;;  %v5811_v24 = vld [vmem:[%s6391_s19 + $0x28] sm:$0xff]   ;;  %v5802_v20 = vld [vmem:[%s6391_s19 + $0xa0] sm:$0xff]  }
 0x24a   : > { %v5583_v47 = vunpack.i.h.bf16 %v5581_v35  ;;  %v5582_v39 = vunpack.i.l.bf16 %v5581_v35  ;;  %v5588_v10 = vunpack.i.h.bf16 %v5586_v14  ;;  %v5587_v27 = vunpack.i.l.bf16 %v5586_v14  ;;  %v5812_v33 = vld [vmem:[%s6391_s19 + $0x60] sm:$0xff]  }
 0x24b   : > { %v5813_v50 = vld [vmem:[%s6391_s19 + $0x20] sm:$0xff]  }
 0x24c   : > { %v1640_v19 = vsel %vm1633_vm7, %v5547_v63, %v5582_v39  ;;  %v1641_v21 = vsel %vm1633_vm7, %v5548_v0, %v5583_v47  ;;  %v1663_v58 = vpack.c.bf16 %v5588_v10, %v5587_v27  ;;  %v1642_v1 = vsel %vm1633_vm7, %v5562_v51, %v5587_v27  ;;  %v5799_v63 = vld [vmem:[%s6391_s19 + $0xb8] sm:$0xff]   ;;  %v5800_v0 = vld [vmem:[%s6391_s19 + $0xb0] sm:$0xff]   ;;  %v5801_v51 = vld [vmem:[%s6391_s19 + $0xa8] sm:$0xff]  }
 0x24d   : > { %v1658_v59 = vpack.c.bf16 %v1641_v21, %v1640_v19  ;;  %v1643_v53 = vsel %vm1633_vm7, %v5563_v57, %v5588_v10  ;;  %2480 = vmatpush1.bf16.msra.mxu0 %v5799_v63  ;;  %v5808_v57 = vld [vmem:[%s6391_s19 + $0x30] sm:$0xff]  }
 0x24e   : > { %v1662_v11 = vpack.c.bf16 %v1643_v53, %v1642_v1  ;;  %2481 = vmatprep.subr.bf16.mxu0 %v7694_v34 }
 0x250   : > { %2121 = vmatmul.mubr.bf16.vlgmr.msra.gmra.mxu1 %v1646_v44  ;;  %v1659_v44 = vpack.c.bf16 %v5583_v47, %v5582_v39 }
 0x251   : > { %4712 = vmatprep.mubr.msk.bf16.mxu1 %vm1982_vm8, %v1651_v3  ;;  %5070 = vmatpush3.bf16.msra.mxu1 %v5806_v61 }
 0x252   : > { %2482 = vmatpush1.bf16.msra.mxu0 %v5800_v0  ;;  %5071 = vmatprep.subr.bf16.mxu1 %v5807_v18 }
 0x253   : > { %2483 = vmatprep.subr.bf16.mxu0 %v7694_v34 }
 0x255   : > { %5072 = vmatpush3.bf16.msra.mxu1 %v5808_v57 }
 0x256   : > { %2484 = vmatpush1.bf16.msra.mxu0 %v5801_v51  ;;  %5073 = vmatprep.subr.bf16.mxu1 %v5809_v28 }
 0x257   : > { %2485 = vmatprep.subr.bf16.mxu0 %v7694_v34 }
 0x258   : > { %2131 = vmatmul.mubr.bf16.gmra.mxu1 %v1650_v55  ;;  %v5803_v55 = vld [vmem:[%s6391_s19 + $0x98] sm:$0xff]  }
 0x259   : > { %4713 = vmatprep.mubr.msk.bf16.mxu1 %vm1982_vm8, %v1655_v9  ;;  %5074 = vmatpush3.bf16.msra.mxu1 %v5811_v24 }
 0x25a   : > { %2486 = vmatpush1.bf16.msra.mxu0 %v5802_v20  ;;  %5075 = vmatprep.subr.bf16.mxu1 %v5812_v33 }
 0x25b   : > { %2487 = vmatprep.subr.bf16.mxu0 %v7694_v34 }
 0x25d   : > { %5076 = vmatpush3.bf16.msra.mxu1 %v5813_v50  ;;  %v7035_v50 = vld [vmem:[%s7032_s17] ss:$0 sm:$0xff] }
 0x25e   : > { %2488 = vmatpush1.bf16.msra.mxu0 %v5803_v55 }
 0x25f   : > { %2489 = vmatprep.subr.bf16.mxu0 %v7694_v34 }
 0x260   : > { %2141 = vmatmul.mubr.bf16.gmra.mxu1 %v1654_v22 }
 0x261   : > { %4714 = vmatprep.mubr.msk.bf16.mxu1 %vm1982_vm8, %v1659_v44 }
 0x262   : > { %2490 = vmatpush1.bf16.msra.mxu0 %v5804_v41 }
 0x263   : > { %2491 = vmatprep.subr.bf16.mxu0 %v7694_v34 }
 0x266   : > { %2492 = vmatpush1.bf16.msra.mxu0 %v5810_v12 }
 0x267   : > { %2493 = vmatprep.subr.bf16.mxu0 %v7694_v34 }
 0x268   : > { %2151 = vmatmul.mubr.bf16.gmra.mxu1 %v1658_v59 }
 0x269   : > { %4715 = vmatprep.mubr.msk.bf16.mxu1 %vm1982_vm8, %v1663_v58 }
 0x270   : > { %2161 = vmatmul.mubr.bf16.gmra.mxu1 %v1662_v11 }
 0x2c8   : > { %v2039_v3 = vpop.f32.mrf.mxu1 }
 0x2ca   : > { %v2041_v29 = vpop.f32.mrf.mxu1 }
 0x2cc   : > { %v2043_v9 = vpop.f32.mrf.mxu1 }
 0x2ce   : > { %v2045_v35 = vpop.f32.mrf.mxu1 }
 0x2d8   : > { %v2049_v47 = vpop.f32.mrf.mxu1 }
 0x2da   : > { %v2051_v39 = vpop.f32.mrf.mxu1 }
 0x2dc   : > { %v2053_v45 = vpop.f32.mrf.mxu1 }
 0x2de   : > { %v2055_v46 = vpop.f32.mrf.mxu1 }
 0x2e8   : > { %v2059_v22 = vpop.f32.mrf.mxu1 }
 0x2ea   : > { %v2061_v44 = vpop.f32.mrf.mxu1 }
 0x2ec   : > { %v2063_v14 = vpop.f32.mrf.mxu1 }
 0x2ee   : > { %v2065_v10 = vpop.f32.mrf.mxu1 }
 0x2f8   : > { %v7012_v27 = vpop.f32.mrf.mxu1 }
 0x2fa   : > { %v7014_v19 = vpop.f32.mrf.mxu1 }
 0x2fc   : > { %v7016_v21 = vpop.f32.mrf.mxu1 }
 0x2fe   : > { %v7018_v59 = vpop.f32.mrf.mxu1 }
 0x308   : > { %v7020_v58 = vpop.f32.mrf.mxu1 }
 0x30a   : > { %v7022_v1 = vpop.f32.mrf.mxu1 }
 0x30c   : > { %v7024_v53 = vpop.f32.mrf.mxu1 }
 0x30e   : > { %v7026_v11 = vpop.f32.mrf.mxu1 }
 0x310   : > { %v2122_v63 = vpop.f32.mrf.mxu1 }
 0x311   : > { %v2123_v61 = vadd.f32 %v2122_v63, %v2039_v3  ;;  %v5815_v63 = vld [vmem:[%s6391_s19 + $0x18] sm:$0xff]  }
 0x312   : > { %v2124_v0 = vpop.f32.mrf.mxu1 }
 0x313   : > { %v2125_v51 = vadd.f32 %v2124_v0, %v2041_v29  ;;  %v5816_v0 = vld [vmem:[%s6391_s19 + $0x80] sm:$0xff]  }
 0x314   : > { %v2126_v5 = vpop.f32.mrf.mxu1  ;;  %2494 = vmatpush1.bf16.msra.mxu0 %v5816_v0 }
 0x315   : > { %v2127_v18 = vadd.f32 %v2126_v5, %v2043_v9  ;;  %v5814_v9 = vld [vmem:[%s6391_s19 + $0x58] sm:$0xff]   ;;  %2509 = vmatprep.subr.bf16.mxu0 %v7694_v34 }
 0x316   : > { %v2128_v57 = vpop.f32.mrf.mxu1  ;;  %5077 = vmatprep.subr.bf16.mxu1 %v5814_v9  ;;  %v5822_v9 = vld [vmem:[%s6391_s19 + $0xc0] sm:$0xff]  }
 0x317   : > { %v2171_v28 = vmax.f32 %v2123_v61, %v2127_v18  ;;  %v2129_v24 = vadd.f32 %v2128_v57, %v2045_v35  ;;  %v5817_v61 = vld [vmem:[%s6391_s19 + $0x50] sm:$0xff]   ;;  %5078 = vmatpush3.bf16.msra.mxu1 %v5815_v63 }
 0x318   : > { %v2132_v20 = vpop.f32.mrf.mxu1  ;;  %5079 = vmatprep.subr.bf16.mxu1 %v5817_v61  ;;  %2510 = vmatpush2.bf16.msra.mxu0 %v5822_v9 }
 0x319   : > { %v2172_v33 = vmax.f32 %v2125_v51, %v2129_v24  ;;  %v2133_v18 = vadd.f32 %v2132_v20, %v2049_v47  ;;  %v5819_v47 = vld [vmem:[%s6391_s19 + $0x48] sm:$0xff]  }
 0x31a   : > { %v2134_v55 = vpop.f32.mrf.mxu1 }
 0x31b   : > { %v2181_v3 = vmax.f32 %v2171_v28, %v2172_v33  ;;  %v2135_v35 = vadd.f32 %v2134_v55, %v2051_v39  ;;  %v5818_v28 = vld [vmem:[%s6391_s19 + $0x10] sm:$0xff]   ;;  %v5820_v39 = vld [vmem:[%s6391_s19 + $0x8] sm:$0xff]   ;;  %v5821_v55 = vld [vmem:[%s6391_s19 + $0x40] sm:$0xff]  }
 0x31c   : > { %v2136_v41 = vpop.f32.mrf.mxu1  ;;  %5080 = vmatpush3.bf16.msra.mxu1 %v5818_v28 }
 0x31d   : > { %v7038_v12 = vadd.f32 %v7035_v50, %v2181_v3  ;;  %v2137_v29 = vadd.f32 %v2136_v41, %v2053_v45  ;;  %5081 = vmatprep.subr.bf16.mxu1 %v5819_v47 }
 0x31e   : > { %v2138_v5 = vpop.f32.mrf.mxu1 }
 0x31f   : > { %v2139_v57 = vadd.f32 %v2138_v5, %v2055_v46  ;;  %v2173_v45 = vmax.f32 %v2133_v18, %v2137_v29 }
 0x320   : > { %v2142_v51 = vpop.f32.mrf.mxu1  ;;  %5082 = vmatpush3.bf16.msra.mxu1 %v5820_v39 }
 0x321   : > { %v2174_v24 = vmax.f32 %v2135_v35, %v2139_v57  ;;  %v2143_v63 = vadd.f32 %v2142_v51, %v2059_v22  ;;  %5083 = vmatprep.subr.bf16.mxu1 %v5821_v55 }
 0x322   : > { %v2144_v33 = vpop.f32.mrf.mxu1 }
 0x323   : > { %v2182_v3 = vmax.f32 %v2173_v45, %v2174_v24  ;;  %v2145_v5 = vadd.f32 %v2144_v33, %v2061_v44  ;;  %v5823_v45 = vld [vmem:[%s6391_s19] sm:$0xff]  }
 0x324   : > { %v2146_v41 = vpop.f32.mrf.mxu1  ;;  %5084 = vmatpush3.bf16.msra.mxu1 %v5823_v45 }
 0x325   : > { %v2147_v20 = vadd.f32 %v2146_v41, %v2063_v14  ;;  %v2194_v46 = vadd.f32 %v7035_v50, %v2182_v3 }
 0x326   : > { %v2148_v0 = vpop.f32.mrf.mxu1 }
 0x327   : > { %v2149_v34 = vadd.f32 %v2148_v0, %v2065_v10  ;;  %v2199_v29 = vmax.f32 %v2194_v46, 0.0  ;;  %v2175_v18 = vmax.f32 %v2143_v63, %v2147_v20  ;;  %v6087_v63 = vmov 0.0  }
 0x328   : > { %v2152_v61 = vpop.f32.mrf.mxu1  ;;  %5145 = vmatprep.subr.bf16.mxu1 %v6087_v63  ;;  %5165 = vmatprep.subr.bf16.mxu0 %v6087_v63 }
 0x329   : > { %v2176_v35 = vmax.f32 %v2145_v5, %v2149_v34  ;;  %2204 = vrot.lane.b32.xlu0 %v2199_v29, %s7696_s3  ;;  %v2153_v44 = vadd.f32 %v2152_v61, %v7012_v27  ;;  %s7211_s3 = scalar_lea.vmem %s7682_s10, %s7736_s29  ;;  %s7725_s29 = smov 40  }
 0x32a   : > { %v2154_v14 = vpop.f32.mrf.mxu1 }
 0x32b   : > { %v2183_v57 = vmax.f32 %v2175_v18, %v2176_v35  ;;  %v2155_v10 = vadd.f32 %v2154_v14, %v7014_v19  ;;  %v2198_v18 = vmax.f32 %v7038_v12, 0.0  ;;  %v5824_v35 = vld [vmem:[%s7071_s26 + $0x38] ss:$0 sps:$4 sm:$0xff]   ;;  %v5825_v12 = vld [vmem:[%s7071_s26 + $0x30] sm:$0xff]  }
 0x32c   : > { %v2156_v28 = vpop.f32.mrf.mxu1 }
 0x32d   : > { %v2157_v24 = vadd.f32 %v2156_v28, %v7016_v21  ;;  %v2195_v3 = vadd.f32 %v7035_v50, %v2183_v57 }
 0x32e   : > { %v2158_v22 = vpop.f32.mrf.mxu1 }
 0x32f   : > { %v2159_v51 = vadd.f32 %v2158_v22, %v7018_v59  ;;  %v2200_v34 = vmax.f32 %v2195_v3, 0.0  ;;  %v2177_v41 = vmax.f32 %v2153_v44, %v2157_v24  ;;  %v2594_v3 = vsel %vm2592_vm10, %v5824_v35, 0 }
 0x330   : > { %v2162_v33 = vpop.f32.mrf.mxu1 }
 0x331   : > { %v2178_v47 = vmax.f32 %v2155_v10, %v2159_v51  ;;  %2208 = vrot.lane.b32.xlu1 %v2200_v34, %s7719_s1  ;;  %v2163_v27 = vadd.f32 %v2162_v33, %v7020_v58  ;;  %v5826_v34 = vld [vmem:[%s7071_s26 + $0x28] sm:$0xff]   ;;  %v5827_v33 = vld [vmem:[%s7071_s26 + $0x20] sm:$0xff]  }
 0x332   : > { %v2164_v39 = vpop.f32.mrf.mxu1 }
 0x333   : > { %v2184_v20 = vmax.f32 %v2177_v41, %v2178_v47  ;;  %v2165_v19 = vadd.f32 %v2164_v39, %v7022_v1  ;;  %v5828_v41 = vld [vmem:[%s7071_s26 + $0x18] sm:$0xff]   ;;  %v5829_v47 = vld [vmem:[%s7071_s26 + $0x10] sm:$0xff]   ;;  %v5830_v39 = vld [vmem:[%s7071_s26 + $0x8] sm:$0xff]  }
 0x334   : > { %v2166_v21 = vpop.f32.mrf.mxu1 }
 0x335   : > { %v2167_v46 = vadd.f32 %v2166_v21, %v7024_v53  ;;  %v2196_v55 = vadd.f32 %v7035_v50, %v2184_v20  ;;  %v5831_v20 = vld [vmem:[%s7071_s26] sm:$0xff]  }
 0x336   : > { %v2168_v9 = vpop.f32.mrf.mxu1 }
 0x337   : > { %v2169_v59 = vadd.f32 %v2168_v9, %v7026_v11  ;;  %v2201_v0 = vmax.f32 %v2196_v55, 0.0  ;;  %v2179_v5 = vmax.f32 %v2163_v27, %v2167_v46 }
 0x339   : > { %v2180_v29 = vmax.f32 %v2165_v19, %v2169_v59  ;;  %2212 = vrot.lane.b32.xlu0 %v2201_v0, %s7702_s28  ;;  %s7105_s28 = scalar_lea.vmem %s7681_s9, %s5221_s18  ;;  %s7129_s18 = sand.u32 1, %s6069_s22  }
 0x33a   : > { %v5832_v21 = vld [vmem:[%s7105_s28 + $0x28] ss:$0 sps:$4 sm:$0x33]   ;;  %v5833_v55 = vld [vmem:[%s7105_s28 + $0x20] sm:$0xff]   ;;  %v5834_v27 = vld [vmem:[%s7105_s28 + $0x18] sm:$0xff]   ;;  %s4604_s4 = sshll.u32 %s7129_s18, 4 }
 0x33b   : > { %v2185_v58 = vmax.f32 %v2179_v5, %v2180_v29  ;;  %v2692_v46 = vsel %vm1998_vm6, %v5832_v21, 0  ;;  %v5835_v9 = vld [vmem:[%s7105_s28 + $0x10] sm:$0xff]   ;;  %v5836_v19 = vld [vmem:[%s7105_s28 + $0x8] sm:$0xff]   ;;  %v4717_v5 = vld [vmem:[%s7122_s30] ss:$0 sm:$0xff]  ;;  %s7142_s5 = scalar_lea.vmem [#allocation4], %s4604_s4 }
 0x33c   : > { %v5847_v21 = vld [vmem:[%s6263_s16 + $0xe0] ss:$8 sps:$4 sm:$0xff]   ;;  %s7216_s6 = scalar_lea.vmem [#allocation2], %s4604_s4  ;;  %s7724_s4 = smov 84  }
 0x33d   : > { %v2197_v1 = vadd.f32 %v7035_v50, %v2185_v58 }
 0x33f   : > { %v2202_v53 = vmax.f32 %v2197_v1, 0.0 }
 0x341   : > { %2216 = vrot.lane.b32.xlu1 %v2202_v53, %s7717_s15 }
 0x39b   : > { %v2205_v11 = vpop.permute.xlu0 %2204 }
 0x39c   : > { %v2219_v14 = vsel %vm1633_vm7, %v2198_v18, %v2205_v11 }
 0x39d   : > { %v2224_v24 = vpack.c.bf16 %v2219_v14, %v2219_v14 }
 0x3a3   : > { %v2209_v61 = vpop.permute.xlu1 %2208 }
 0x3a4   : > { %v2220_v57 = vsel %vm940_vm0, %v2205_v11, %v2209_v61 }
 0x3ab   : > { %v2213_v28 = vpop.permute.xlu0 %2212 }
 0x3ac   : > { %v2222_v45 = vsel %vm2221_vm9, %v2220_v57, %v2213_v28 }
 0x3ad   : > { %v2225_v50 = vpack.c.bf16 %v2222_v45, %v2222_v45  ;;  %v5837_v45 = vld [vmem:[%s7105_s28] sm:$0xff]  }
 0x3af   : > { %2471 = vmatprep.mubr.bf16.mxu1 %v2225_v50  ;;  %v5840_v50 = vld [vmem:[%s6263_s16 + $0x114] ss:$8 sps:$4 sm:$0xff]  }
 0x3b0   : > { %2472 = vmatmul.mubr.bf16.vlgmr.msra.gmra.mxu1 %v2224_v24  ;;  %v4744_v24 = vld [vmem:[%s7135_s2] ss:$0 sm:$0xff] }
 0x3b1   : > { %5146 = vmatpush3.bf16.msra.mxu1 %v2594_v3  ;;  %5161 = vmatprep.mubr.msk.bf16.mxu1 %vm6089_vm12, %v6087_v63 }
 0x3b2   : > { %5147 = vmatprep.subr.bf16.mxu1 %v6087_v63 }
 0x3b3   : > { %v2217_v22 = vpop.permute.xlu1 %2216 }
 0x3b4   : > { %v2223_v44 = vsel %vm969_vm1, %v2213_v28, %v2217_v22  ;;  %v2227_v10 = vpack.c.bf16 %v2217_v22, %v2217_v22 }
 0x3b5   : > { %v2226_v51 = vpack.c.bf16 %v2223_v44, %v2223_v44  ;;  %5148 = vmatpush3.bf16.msra.mxu1 %v5825_v12  ;;  %v5838_v44 = vld [vmem:[%s6263_s16 + $0x110] ss:$8 sps:$4 sm:$0xff]  }
 0x3b6   : > { %4743 = vmatprep.mubr.msk.bf16.mxu0 %vm2435_vm11, %v2227_v10  ;;  %5149 = vmatprep.subr.bf16.mxu1 %v6087_v63 }
 0x3b7   : > { %2512 = vmatmul.mubr.bf16.vlgmr.msra.gmra.mxu0 %v2226_v51  ;;  %v5843_v51 = vld [vmem:[%s6263_s16 + $0x104] ss:$8 sps:$4 sm:$0xff]  }
 0x3b8   : > { %5177 = vmatprep.mubr.msk.bf16.mxu0 %vm6089_vm12, %v6087_v63  ;;  %5166 = vmatpush3.bf16.msra.mxu0 %v2692_v46  ;;  %v5852_v46 = vld [vmem:[%s6263_s16 + $0xd4] ss:$8 sps:$4 sm:$0xff]  }
 0x3b9   : > { %5150 = vmatpush3.bf16.msra.mxu1 %v5826_v34  ;;  %5167 = vmatprep.subr.bf16.mxu0 %v6087_v63 }
 0x3ba   : > { %5151 = vmatprep.subr.bf16.mxu1 %v6087_v63 }
 0x3bc   : > { %5168 = vmatpush3.bf16.msra.mxu0 %v5833_v55  ;;  %v5850_v55 = vld [vmem:[%s6263_s16 + $0xd0] ss:$8 sps:$4 sm:$0xff]  }
 0x3bd   : > { %5152 = vmatpush3.bf16.msra.mxu1 %v5827_v33  ;;  %5169 = vmatprep.subr.bf16.mxu0 %v6087_v63 }
 0x3be   : > { %5153 = vmatprep.subr.bf16.mxu1 %v6087_v63 }
 0x3c0   : > { %5170 = vmatpush3.bf16.msra.mxu0 %v5834_v27  ;;  %v5853_v27 = vld [vmem:[%s6263_s16 + $0xc0] ss:$8 sps:$4 sm:$0xff]  }
 0x3c1   : > { %5154 = vmatpush3.bf16.msra.mxu1 %v5828_v41  ;;  %5171 = vmatprep.subr.bf16.mxu0 %v6087_v63  ;;  %v5841_v41 = vld [vmem:[%s6263_s16 + $0x100] ss:$8 sps:$4 sm:$0xff]  }
 0x3c2   : > { %5155 = vmatprep.subr.bf16.mxu1 %v6087_v63 }
 0x3c4   : > { %5172 = vmatpush3.bf16.msra.mxu0 %v5835_v9  ;;  %v5858_v9 = vld [vmem:[%s6263_s16 + $0xb4] ss:$8 sps:$4 sm:$0xff]  }
 0x3c5   : > { %5156 = vmatpush3.bf16.msra.mxu1 %v5829_v47  ;;  %5173 = vmatprep.subr.bf16.mxu0 %v6087_v63  ;;  %v5846_v47 = vld [vmem:[%s6263_s16 + $0xf4] ss:$8 sps:$4 sm:$0xff]  }
 0x3c6   : > { %5157 = vmatprep.subr.bf16.mxu1 %v6087_v63 }
 0x3c8   : > { %5174 = vmatpush3.bf16.msra.mxu0 %v5836_v19  ;;  %v5856_v19 = vld [vmem:[%s6263_s16 + $0xb0] ss:$8 sps:$4 sm:$0xff]  }
 0x3c9   : > { %5158 = vmatpush3.bf16.msra.mxu1 %v5830_v39  ;;  %5175 = vmatprep.subr.bf16.mxu0 %v6087_v63  ;;  %v5844_v39 = vld [vmem:[%s6263_s16 + $0xf0] ss:$8 sps:$4 sm:$0xff]  }
 0x3ca   : > { %5159 = vmatprep.subr.bf16.mxu1 %v6087_v63 }
 0x3cc   : > { %5176 = vmatpush3.bf16.msra.mxu0 %v5837_v45 }
 0x3cd   : > { %5160 = vmatpush3.bf16.msra.mxu1 %v5831_v20  ;;  %2858 = vmatprep.subr.bf16.mxu0 %v5840_v50  ;;  %v5849_v20 = vld [vmem:[%s6263_s16 + $0xe4] ss:$8 sps:$4 sm:$0xff]  }
 0x3ce   : > { %v5900_v50 = vld [vmem:[%s6324_s23 + $0x27c] ss:$8 sps:$4 sm:$0xff]  }
 0x470   : > { %v5085_v59 = vpop.f32.mrf.mxu1 }
 0x472   : > { %v5086_v0 = vpop.f32.mrf.mxu1 }
 0x473   : > { %v5087_v29 = vadd.f32 %v5086_v0, %v5085_v59  ;;  %v5861_v59 = vld [vmem:[%s6263_s16 + $0xa4] ss:$8 sps:$4 sm:$0xff]   ;;  %v5859_v0 = vld [vmem:[%s6263_s16 + $0xa0] ss:$8 sps:$4 sm:$0xff]  }
 0x474   : > { %v5088_v58 = vpop.f32.mrf.mxu1 }
 0x475   : > { %v2474_v1 = vadd.f32 %v5087_v29, %v4717_v5  ;;  %v5864_v5 = vld [vmem:[%s6263_s16 + $0x134] ss:$8 sps:$4 sm:$0xff]   ;;  %v5862_v29 = vld [vmem:[%s6263_s16 + $0x130] ss:$8 sps:$4 sm:$0xff]   ;;  %v5867_v58 = vld [vmem:[%s6263_s16 + $0x124] ss:$8 sps:$4 sm:$0xff]  }
 0x476   : > { %v5089_v53 = vpop.f32.mrf.mxu1 }
 0x477   : > { %v2513_v11 = vpop.f32.mrf.mxu0 }
 0x478   : > { %v2514_v61 = vadd.f32 %v2513_v11, %v2474_v1  ;;  %v5865_v1 = vld [vmem:[%s6263_s16 + $0x120] ss:$8 sps:$4 sm:$0xff]  }
 0x479   : > { %v2515_v18 = vpop.f32.mrf.mxu0 }
 0x47a   : > { %v2519_v35 = vmax.f32 %v2514_v61, 0.0  ;;  %v5892_v61 = vld [vmem:[%s6324_s23 + $0x298] ss:$8 sps:$4 sm:$0xff]  }
 0x47b   : > { %v2516_v14 = vpop.f32.mrf.mxu0 }
 0x47c   : > { %v2520_v57 = vpack.c.bf16 %v2519_v35, %v2519_v35  ;;  %v5897_v35 = vld [vmem:[%s6324_s23 + $0x28c] ss:$8 sps:$4 sm:$0xff]  }
 0x47d   : > { %v2517_v28 = vpop.f32.mrf.mxu0 }
 0x47e   : > { %5162 = vmatmul.mubr.msk.bf16.vlgmr.msra.gmra.mxu1 %vm2588_vm13, %v2520_v57  ;;  %v5895_v28 = vld [vmem:[%s6324_s23 + $0x288] ss:$8 sps:$4 sm:$0xff]  }
 0x53e   : > { %v2630_v3 = vpop.f32.mrf.mxu1 }
 0x53f   : > { %v2631_v12 = vadd.f32 %v4744_v24, %v2630_v3  ;;  %v5898_v3 = vld [vmem:[%s6324_s23 + $0x278] ss:$8 sps:$4 sm:$0xff]  }
 0x540   : > { %v5163_v22 = vpop.f32.mrf.mxu1 }
 0x541   : > { %v2636_v10 = vpack.c.bf16 %v2631_v12, %v2631_v12  ;;  %2734 = vst.msk [vmem:[%s7142_s5] sm:$0xff] %vm1600_vm4, %v2631_v12 }
 0x542   : > { %v2633_v34 = vpop.f32.mrf.mxu1 }
 0x543   : > { %5178 = vmatmul.mubr.msk.bf16.vlgmr.msra.gmra.mxu0 %vm1600_vm4, %v2636_v10  ;;  %v5903_v34 = vld [vmem:[%s6324_s23 + $0x26c] ss:$8 sps:$4 sm:$0xff]  }
 0x544   : > { %2859 = vmatpush1.bf16.msra.mxu0 %v5838_v44  ;;  %v5164_v33 = vpop.f32.mrf.mxu1  ;;  %4802 = vmatprep.mubr.msk.bf16.mxu0 %vm940_vm0, %v6271_v15  ;;  %v5855_v15 = vld [vmem:[%s6263_s16 + $0xc4] ss:$8 sps:$4 sm:$0xff]  }
 0x545   : > { %2860 = vmatprep.subr.bf16.mxu0 %v5843_v51 }
 0x548   : > { %2861 = vmatpush1.bf16.msra.mxu0 %v5841_v41  ;;  %v5901_v41 = vld [vmem:[%s6324_s23 + $0x268] ss:$8 sps:$4 sm:$0xff]  }
 0x549   : > { %2862 = vmatprep.subr.bf16.mxu0 %v5846_v47 }
 0x54c   : > { %2863 = vmatpush1.bf16.msra.mxu0 %v5844_v39 }
 0x54d   : > { %2864 = vmatprep.subr.bf16.mxu0 %v5849_v20 }
 0x550   : > { %2865 = vmatpush1.bf16.msra.mxu0 %v5847_v21  ;;  %v5904_v21 = vld [vmem:[%s6324_s23 + $0x258] ss:$8 sps:$4 sm:$0xff]  }
 0x551   : > { %2866 = vmatprep.subr.bf16.mxu0 %v5852_v46  ;;  %v5906_v46 = vld [vmem:[%s6324_s23 + $0x25c] ss:$8 sps:$4 sm:$0xff]  }
 0x554   : > { %2867 = vmatpush1.bf16.msra.mxu0 %v5850_v55  ;;  %v7249_v55 = vld [vmem:[%s6771_s20 + $0x1] ss:$0 sm:$0xff]  ;;  %s7726_s20 = smov 124  }
 0x555   : > { %2868 = vmatprep.subr.bf16.mxu0 %v5855_v15 }
 0x558   : > { %2869 = vmatpush1.bf16.msra.mxu0 %v5853_v27 }
 0x559   : > { %2870 = vmatprep.subr.bf16.mxu0 %v5858_v9 }
 0x55c   : > { %2871 = vmatpush1.bf16.msra.mxu0 %v5856_v19 }
 0x55d   : > { %2872 = vmatprep.subr.bf16.mxu0 %v5861_v59 }
 0x560   : > { %2873 = vmatpush1.bf16.msra.mxu0 %v5859_v0 }
 0x561   : > { %2886 = vmatprep.subr.bf16.mxu0 %v5864_v5  ;;  %v5909_v5 = vld [vmem:[%s6324_s23 + $0x24c] ss:$8 sps:$4 sm:$0xff]  }
 0x564   : > { %2887 = vmatpush2.bf16.msra.mxu0 %v5862_v29 }
 0x565   : > { %2888 = vmatprep.subr.bf16.mxu0 %v5867_v58 }
 0x568   : > { %2889 = vmatpush2.bf16.msra.mxu0 %v5865_v1  ;;  %v5907_v1 = vld [vmem:[%s6324_s23 + $0x248] ss:$8 sps:$4 sm:$0xff]  }
 0x56b   : > { %2891 = vmatmul.mubr.bf16.vlgmr.msra.gmra.mxu0 %v6522_v6 }
 0x56c   : > { %4803 = vmatprep.mubr.msk.bf16.mxu0 %vm940_vm0, %v6514_v52  ;;  %v4754_v52 = vld [vmem:[%s7211_s3] ss:$0 sm:$0xff] }
 0x573   : > { %2901 = vmatmul.mubr.bf16.gmra.mxu0 %v6539_v38 }
 0x574   : > { %4804 = vmatprep.mubr.msk.bf16.mxu0 %vm940_vm0, %v6537_v36 }
 0x57b   : > { %2911 = vmatmul.mubr.bf16.gmra.mxu0 %v6556_v62 }
 0x57c   : > { %4805 = vmatprep.mubr.msk.bf16.mxu0 %vm940_vm0, %v6554_v60 }
 0x583   : > { %2921 = vmatmul.mubr.bf16.gmra.mxu0 %v6573_v32  ;;  %v5868_v32 = vld [vmem:[%s6324_s23 + $0x218] ss:$8 sps:$4 sm:$0xff]  }
 0x584   : > { %4806 = vmatprep.mubr.msk.bf16.mxu0 %vm940_vm0, %v6571_v31  ;;  %v5870_v31 = vld [vmem:[%s6324_s23 + $0x21c] ss:$8 sps:$4 sm:$0xff]  }
 0x585   : > { %3642 = vmatprep.subr.bf16.mxu1 %v5870_v31 }
 0x586   : > { %3643 = vmatpush1.bf16.msra.mxu1 %v5868_v32 }
 0x58b   : > { %2931 = vmatmul.mubr.bf16.gmra.mxu0 %v6590_v56  ;;  %v5871_v56 = vld [vmem:[%s6324_s23 + $0x208] ss:$8 sps:$4 sm:$0xff]  }
 0x58c   : > { %4807 = vmatprep.mubr.msk.bf16.mxu0 %vm940_vm0, %v6588_v54  ;;  %v5873_v54 = vld [vmem:[%s6324_s23 + $0x20c] ss:$8 sps:$4 sm:$0xff]  }
 0x58d   : > { %3644 = vmatprep.subr.bf16.mxu1 %v5873_v54 }
 0x58e   : > { %3645 = vmatpush1.bf16.msra.mxu1 %v5871_v56 }
 0x593   : > { %2941 = vmatmul.mubr.bf16.gmra.mxu0 %v6607_v26  ;;  %v5874_v26 = vld [vmem:[%s6324_s23 + $0x1f8] ss:$8 sps:$4 sm:$0xff]  }
 0x594   : > { %4808 = vmatprep.mubr.msk.bf16.mxu0 %vm940_vm0, %v6605_v25  ;;  %v5876_v25 = vld [vmem:[%s6324_s23 + $0x1fc] ss:$8 sps:$4 sm:$0xff]  }
 0x595   : > { %3646 = vmatprep.subr.bf16.mxu1 %v5876_v25 }
 0x596   : > { %3647 = vmatpush1.bf16.msra.mxu1 %v5874_v26  ;;  %v5913_v26 = vld [vmem:[%s6324_s23 + $0x228] ss:$8 sps:$4 sm:$0xff]  }
 0x59b   : > { %2951 = vmatmul.mubr.bf16.gmra.mxu0 %v6624_v49  ;;  %v5877_v49 = vld [vmem:[%s6324_s23 + $0x1e8] ss:$8 sps:$4 sm:$0xff]  }
 0x59c   : > { %4809 = vmatprep.mubr.msk.bf16.mxu0 %vm940_vm0, %v6622_v4  ;;  %v5879_v4 = vld [vmem:[%s6324_s23 + $0x1ec] ss:$8 sps:$4 sm:$0xff]  }
 0x59d   : > { %3648 = vmatprep.subr.bf16.mxu1 %v5879_v4  ;;  %v5915_v4 = vld [vmem:[%s6324_s23 + $0x22c] ss:$8 sps:$4 sm:$0xff]  }
 0x59e   : > { %3649 = vmatpush1.bf16.msra.mxu1 %v5877_v49 }
 0x5a3   : > { %2961 = vmatmul.mubr.bf16.gmra.mxu0 %v6641_v8  ;;  %v5880_v8 = vld [vmem:[%s6324_s23 + $0x1d8] ss:$8 sps:$4 sm:$0xff]  }
 0x5a4   : > { %4810 = vmatprep.mubr.msk.bf16.mxu0 %vm940_vm0, %v6639_v2  ;;  %v5882_v2 = vld [vmem:[%s6324_s23 + $0x1dc] ss:$8 sps:$4 sm:$0xff]  }
 0x5a5   : > { %3650 = vmatprep.subr.bf16.mxu1 %v5882_v2 }
 0x5a6   : > { %3651 = vmatpush1.bf16.msra.mxu1 %v5880_v8 }
 0x5ab   : > { %2971 = vmatmul.mubr.bf16.gmra.mxu0 %v6658_v7  ;;  %v5883_v7 = vld [vmem:[%s6324_s23 + $0x1c8] ss:$8 sps:$4 sm:$0xff]  }
 0x5ac   : > { %4811 = vmatprep.mubr.msk.bf16.mxu0 %vm940_vm0, %v6656_v17  ;;  %v5885_v17 = vld [vmem:[%s6324_s23 + $0x1cc] ss:$8 sps:$4 sm:$0xff]  }
 0x5ad   : > { %3652 = vmatprep.subr.bf16.mxu1 %v5885_v17 }
 0x5ae   : > { %3653 = vmatpush1.bf16.msra.mxu1 %v5883_v7 }
 0x5b3   : > { %2981 = vmatmul.mubr.bf16.gmra.mxu0 %v6675_v23  ;;  %v5886_v23 = vld [vmem:[%s6324_s23 + $0x1b8] ss:$8 sps:$4 sm:$0xff]  }
 0x5b4   : > { %4812 = vmatprep.mubr.msk.bf16.mxu0 %vm940_vm0, %v6673_v16  ;;  %v5888_v16 = vld [vmem:[%s6324_s23 + $0x1bc] ss:$8 sps:$4 sm:$0xff]  }
 0x5b5   : > { %3654 = vmatprep.subr.bf16.mxu1 %v5888_v16 }
 0x5b6   : > { %3655 = vmatpush1.bf16.msra.mxu1 %v5886_v23 }
 0x5bb   : > { %2991 = vmatmul.mubr.bf16.gmra.mxu0 %v6692_v43  ;;  %v5891_v43 = vld [vmem:[%s6324_s23 + $0x1ac] ss:$8 sps:$4 sm:$0xff]  }
 0x5bc   : > { %4813 = vmatprep.mubr.msk.bf16.mxu0 %vm940_vm0, %v6690_v30  ;;  %3656 = vmatprep.subr.bf16.mxu1 %v5891_v43 }
 0x5c3   : > { %3001 = vmatmul.mubr.bf16.gmra.mxu0 %v6709_v13  ;;  %v5889_v13 = vld [vmem:[%s6324_s23 + $0x1a8] ss:$8 sps:$4 sm:$0xff]  }
 0x5c4   : > { %4814 = vmatprep.mubr.msk.bf16.mxu0 %vm940_vm0, %v6707_v37  ;;  %3657 = vmatpush1.bf16.msra.mxu1 %v5889_v13 }
 0x5cb   : > { %3011 = vmatmul.mubr.bf16.gmra.mxu0 %v6728_v40  ;;  %v5894_v40 = vld [vmem:[%s6324_s23 + $0x29c] ss:$8 sps:$4 sm:$0xff]  }
 0x5cc   : > { %4815 = vmatprep.mubr.msk.bf16.mxu0 %vm940_vm0, %v6726_v48  ;;  %3658 = vmatprep.subr.bf16.mxu1 %v5894_v40 }
 0x5cd   : > { %3659 = vmatpush2.bf16.msra.mxu1 %v5892_v61 }
 0x5ce   : > { %3660 = vmatprep.subr.bf16.mxu1 %v5897_v35 }
 0x5d1   : > { %3661 = vmatpush2.bf16.msra.mxu1 %v5895_v28 }
 0x5d2   : > { %3662 = vmatprep.subr.bf16.mxu1 %v5900_v50 }
 0x5d3   : > { %3021 = vmatmul.mubr.bf16.gmra.mxu0 %v6737_v42 }
 0x5d5   : > { %3663 = vmatpush2.bf16.msra.mxu1 %v5898_v3 }
 0x5d6   : > { %3664 = vmatprep.subr.bf16.mxu1 %v5903_v34 }
 0x5d9   : > { %3665 = vmatpush2.bf16.msra.mxu1 %v5901_v41 }
 0x5da   : > { %3666 = vmatprep.subr.bf16.mxu1 %v5906_v46 }
 0x5dd   : > { %3667 = vmatpush2.bf16.msra.mxu1 %v5904_v21 }
 0x5de   : > { %3668 = vmatprep.subr.bf16.mxu1 %v5909_v5 }
 0x5e1   : > { %3669 = vmatpush2.bf16.msra.mxu1 %v5907_v1 }
 0x603   : > { %v2728_v6 = vpop.f32.mrf.mxu0 }
 0x604   : > { %v2729_v36 = vadd.f32 %v4754_v52, %v2728_v6  ;;  %v5912_v6 = vld [vmem:[%s6324_s23 + $0x23c] ss:$8 sps:$4 sm:$0xff]  }
 0x605   : > { %v5179_v38 = vpop.f32.mrf.mxu0  ;;  %3670 = vmatprep.subr.bf16.mxu1 %v5912_v6 }
 0x606   : > { %2736 = vst.msk [vmem:[%s7216_s6] sm:$0xff] %vm2735_vm14, %v2729_v36 }
 0x607   : > { %v2731_v60 = vpop.f32.mrf.mxu0 }
 0x609   : > { %v5180_v62 = vpop.f32.mrf.mxu0 }
 0x60a   : > { %v5910_v62 = vld [vmem:[%s6324_s23 + $0x238] ss:$8 sps:$4 sm:$0xff]  }
 0x60b   : > { %3671 = vmatpush2.bf16.msra.mxu1 %v5910_v62 }
 0x60c   : > { %3672 = vmatprep.subr.bf16.mxu1 %v5915_v4 }
 0x60f   : > { %3673 = vmatpush2.bf16.msra.mxu1 %v5913_v26 }
 0x62b   : > { %v2892_v30 = vpop.f32.mrf.mxu0 }
 0x62d   : > { %v2894_v37 = vpop.f32.mrf.mxu0 }
 0x62f   : > { %v2896_v48 = vpop.f32.mrf.mxu0 }
 0x630   : > { %v3031_v42 = vmax.f32 %v2892_v30, %v2896_v48 }
 0x631   : > { %v2898_v53 = vpop.f32.mrf.mxu0 }
 0x632   : > { %v3032_v11 = vmax.f32 %v2894_v37, %v2898_v53 }
 0x633   : > { %v2902_v18 = vpop.f32.mrf.mxu0 }
 0x634   : > { %v7239_v14 = vmax.f32 %v3031_v42, %v3032_v11 }
 0x635   : > { %v2904_v57 = vpop.f32.mrf.mxu0 }
 0x637   : > { %v2906_v45 = vpop.f32.mrf.mxu0 }
 0x638   : > { %v3033_v10 = vmax.f32 %v2902_v18, %v2906_v45 }
 0x639   : > { %v2908_v24 = vpop.f32.mrf.mxu0 }
 0x63a   : > { %v3034_v22 = vmax.f32 %v2904_v57, %v2908_v24 }
 0x63b   : > { %v2912_v12 = vpop.f32.mrf.mxu0 }
 0x63c   : > { %v3060_v33 = vmax.f32 %v3033_v10, %v3034_v22 }
 0x63d   : > { %v2914_v44 = vpop.f32.mrf.mxu0 }
 0x63e   : > { %v7252_v27 = vadd.f32 %v7249_v55, %v3060_v33 }
 0x63f   : > { %v2916_v51 = vpop.f32.mrf.mxu0 }
 0x640   : > { %v3035_v39 = vmax.f32 %v2912_v12, %v2916_v51  ;;  %v3096_v29 = vmax.f32 %v7252_v27, 0.0 }
 0x641   : > { %v2918_v47 = vpop.f32.mrf.mxu0 }
 0x642   : > { %v3036_v20 = vmax.f32 %v2914_v44, %v2918_v47 }
 0x643   : > { %v2922_v15 = vpop.f32.mrf.mxu0 }
 0x644   : > { %v3061_v9 = vmax.f32 %v3035_v39, %v3036_v20 }
 0x645   : > { %v2924_v19 = vpop.f32.mrf.mxu0 }
 0x646   : > { %v3083_v59 = vadd.f32 %v7249_v55, %v3061_v9 }
 0x647   : > { %v2926_v0 = vpop.f32.mrf.mxu0 }
 0x648   : > { %v7257_v58 = vmax.f32 %v3083_v59, 0.0  ;;  %v3037_v36 = vmax.f32 %v2922_v15, %v2926_v0 }
 0x649   : > { %v2928_v52 = vpop.f32.mrf.mxu0 }
 0x64a   : > { %v3038_v38 = vmax.f32 %v2924_v19, %v2928_v52  ;;  %v5589_v60 = vpack.i.bf16 %v7257_v58, %v3096_v29  ;;  %v5918_v19 = vld [vmem:[%s6324_s23 + $0x31c] ss:$8 sps:$4 sm:$0xff]  }
 0x64b   : > { %v2932_v31 = vpop.f32.mrf.mxu0  ;;  %3725 = vmatprep.subr.bf16.mxu1 %v5918_v19 }
 0x64c   : > { %v3062_v32 = vmax.f32 %v3037_v36, %v3038_v38  ;;  %5590 = vrot.lane.b32.xlu0 %v5589_v60, %s7724_s4 }
 0x64d   : > { %v2934_v54 = vpop.f32.mrf.mxu0 }
 0x64e   : > { %v3084_v56 = vadd.f32 %v7249_v55, %v3062_v32 }
 0x64f   : > { %v2936_v25 = vpop.f32.mrf.mxu0 }
 0x650   : > { %v7269_v49 = vmax.f32 %v3084_v56, 0.0  ;;  %v3039_v8 = vmax.f32 %v2932_v31, %v2936_v25 }
 0x651   : > { %v2938_v2 = vpop.f32.mrf.mxu0 }
 0x652   : > { %v3040_v17 = vmax.f32 %v2934_v54, %v2938_v2  ;;  %v5594_v7 = vpack.i.bf16 %v7269_v49, %v7257_v58 }
 0x653   : > { %v2942_v16 = vpop.f32.mrf.mxu0 }
 0x654   : > { %v3063_v23 = vmax.f32 %v3039_v8, %v3040_v17  ;;  %5595 = vrot.lane.b32.xlu1 %v5594_v7, %s7725_s29 }
 0x655   : > { %v2944_v30 = vpop.f32.mrf.mxu0 }
 0x656   : > { %v3085_v43 = vadd.f32 %v7249_v55, %v3063_v23 }
 0x657   : > { %v2946_v37 = vpop.f32.mrf.mxu0 }
 0x658   : > { %v7275_v13 = vmax.f32 %v3085_v43, 0.0  ;;  %v3041_v40 = vmax.f32 %v2942_v16, %v2946_v37 }
 0x659   : > { %v2948_v48 = vpop.f32.mrf.mxu0 }
 0x65a   : > { %v3042_v42 = vmax.f32 %v2944_v30, %v2948_v48  ;;  %v5604_v53 = vpack.i.bf16 %v7275_v13, %v7269_v49 }
 0x65b   : > { %v2952_v11 = vpop.f32.mrf.mxu0 }
 0x65c   : > { %v3064_v61 = vmax.f32 %v3041_v40, %v3042_v42  ;;  %5605 = vrot.lane.b32.xlu1 %v5604_v53, %s7724_s4  ;;  %5600 = vrot.lane.b32.xlu0 %v5604_v53, %s7726_s20 }
 0x65d   : > { %v2954_v18 = vpop.f32.mrf.mxu0 }
 0x65e   : > { %v3086_v35 = vadd.f32 %v7249_v55, %v3064_v61 }
 0x65f   : > { %v2956_v57 = vpop.f32.mrf.mxu0 }
 0x660   : > { %v7282_v28 = vmax.f32 %v3086_v35, 0.0  ;;  %v3043_v50 = vmax.f32 %v2952_v11, %v2956_v57 }
 0x661   : > { %v2958_v45 = vpop.f32.mrf.mxu0 }
 0x662   : > { %v3044_v24 = vmax.f32 %v2954_v18, %v2958_v45  ;;  %v7286_v3 = vpack.i.bf16 %v7282_v28, %v7275_v13 }
 0x663   : > { %v2962_v12 = vpop.f32.mrf.mxu0 }
 0x664   : > { %v3065_v22 = vmax.f32 %v3043_v50, %v3044_v24  ;;  %5610 = vrot.lane.b32.xlu0 %v7286_v3, %s7725_s29 }
 0x665   : > { %v2964_v44 = vpop.f32.mrf.mxu0 }
 0x666   : > { %v3087_v10 = vadd.f32 %v7249_v55, %v3065_v22 }
 0x667   : > { %v2966_v51 = vpop.f32.mrf.mxu0 }
 0x668   : > { %v7291_v34 = vmax.f32 %v3087_v10, 0.0  ;;  %v3045_v41 = vmax.f32 %v2962_v12, %v2966_v51 }
 0x669   : > { %v2968_v33 = vpop.f32.mrf.mxu0 }
 0x66a   : > { %v3046_v47 = vmax.f32 %v2964_v44, %v2968_v33  ;;  %v5619_v39 = vpack.i.bf16 %v7291_v34, %v7282_v28 }
 0x66b   : > { %v2972_v20 = vpop.f32.mrf.mxu0 }
 0x66c   : > { %v3066_v21 = vmax.f32 %v3045_v41, %v3046_v47  ;;  %5620 = vrot.lane.b32.xlu0 %v5619_v39, %s7724_s4  ;;  %5615 = vrot.lane.b32.xlu1 %v5619_v39, %s7726_s20 }
 0x66d   : > { %v2974_v46 = vpop.f32.mrf.mxu0 }
 0x66e   : > { %v3088_v15 = vadd.f32 %v7249_v55, %v3066_v21 }
 0x66f   : > { %v2976_v9 = vpop.f32.mrf.mxu0 }
 0x670   : > { %v7299_v59 = vmax.f32 %v3088_v15, 0.0  ;;  %v3047_v5 = vmax.f32 %v2972_v20, %v2976_v9 }
 0x671   : > { %v2978_v0 = vpop.f32.mrf.mxu0 }
 0x672   : > { %v3048_v1 = vmax.f32 %v2974_v46, %v2978_v0  ;;  %v7303_v52 = vpack.i.bf16 %v7299_v59, %v7291_v34 }
 0x673   : > { %v2982_v6 = vpop.f32.mrf.mxu0 }
 0x674   : > { %v3067_v36 = vmax.f32 %v3047_v5, %v3048_v1  ;;  %5625 = vrot.lane.b32.xlu1 %v7303_v52, %s7725_s29 }
 0x675   : > { %v2984_v38 = vpop.f32.mrf.mxu0 }
 0x676   : > { %v3089_v60 = vadd.f32 %v7249_v55, %v3067_v36 }
 0x677   : > { %v2986_v62 = vpop.f32.mrf.mxu0 }
 0x678   : > { %v7308_v31 = vmax.f32 %v3089_v60, 0.0  ;;  %v3049_v54 = vmax.f32 %v2982_v6, %v2986_v62  ;;  %v3081_v62 = vadd.f32 %v7249_v55, %v7239_v14 }
 0x679   : > { %v2988_v32 = vpop.f32.mrf.mxu0 }
 0x67a   : > { %v3050_v56 = vmax.f32 %v2984_v38, %v2988_v32  ;;  %v5634_v25 = vpack.i.bf16 %v7308_v31, %v7299_v59 }
 0x67b   : > { %v2992_v26 = vpop.f32.mrf.mxu0 }
 0x67c   : > { %v3068_v4 = vmax.f32 %v3049_v54, %v3050_v56  ;;  %5635 = vrot.lane.b32.xlu1 %v5634_v25, %s7724_s4  ;;  %5630 = vrot.lane.b32.xlu0 %v5634_v25, %s7726_s20 }
 0x67d   : > { %v2994_v2 = vpop.f32.mrf.mxu0 }
 0x67e   : > { %v3090_v8 = vadd.f32 %v7249_v55, %v3068_v4 }
 0x67f   : > { %v2996_v17 = vpop.f32.mrf.mxu0 }
 0x680   : > { %v7315_v7 = vmax.f32 %v3090_v8, 0.0  ;;  %v3051_v23 = vmax.f32 %v2992_v26, %v2996_v17  ;;  %v3095_v26 = vmax.f32 %v3081_v62, 0.0 }
 0x681   : > { %v2998_v16 = vpop.f32.mrf.mxu0 }
 0x682   : > { %v3052_v30 = vmax.f32 %v2994_v2, %v2998_v16  ;;  %v5639_v43 = vpack.i.bf16 %v7315_v7, %v7308_v31 }
 0x683   : > { %v3002_v37 = vpop.f32.mrf.mxu0 }
 0x684   : > { %v3069_v48 = vmax.f32 %v3051_v23, %v3052_v30  ;;  %5640 = vrot.lane.b32.xlu0 %v5639_v43, %s7725_s29  ;;  %v5916_v30 = vld [vmem:[%s6324_s23 + $0x318] ss:$8 sps:$4 sm:$0xff]  }
 0x685   : > { %v3004_v40 = vpop.f32.mrf.mxu0 }
 0x686   : > { %v3091_v42 = vadd.f32 %v7249_v55, %v3069_v48  ;;  %v5924_v48 = vld [vmem:[%s6324_s23 + $0x2fc] ss:$8 sps:$4 sm:$0xff]  }
 0x687   : > { %v3006_v53 = vpop.f32.mrf.mxu0 }
 0x688   : > { %v3105_v11 = vmax.f32 %v3091_v42, 0.0  ;;  %v3053_v18 = vmax.f32 %v3002_v37, %v3006_v53  ;;  %v5919_v37 = vld [vmem:[%s6324_s23 + $0x308] ss:$8 sps:$4 sm:$0xff]   ;;  %v5922_v53 = vld [vmem:[%s6324_s23 + $0x2f8] ss:$8 sps:$4 sm:$0xff]  }
 0x689   : > { %v3008_v61 = vpop.f32.mrf.mxu0 }
 0x68a   : > { %v3054_v35 = vmax.f32 %v3004_v40, %v3008_v61  ;;  %v5649_v57 = vpack.i.bf16 %v3105_v11, %v7315_v7 }
 0x68b   : > { %v3012_v45 = vpop.f32.mrf.mxu0 }
 0x68c   : > { %v3070_v50 = vmax.f32 %v3053_v18, %v3054_v35  ;;  %5650 = vrot.lane.b32.xlu0 %v5649_v57, %s7724_s4  ;;  %5645 = vrot.lane.b32.xlu1 %v5649_v57, %s7726_s20 }
 0x68d   : > { %v3014_v24 = vpop.f32.mrf.mxu0 }
 0x68e   : > { %v3092_v12 = vadd.f32 %v7249_v55, %v3070_v50  ;;  %v5925_v50 = vld [vmem:[%s6324_s23 + $0x2e8] ss:$8 sps:$4 sm:$0xff]  }
 0x68f   : > { %v3016_v22 = vpop.f32.mrf.mxu0 }
 0x690   : > { %v3106_v44 = vmax.f32 %v3092_v12, 0.0  ;;  %v3055_v51 = vmax.f32 %v3012_v45, %v3016_v22  ;;  %v5930_v22 = vld [vmem:[%s6324_s23 + $0x2dc] ss:$8 sps:$4 sm:$0xff]  }
 0x691   : > { %v3018_v10 = vpop.f32.mrf.mxu0 }
 0x692   : > { %v3056_v33 = vmax.f32 %v3014_v24, %v3018_v10  ;;  %v5654_v41 = vpack.i.bf16 %v3106_v44, %v3105_v11  ;;  %v5927_v11 = vld [vmem:[%s6324_s23 + $0x2ec] ss:$8 sps:$4 sm:$0xff]  }
 0x693   : > { %v3022_v47 = vpop.f32.mrf.mxu0 }
 0x694   : > { %v3071_v39 = vmax.f32 %v3055_v51, %v3056_v33  ;;  %5655 = vrot.lane.b32.xlu1 %v5654_v41, %s7725_s29 }
 0x695   : > { %v3024_v20 = vpop.f32.mrf.mxu0 }
 0x696   : > { %v3093_v21 = vadd.f32 %v7249_v55, %v3071_v39 }
 0x697   : > { %v3026_v46 = vpop.f32.mrf.mxu0 }
 0x698   : > { %v3107_v15 = vmax.f32 %v3093_v21, 0.0  ;;  %5665 = vrot.lane.b32.xlu1 %v7286_v3, %s7727_s0  ;;  %v3057_v19 = vmax.f32 %v3022_v47, %v3026_v46  ;;  %v5933_v46 = vld [vmem:[%s6324_s23 + $0x2cc] ss:$8 sps:$4 sm:$0xff]  }
 0x699   : > { %v3028_v9 = vpop.f32.mrf.mxu0 }
 0x69a   : > { %v3058_v0 = vmax.f32 %v3024_v20, %v3028_v9  ;;  %v5659_v5 = vpack.i.bf16 %v3107_v15, %v3106_v44  ;;  %v5928_v20 = vld [vmem:[%s6324_s23 + $0x2d8] ss:$8 sps:$4 sm:$0xff]  }
 0x69c   : > { %v3072_v1 = vmax.f32 %v3057_v19, %v3058_v0  ;;  %5675 = vrot.lane.b32.xlu1 %v5639_v43, %s7727_s0  ;;  %5660 = vrot.lane.b32.xlu0 %v5659_v5, %s7726_s20  ;;  %v5934_v19 = vld [vmem:[%s6324_s23 + $0x2b8] ss:$8 sps:$4 sm:$0xff]   ;;  %v5939_v0 = vld [vmem:[%s6324_s23 + $0x2ac] ss:$8 sps:$4 sm:$0xff]  }
 0x69e   : > { %v3094_v6 = vadd.f32 %v7249_v55, %v3072_v1 }
 0x6a0   : > { %v3108_v36 = vmax.f32 %v3094_v6, 0.0  ;;  %5670 = vrot.lane.b32.xlu0 %v7303_v52, %s7727_s0 }
 0x6a2   : > { %v5684_v38 = vpack.i.bf16 %v3108_v36, %v3107_v15 }
 0x6a4   : > { %5680 = vrot.lane.b32.xlu0 %v5654_v41, %s7727_s0  ;;  %5685 = vrot.lane.b32.xlu1 %v5684_v38, %s7727_s0  ;;  %v4870_v38 = vld [vmem:[%s6324_s23 + $0x348] sm:$0x33] }
 0x6be   : > { %v5591_v3 = vpop.permute.xlu0 %5590 }
 0x6bf   : > { %v5593_v32 = vunpack.i.h.bf16 %v5591_v3  ;;  %v5592_v54 = vunpack.i.l.bf16 %v5591_v3 }
 0x6c1   : > { %v3243_v8 = vsel %vm1600_vm4, %v3096_v29, %v5593_v32  ;;  %v3242_v14 = vsel %vm1600_vm4, %v3095_v26, %v5592_v54  ;;  %v5921_v29 = vld [vmem:[%s6324_s23 + $0x30c] ss:$8 sps:$4 sm:$0xff]  }
 0x6c2   : > { %v3282_v43 = vpack.c.bf16 %v3243_v8, %v3242_v14 }
 0x6c6   : > { %v5596_v60 = vpop.permute.xlu1 %5595 }
 0x6c7   : > { %v5598_v56 = vunpack.i.h.bf16 %v5596_v60  ;;  %v5597_v25 = vunpack.i.l.bf16 %v5596_v60  ;;  %v5937_v60 = vld [vmem:[%s6324_s23 + $0x2a8] ss:$8 sps:$4 sm:$0xff]  }
 0x6c9   : > { %v3253_v55 = vsel %vm1611_vm3, %v5593_v32, %v5598_v56  ;;  %v3252_v17 = vsel %vm1611_vm3, %v5592_v54, %v5597_v25  ;;  %v4924_v54 = vcombine.high %v4870_v38, %v4870_v38  ;;  %v4923_v56 = vcombine.low %v4870_v38, %v4870_v38 }
 0x6ce   : > { %v7338_v4 = vpop.permute.xlu0 %5600  ;;  %v5606_v40 = vpop.permute.xlu1 %5605 }
 0x6cf   : > { %v5603_v52 = vunpack.i.h.bf16 %v7338_v4  ;;  %v5602_v2 = vunpack.i.l.bf16 %v7338_v4  ;;  %v5608_v61 = vunpack.i.h.bf16 %v5606_v40  ;;  %v5607_v18 = vunpack.i.l.bf16 %v5606_v40 }
 0x6d1   : > { %v3262_v16 = vsel %vm1622_vm5, %v3252_v17, %v5602_v2  ;;  %v3263_v23 = vsel %vm1622_vm5, %v3253_v55, %v5603_v52  ;;  %v3244_v51 = vsel %vm1600_vm4, %v7257_v58, %v5607_v18  ;;  %v3245_v33 = vsel %vm1600_vm4, %v7269_v49, %v5608_v61  ;;  %v5931_v58 = vld [vmem:[%s6324_s23 + $0x2c8] ss:$8 sps:$4 sm:$0xff]   ;;  %v5936_v49 = vld [vmem:[%s6324_s23 + $0x2bc] ss:$8 sps:$4 sm:$0xff]  }
 0x6d2   : > { %v3283_v27 = vpack.c.bf16 %v3263_v23, %v3262_v16  ;;  %v3286_v21 = vpack.c.bf16 %v3245_v33, %v3244_v51 }
 0x6d4   : > { %3674 = vmatprep.mubr.bf16.mxu1 %v3283_v27  ;;  %v3637_v27 = vsel %vm1998_vm6, %v4923_v56, 0 }
 0x6d5   : > { %3675 = vmatmul.mubr.bf16.vlgmr.msra.gmra.mxu1 %v3282_v43 }
 0x6d6   : > { %3726 = vmatpush1.bf16.msra.mxu1 %v5916_v30  ;;  %v5611_v42 = vpop.permute.xlu0 %5610  ;;  %v5947_v30 = vld [vmem:[%s6324_s23 + $0x32c] ss:$8 sps:$4 sm:$0xff]  }
 0x6d7   : > { %3727 = vmatprep.subr.bf16.mxu1 %v5921_v29  ;;  %v5613_v35 = vunpack.i.h.bf16 %v5611_v42  ;;  %v5612_v57 = vunpack.i.l.bf16 %v5611_v42 }
 0x6d9   : > { %v3255_v44 = vsel %vm1611_vm3, %v5608_v61, %v5613_v35  ;;  %v3254_v10 = vsel %vm1611_vm3, %v5607_v18, %v5612_v57  ;;  %v7728_v35 = vmov 0  }
 0x6da   : > { %3728 = vmatpush1.bf16.msra.mxu1 %v5919_v37  ;;  %v5945_v37 = vld [vmem:[%s6324_s23 + $0x328] ss:$8 sps:$4 sm:$0xff]  }
 0x6db   : > { %3729 = vmatprep.subr.bf16.mxu1 %v5924_v48 }
 0x6de   : > { %v7360_v45 = vpop.permute.xlu1 %5615  ;;  %3730 = vmatpush1.bf16.msra.mxu1 %v5922_v53  ;;  %v5621_v15 = vpop.permute.xlu0 %5620 }
 0x6df   : > { %v5618_v24 = vunpack.i.h.bf16 %v7360_v45  ;;  %v5617_v12 = vunpack.i.l.bf16 %v7360_v45  ;;  %3731 = vmatprep.subr.bf16.mxu1 %v5927_v11  ;;  %v5623_v5 = vunpack.i.h.bf16 %v5621_v15  ;;  %v5622_v1 = vunpack.i.l.bf16 %v5621_v15 }
 0x6e1   : > { %v3264_v41 = vsel %vm1622_vm5, %v3254_v10, %v5617_v12  ;;  %v3265_v47 = vsel %vm1622_vm5, %v3255_v44, %v5618_v24  ;;  %v3246_v8 = vsel %vm1600_vm4, %v7275_v13, %v5622_v1  ;;  %v3247_v14 = vsel %vm1600_vm4, %v7282_v28, %v5623_v5  ;;  %v5944_v13 = vld [vmem:[%s6324_s23 + $0x33c] ss:$8 sps:$4 sm:$0xff]   ;;  %v5942_v28 = vld [vmem:[%s6324_s23 + $0x338] ss:$8 sps:$4 sm:$0xff]   ;;  %s7729_s23 = smov 112  }
 0x6e2   : > { %v3287_v39 = vpack.c.bf16 %v3265_v47, %v3264_v41  ;;  %3732 = vmatpush1.bf16.msra.mxu1 %v5925_v50  ;;  %v3290_v23 = vpack.c.bf16 %v3247_v14, %v3246_v8 }
 0x6e3   : > { %3733 = vmatprep.subr.bf16.mxu1 %v5930_v22 }
 0x6e4   : > { %3684 = vmatprep.mubr.bf16.mxu1 %v3287_v39 }
 0x6e5   : > { %3685 = vmatmul.mubr.bf16.gmra.mxu1 %v3286_v21 }
 0x6e6   : > { %3734 = vmatpush1.bf16.msra.mxu1 %v5928_v20  ;;  %v5626_v9 = vpop.permute.xlu1 %5625 }
 0x6e7   : > { %3735 = vmatprep.subr.bf16.mxu1 %v5933_v46  ;;  %v5628_v6 = vunpack.i.h.bf16 %v5626_v9  ;;  %v5627_v36 = vunpack.i.l.bf16 %v5626_v9 }
 0x6e9   : > { %v3257_v25 = vsel %vm1611_vm3, %v5623_v5, %v5628_v6  ;;  %v3256_v26 = vsel %vm1611_vm3, %v5622_v1, %v5627_v36 }
 0x6ea   : > { %3736 = vmatpush1.bf16.msra.mxu1 %v5931_v58 }
 0x6eb   : > { %3737 = vmatprep.subr.bf16.mxu1 %v5936_v49 }
 0x6ee   : > { %v7385_v3 = vpop.permute.xlu0 %5630  ;;  %3738 = vmatpush1.bf16.msra.mxu1 %v5934_v19  ;;  %v5636_v43 = vpop.permute.xlu1 %5635 }
 0x6ef   : > { %v5633_v62 = vunpack.i.h.bf16 %v7385_v3  ;;  %v5632_v32 = vunpack.i.l.bf16 %v7385_v3  ;;  %3739 = vmatprep.subr.bf16.mxu1 %v5939_v0  ;;  %v5638_v48 = vunpack.i.h.bf16 %v5636_v43  ;;  %v5637_v40 = vunpack.i.l.bf16 %v5636_v43 }
 0x6f1   : > { %v3266_v55 = vsel %vm1622_vm5, %v3256_v26, %v5632_v32  ;;  %v3267_v17 = vsel %vm1622_vm5, %v3257_v25, %v5633_v62  ;;  %v3248_v22 = vsel %vm1600_vm4, %v7291_v34, %v5637_v40  ;;  %v3249_v44 = vsel %vm1600_vm4, %v7299_v59, %v5638_v48 }
 0x6f2   : > { %v3291_v16 = vpack.c.bf16 %v3267_v17, %v3266_v55  ;;  %3740 = vmatpush1.bf16.msra.mxu1 %v5937_v60  ;;  %v3294_v41 = vpack.c.bf16 %v3249_v44, %v3248_v22  ;;  %v5952_v22 = vld [vmem:[%s6391_s19 + $0x130] sm:$0xff]  }
 0x6f3   : > { %4925 = vmatprep.subr.msk.bf16.mxu1 %vm1998_vm6, %v4924_v54  ;;  %v5953_v44 = vld [vmem:[%s6391_s19 + $0xf0] sm:$0xff]  }
 0x6f4   : > { %3694 = vmatprep.mubr.bf16.mxu1 %v3291_v16 }
 0x6f5   : > { %3695 = vmatmul.mubr.bf16.gmra.mxu1 %v3290_v23 }
 0x6f6   : > { %3752 = vmatpush2.bf16.msra.mxu1 %v3637_v27  ;;  %v5641_v29 = vpop.permute.xlu0 %5640 }
 0x6f7   : > { %3753 = vmatprep.subr.bf16.mxu1 %v5944_v13  ;;  %v5643_v42 = vunpack.i.h.bf16 %v5641_v29  ;;  %v5642_v53 = vunpack.i.l.bf16 %v5641_v29 }
 0x6f9   : > { %v3259_v57 = vsel %vm1611_vm3, %v5638_v48, %v5643_v42  ;;  %v3258_v50 = vsel %vm1611_vm3, %v5637_v40, %v5642_v53 }
 0x6fa   : > { %3754 = vmatpush2.bf16.msra.mxu1 %v5942_v28 }
 0x6fb   : > { %3755 = vmatprep.subr.bf16.mxu1 %v5947_v30 }
 0x6fe   : > { %v7408_v11 = vpop.permute.xlu1 %5645  ;;  %3756 = vmatpush2.bf16.msra.mxu1 %v5945_v37  ;;  %v5651_v39 = vpop.permute.xlu0 %5650 }
 0x6ff   : > { %v5648_v61 = vunpack.i.h.bf16 %v7408_v11  ;;  %v5647_v18 = vunpack.i.l.bf16 %v7408_v11  ;;  %4117 = vmatprep.subr.bf16.mxu1 %v7728_v35  ;;  %v5653_v46 = vunpack.i.h.bf16 %v5651_v39  ;;  %v5652_v58 = vunpack.i.l.bf16 %v5651_v39  ;;  %v5949_v11 = vld [vmem:[%s6391_s19 + $0x100] sm:$0xff]   ;;  %v5964_v39 = vld [vmem:[%s6391_s19 + $0x170] sm:$0xff]  }
 0x701   : > { %v3268_v10 = vsel %vm1622_vm5, %v3258_v50, %v5647_v18  ;;  %v3269_v51 = vsel %vm1622_vm5, %v3259_v57, %v5648_v61  ;;  %v3250_v38 = vsel %vm1600_vm4, %v7308_v31, %v5652_v58  ;;  %v3251_v60 = vsel %vm1600_vm4, %v7315_v7, %v5653_v46  ;;  %v5951_v50 = vld [vmem:[%s6391_s19 + $0xf8] sm:$0xff]  }
 0x702   : > { %v3295_v33 = vpack.c.bf16 %v3269_v51, %v3268_v10  ;;  %v3298_v26 = vpack.c.bf16 %v3251_v60, %v3250_v38  ;;  %v5960_v10 = vld [vmem:[%s6391_s19 + $0x180] sm:$0xff]   ;;  %v5954_v51 = vld [vmem:[%s6391_s19 + $0x128] sm:$0xff]  }
 0x704   : > { %3704 = vmatprep.mubr.bf16.mxu1 %v3295_v33  ;;  %v5962_v33 = vld [vmem:[%s6391_s19 + $0x178] sm:$0xff]  }
 0x705   : > { %3705 = vmatmul.mubr.bf16.gmra.mxu1 %v3294_v41  ;;  %v5955_v41 = vld [vmem:[%s6391_s19 + $0xe8] sm:$0xff]  }
 0x706   : > { %v5656_v47 = vpop.permute.xlu1 %5655 }
 0x707   : > { %v5658_v59 = vunpack.i.h.bf16 %v5656_v47  ;;  %v5657_v49 = vunpack.i.l.bf16 %v5656_v47  ;;  %v5956_v47 = vld [vmem:[%s6391_s19 + $0x120] sm:$0xff]  }
 0x709   : > { %v3261_v6 = vsel %vm1611_vm3, %v5653_v46, %v5658_v59  ;;  %v3260_v36 = vsel %vm1611_vm3, %v5652_v58, %v5657_v49  ;;  %v5959_v46 = vld [vmem:[%s6391_s19 + $0xd8] sm:$0xff]   ;;  %v5961_v58 = vld [vmem:[%s6391_s19 + $0x110] sm:$0xff]  }
 0x70a   : > { %v5666_v20 = vpop.permute.xlu1 %5665  ;;  %v5963_v49 = vld [vmem:[%s6391_s19 + $0xd0] sm:$0xff]  }
 0x70b   : > { %v5668_v21 = vunpack.i.h.bf16 %v5666_v20  ;;  %v5667_v34 = vunpack.i.l.bf16 %v5666_v20  ;;  %v5957_v20 = vld [vmem:[%s6391_s19 + $0xe0] sm:$0xff]  }
 0x70d   : > { %v3273_v15 = vsel %vm1633_vm7, %v5603_v52, %v5668_v21  ;;  %v3272_v9 = vsel %vm1633_vm7, %v5602_v2, %v5667_v34  ;;  %v3285_v8 = vpack.c.bf16 %v5668_v21, %v5667_v34  ;;  %v5958_v21 = vld [vmem:[%s6391_s19 + $0x118] sm:$0xff]  }
 0x70e   : > { %v3284_v19 = vpack.c.bf16 %v3273_v15, %v3272_v9  ;;  %v5661_v0 = vpop.permute.xlu0 %5660  ;;  %v5676_v17 = vpop.permute.xlu1 %5675 }
 0x70f   : > { %v5663_v5 = vunpack.i.h.bf16 %v5661_v0  ;;  %v5662_v1 = vunpack.i.l.bf16 %v5661_v0  ;;  %v5678_v16 = vunpack.i.h.bf16 %v5676_v17  ;;  %v5677_v23 = vunpack.i.l.bf16 %v5676_v17 }
 0x711   : > { %v3270_v52 = vsel %vm1622_vm5, %v3260_v36, %v5662_v1  ;;  %v3271_v4 = vsel %vm1622_vm5, %v3261_v6, %v5663_v5  ;;  %v3293_v27 = vpack.c.bf16 %v5678_v16, %v5677_v23  ;;  %v3276_v45 = vsel %vm1633_vm7, %v5632_v32, %v5677_v23 }
 0x712   : > { %v5671_v54 = vpop.permute.xlu0 %5670  ;;  %v3299_v2 = vpack.c.bf16 %v3271_v4, %v3270_v52 }
 0x713   : > { %v5673_v56 = vunpack.i.h.bf16 %v5671_v54  ;;  %v5672_v25 = vunpack.i.l.bf16 %v5671_v54 }
 0x714   : > { %3714 = vmatprep.mubr.bf16.mxu1 %v3299_v2 }
 0x715   : > { %3715 = vmatmul.mubr.bf16.gmra.mxu1 %v3298_v26  ;;  %v3274_v14 = vsel %vm1633_vm7, %v5617_v12, %v5672_v25  ;;  %v3275_v31 = vsel %vm1633_vm7, %v5618_v24, %v5673_v56  ;;  %v3289_v55 = vpack.c.bf16 %v5673_v56, %v5672_v25  ;;  %v3277_v24 = vsel %vm1633_vm7, %v5633_v62, %v5678_v16 }
 0x716   : > { %4926 = vmatprep.mubr.msk.bf16.mxu1 %vm1982_vm8, %v3285_v8  ;;  %v3288_v7 = vpack.c.bf16 %v3275_v31, %v3274_v14  ;;  %v5681_v13 = vpop.permute.xlu0 %5680  ;;  %v3292_v30 = vpack.c.bf16 %v3277_v24, %v3276_v45  ;;  %v5686_v29 = vpop.permute.xlu1 %5685  ;;  %v7501_v45 = vld [vmem:[%s7032_s17 + $0x1] ss:$0 sm:$0xff]  ;;  %s4384_s17 = scalar_lea.sflag [#allocation5], %s7129_s18 }
 0x717   : > { %v5683_v12 = vunpack.i.h.bf16 %v5681_v13  ;;  %v5682_v28 = vunpack.i.l.bf16 %v5681_v13  ;;  %v5688_v37 = vunpack.i.h.bf16 %v5686_v29  ;;  %v5687_v48 = vunpack.i.l.bf16 %v5686_v29 }
 0x719   : > { %v3297_v43 = vpack.c.bf16 %v5683_v12, %v5682_v28  ;;  %v3278_v32 = vsel %vm1633_vm7, %v5647_v18, %v5682_v28  ;;  %v3279_v3 = vsel %vm1633_vm7, %v5648_v61, %v5683_v12  ;;  %v3301_v40 = vpack.c.bf16 %v5688_v37, %v5687_v48  ;;  %v5948_v18 = vld [vmem:[%s6391_s19 + $0x140] sm:$0xff]   ;;  %v5950_v61 = vld [vmem:[%s6391_s19 + $0x138] sm:$0xff]  }
 0x71a   : > { %v3296_v62 = vpack.c.bf16 %v3279_v3, %v3278_v32  ;;  %v3280_v42 = vsel %vm1633_vm7, %v5662_v1, %v5687_v48  ;;  %v3281_v53 = vsel %vm1633_vm7, %v5663_v5, %v5688_v37  ;;  %5107 = vmatprep.subr.bf16.mxu0 %v5948_v18  ;;  %v5965_v48 = vld [vmem:[%s6391_s19 + $0x168] sm:$0xff]  }
 0x71b   : > { %v3300_v57 = vpack.c.bf16 %v3281_v53, %v3280_v42  ;;  %5108 = vmatpush3.bf16.msra.mxu0 %v5949_v11  ;;  %v5967_v32 = vld [vmem:[%s6391_s19 + $0x108] sm:$0xff]  }
 0x71c   : > { %5109 = vmatprep.subr.bf16.mxu0 %v5950_v61 }
 0x71d   : > { %3758 = vmatmul.mubr.bf16.vlgmr.msra.gmra.mxu1 %v3284_v19 }
 0x71e   : > { %4927 = vmatprep.mubr.msk.bf16.mxu1 %vm1982_vm8, %v3289_v55  ;;  %4118 = vmatpush1.bf16.msra.mxu1 %v5960_v10  ;;  %v5969_v10 = vld [vmem:[%s6391_s19 + $0x158] sm:$0xff]  }
 0x71f   : > { %5110 = vmatpush3.bf16.msra.mxu0 %v5951_v50  ;;  %4119 = vmatprep.subr.bf16.mxu1 %v7728_v35 }
 0x720   : > { %5111 = vmatprep.subr.bf16.mxu0 %v5952_v22 }
 0x722   : > { %4120 = vmatpush1.bf16.msra.mxu1 %v5962_v33 }
 0x723   : > { %5112 = vmatpush3.bf16.msra.mxu0 %v5953_v44  ;;  %4121 = vmatprep.subr.bf16.mxu1 %v7728_v35 }
 0x724   : > { %5113 = vmatprep.subr.bf16.mxu0 %v5954_v51 }
 0x725   : > { %3768 = vmatmul.mubr.bf16.gmra.mxu1 %v3288_v7 }
 0x726   : > { %4928 = vmatprep.mubr.msk.bf16.mxu1 %vm1982_vm8, %v3293_v27  ;;  %4122 = vmatpush1.bf16.msra.mxu1 %v5964_v39 }
 0x727   : > { %5114 = vmatpush3.bf16.msra.mxu0 %v5955_v41  ;;  %4123 = vmatprep.subr.bf16.mxu1 %v7728_v35 }
 0x728   : > { %5115 = vmatprep.subr.bf16.mxu0 %v5956_v47 }
 0x72a   : > { %4124 = vmatpush1.bf16.msra.mxu1 %v5965_v48  ;;  %v5973_v48 = vld [vmem:[%s7071_s26 + $0x74] ss:$0 sps:$4 sm:$0xff]  }
 0x72b   : > { %5116 = vmatpush3.bf16.msra.mxu0 %v5957_v20  ;;  %4125 = vmatprep.subr.bf16.mxu1 %v7728_v35 }
 0x72c   : > { %5117 = vmatprep.subr.bf16.mxu0 %v5958_v21 }
 0x72d   : > { %3778 = vmatmul.mubr.bf16.gmra.mxu1 %v3292_v30 }
 0x72e   : > { %4929 = vmatprep.mubr.msk.bf16.mxu1 %vm1982_vm8, %v3297_v43 }
 0x72f   : > { %5118 = vmatpush3.bf16.msra.mxu0 %v5959_v46 }
 0x730   : > { %5119 = vmatprep.subr.bf16.mxu0 %v5961_v58 }
 0x733   : > { %5120 = vmatpush3.bf16.msra.mxu0 %v5963_v49 }
 0x734   : > { %5121 = vmatprep.subr.bf16.mxu0 %v5967_v32 }
 0x735   : > { %3788 = vmatmul.mubr.bf16.gmra.mxu1 %v3296_v62  ;;  %v5968_v62 = vld [vmem:[%s6391_s19 + $0xc8] sm:$0xff]  }
 0x736   : > { %4930 = vmatprep.mubr.msk.bf16.mxu1 %vm1982_vm8, %v3301_v40 }
 0x737   : > { %5122 = vmatpush3.bf16.msra.mxu0 %v5968_v62 }
 0x738   : > { %5181 = vmatprep.subr.bf16.mxu0 %v6087_v63 }
 0x73d   : > { %3798 = vmatmul.mubr.bf16.gmra.mxu1 %v3300_v57  ;;  %v5966_v57 = vld [vmem:[%s6391_s19 + $0x160] sm:$0xff]  }
 0x73e   : > { %4126 = vmatpush1.bf16.msra.mxu1 %v5966_v57 }
 0x73f   : > { %4127 = vmatprep.subr.bf16.mxu1 %v7728_v35 }
 0x742   : > { %4128 = vmatpush1.bf16.msra.mxu1 %v5969_v10  ;;  %v5980_v10 = vld [vmem:[%s7071_s26 + $0x3c] sm:$0xff]  }
 0x743   : > { %4129 = vmatprep.subr.bf16.mxu1 %v7728_v35 }
 0x795   : > { %v3676_v34 = vpop.f32.mrf.mxu1 }
 0x797   : > { %v3678_v59 = vpop.f32.mrf.mxu1 }
 0x799   : > { %v3680_v15 = vpop.f32.mrf.mxu1 }
 0x79b   : > { %v3682_v9 = vpop.f32.mrf.mxu1 }
 0x7a5   : > { %v3686_v19 = vpop.f32.mrf.mxu1 }
 0x7a7   : > { %v3688_v0 = vpop.f32.mrf.mxu1 }
 0x7a9   : > { %v3690_v5 = vpop.f32.mrf.mxu1 }
 0x7ab   : > { %v3692_v1 = vpop.f32.mrf.mxu1 }
 0x7b5   : > { %v3696_v6 = vpop.f32.mrf.mxu1 }
 0x7b7   : > { %v3698_v36 = vpop.f32.mrf.mxu1 }
 0x7b9   : > { %v3700_v38 = vpop.f32.mrf.mxu1 }
 0x7bb   : > { %v3702_v60 = vpop.f32.mrf.mxu1 }
 0x7c5   : > { %v7484_v52 = vpop.f32.mrf.mxu1 }
 0x7c7   : > { %v7486_v4 = vpop.f32.mrf.mxu1 }
 0x7c9   : > { %v7488_v54 = vpop.f32.mrf.mxu1 }
 0x7cb   : > { %v7490_v2 = vpop.f32.mrf.mxu1 }
 0x7d5   : > { %v7492_v56 = vpop.f32.mrf.mxu1 }
 0x7d7   : > { %v7494_v25 = vpop.f32.mrf.mxu1 }
 0x7d9   : > { %v7496_v26 = vpop.f32.mrf.mxu1 }
 0x7db   : > { %v7498_v8 = vpop.f32.mrf.mxu1 }
 0x7dd   : > { %v3759_v14 = vpop.f32.mrf.mxu1 }
 0x7de   : > { %v3760_v55 = vadd.f32 %v3759_v14, %v3676_v34  ;;  %v5970_v34 = vld [vmem:[%s6391_s19 + $0x150] sm:$0xff]  }
 0x7df   : > { %v3761_v31 = vpop.f32.mrf.mxu1  ;;  %4130 = vmatpush1.bf16.msra.mxu1 %v5970_v34 }
 0x7e0   : > { %v3762_v23 = vadd.f32 %v3761_v31, %v3678_v59  ;;  %4131 = vmatprep.subr.bf16.mxu1 %v7728_v35 }
 0x7e1   : > { %v3763_v7 = vpop.f32.mrf.mxu1 }
 0x7e2   : > { %v3764_v17 = vadd.f32 %v3763_v7, %v3680_v15 }
 0x7e3   : > { %v3765_v16 = vpop.f32.mrf.mxu1 }
 0x7e4   : > { %v3808_v27 = vmax.f32 %v3760_v55, %v3764_v17  ;;  %v3766_v13 = vadd.f32 %v3765_v16, %v3682_v9  ;;  %v5972_v55 = vld [vmem:[%s6391_s19 + $0x188] sm:$0xff]  }
 0x7e5   : > { %v3769_v12 = vpop.f32.mrf.mxu1 }
 0x7e6   : > { %v3809_v28 = vmax.f32 %v3762_v23, %v3766_v13  ;;  %v3770_v40 = vadd.f32 %v3769_v12, %v3686_v19 }
 0x7e7   : > { %v3771_v24 = vpop.f32.mrf.mxu1 }
 0x7e8   : > { %v3818_v30 = vmax.f32 %v3808_v27, %v3809_v28  ;;  %v3772_v42 = vadd.f32 %v3771_v24, %v3688_v0 }
 0x7e9   : > { %v3773_v43 = vpop.f32.mrf.mxu1 }
 0x7ea   : > { %v7504_v29 = vadd.f32 %v7501_v45, %v3818_v30  ;;  %v3774_v37 = vadd.f32 %v3773_v43, %v3690_v5 }
 0x7eb   : > { %v3775_v3 = vpop.f32.mrf.mxu1 }
 0x7ec   : > { %v3776_v53 = vadd.f32 %v3775_v3, %v3692_v1  ;;  %v3810_v11 = vmax.f32 %v3770_v40, %v3774_v37 }
 0x7ed   : > { %v3779_v18 = vpop.f32.mrf.mxu1 }
 0x7ee   : > { %v3811_v61 = vmax.f32 %v3772_v42, %v3776_v53  ;;  %v3780_v47 = vadd.f32 %v3779_v18, %v3696_v6  ;;  %v5974_v42 = vld [vmem:[%s7071_s26 + $0x6c] sm:$0xff]  }
 0x7ef   : > { %v3781_v50 = vpop.f32.mrf.mxu1 }
 0x7f0   : > { %v3819_v22 = vmax.f32 %v3810_v11, %v3811_v61  ;;  %v3782_v39 = vadd.f32 %v3781_v50, %v3698_v36  ;;  %v5975_v11 = vld [vmem:[%s7071_s26 + $0x64] sm:$0xff]   ;;  %v5976_v61 = vld [vmem:[%s7071_s26 + $0x5c] sm:$0xff]   ;;  %v5977_v50 = vld [vmem:[%s7071_s26 + $0x54] sm:$0xff]  }
 0x7f1   : > { %v3783_v44 = vpop.f32.mrf.mxu1 }
 0x7f2   : > { %v3784_v51 = vadd.f32 %v3783_v44, %v3700_v38  ;;  %v3832_v33 = vadd.f32 %v7501_v45, %v3819_v22  ;;  %v5978_v22 = vld [vmem:[%s7071_s26 + $0x4c] sm:$0xff]   ;;  %v5979_v44 = vld [vmem:[%s7071_s26 + $0x44] sm:$0xff]  }
 0x7f3   : > { %v3785_v41 = vpop.f32.mrf.mxu1 }
 0x7f4   : > { %v3786_v20 = vadd.f32 %v3785_v41, %v3702_v60  ;;  %v3837_v21 = vmax.f32 %v3832_v33, 0.0  ;;  %v3812_v58 = vmax.f32 %v3780_v47, %v3784_v51  ;;  %v5971_v60 = vld [vmem:[%s6391_s19 + $0x148] sm:$0xff]   ;;  %v5981_v51 = vld [vmem:[%s7105_s28 + $0x54] ss:$0 sps:$4 sm:$0x33]  }
 0x7f5   : > { %v3789_v46 = vpop.f32.mrf.mxu1  ;;  %4132 = vmatpush1.bf16.msra.mxu1 %v5971_v60  ;;  %v4332_v33 = vsel %vm1998_vm6, %v5981_v51, 0  ;;  %v5982_v41 = vld [vmem:[%s7105_s28 + $0x4c] sm:$0xff]   ;;  %v5983_v47 = vld [vmem:[%s7105_s28 + $0x44] sm:$0xff]  }
 0x7f6   : > { %v3813_v59 = vmax.f32 %v3782_v39, %v3786_v20  ;;  %3842 = vrot.lane.b32.xlu0 %v3837_v21, %s7727_s0  ;;  %v3790_v1 = vadd.f32 %v3789_v46, %v7484_v52  ;;  %4147 = vmatprep.subr.bf16.mxu1 %v7728_v35  ;;  %v5984_v39 = vld [vmem:[%s7105_s28 + $0x3c] sm:$0xff]   ;;  %v5985_v20 = vld [vmem:[%s7105_s28 + $0x34] sm:$0xff]  }
 0x7f7   : > { %v3791_v49 = vpop.f32.mrf.mxu1  ;;  %v4984_v46 = vld [vmem:[%s7122_s30 + $0x1] ss:$0 sm:$0xff]  ;;  %s6090_s30 = smov [#allocation4]  }
 0x7f8   : > { %v3820_v15 = vmax.f32 %v3812_v58, %v3813_v59  ;;  %v3792_v6 = vadd.f32 %v3791_v49, %v7486_v4 }
 0x7f9   : > { %v3793_v9 = vpop.f32.mrf.mxu1  ;;  %4148 = vmatpush2.bf16.msra.mxu1 %v5972_v55 }
 0x7fa   : > { %v3794_v19 = vadd.f32 %v3793_v9, %v7488_v54  ;;  %v3833_v0 = vadd.f32 %v7501_v45, %v3820_v15  ;;  %5201 = vmatprep.subr.bf16.mxu1 %v6087_v63 }
 0x7fb   : > { %v3795_v5 = vpop.f32.mrf.mxu1 }
 0x7fc   : > { %v3796_v36 = vadd.f32 %v3795_v5, %v7490_v2  ;;  %v3838_v38 = vmax.f32 %v3833_v0, 0.0  ;;  %v3814_v31 = vmax.f32 %v3790_v1, %v3794_v19 }
 0x7fd   : > { %v3799_v14 = vpop.f32.mrf.mxu1 }
 0x7fe   : > { %v3815_v7 = vmax.f32 %v3792_v6, %v3796_v36  ;;  %3846 = vrot.lane.b32.xlu1 %v3838_v38, %s7719_s1  ;;  %v3800_v23 = vadd.f32 %v3799_v14, %v7492_v56  ;;  %v3836_v56 = vmax.f32 %v7504_v29, 0.0  ;;  %v5027_v38 = vld [vmem:[%s7135_s2 + $0x1] ss:$0 sm:$0xff]  ;;  %s5067_s1 = sshll.u32 %s6180_s25, 8 }
 0x7ff   : > { %v3801_v17 = vpop.f32.mrf.mxu1  ;;  %s7590_s2 = scalar_lea.hbm %s7684_s12, %s5067_s1 }
 0x800   : > { %v3821_v54 = vmax.f32 %v3814_v31, %v3815_v7  ;;  %v3802_v27 = vadd.f32 %v3801_v17, %v7494_v25 }
 0x801   : > { %v3803_v16 = vpop.f32.mrf.mxu1 }
 0x802   : > { %v3804_v52 = vadd.f32 %v3803_v16, %v7496_v26  ;;  %v3834_v4 = vadd.f32 %v7501_v45, %v3821_v54 }
 0x803   : > { %v3805_v2 = vpop.f32.mrf.mxu1 }
 0x804   : > { %v3806_v13 = vadd.f32 %v3805_v2, %v7498_v8  ;;  %v3839_v12 = vmax.f32 %v3834_v4, 0.0  ;;  %v3816_v28 = vmax.f32 %v3800_v23, %v3804_v52 }
 0x806   : > { %v3817_v35 = vmax.f32 %v3802_v27, %v3806_v13  ;;  %3850 = vrot.lane.b32.xlu0 %v3839_v12, %s7729_s23 }
 0x808   : > { %v3822_v24 = vmax.f32 %v3816_v28, %v3817_v35 }
 0x80a   : > { %v3835_v26 = vadd.f32 %v7501_v45, %v3822_v24  ;;  %v4232_v45 = vsel %vm2592_vm10, %v5973_v48, 0 }
 0x80c   : > { %v3840_v30 = vmax.f32 %v3835_v26, 0.0 }
 0x80e   : > { %3854 = vrot.lane.b32.xlu1 %v3840_v30, %s7717_s15  ;;  %s4413_s15 = sshll.u32 %s7142_s5, 4  ;;  %s7583_s15 = int_to_ptr.vmem [resolvable:$true] %s4413_s15 }
 0x868   : > { %v3843_v43 = vpop.permute.xlu0 %3842 }
 0x869   : > { %v3857_v25 = vsel %vm1633_vm7, %v3836_v56, %v3843_v43 }
 0x86a   : > { %v3861_v40 = vpack.c.bf16 %v3857_v25, %v3857_v25 }
 0x870   : > { %v3847_v37 = vpop.permute.xlu1 %3846 }
 0x871   : > { %v3858_v8 = vsel %vm940_vm0, %v3843_v43, %v3847_v37 }
 0x878   : > { %v3851_v32 = vpop.permute.xlu0 %3850 }
 0x879   : > { %v3859_v3 = vsel %vm2221_vm9, %v3858_v8, %v3851_v32 }
 0x87a   : > { %v3862_v62 = vpack.c.bf16 %v3859_v3, %v3859_v3 }
 0x87c   : > { %4109 = vmatprep.mubr.bf16.mxu0 %v3862_v62 }
 0x87d   : > { %4110 = vmatmul.mubr.bf16.vlgmr.msra.gmra.mxu0 %v3861_v40 }
 0x87e   : > { %5182 = vmatpush3.bf16.msra.mxu0 %v4232_v45  ;;  %5197 = vmatprep.mubr.msk.bf16.mxu0 %vm6089_vm12, %v6087_v63 }
 0x87f   : > { %5183 = vmatprep.subr.bf16.mxu0 %v6087_v63 }
 0x880   : > { %v3855_v29 = vpop.permute.xlu1 %3854 }
 0x881   : > { %v3860_v53 = vsel %vm969_vm1, %v3851_v32, %v3855_v29  ;;  %v3864_v57 = vpack.c.bf16 %v3855_v29, %v3855_v29 }
 0x882   : > { %v3863_v18 = vpack.c.bf16 %v3860_v53, %v3860_v53  ;;  %5184 = vmatpush3.bf16.msra.mxu0 %v5974_v42 }
 0x883   : > { %5010 = vmatprep.mubr.msk.bf16.mxu1 %vm2435_vm11, %v3864_v57  ;;  %5185 = vmatprep.subr.bf16.mxu0 %v6087_v63 }
 0x884   : > { %4150 = vmatmul.mubr.bf16.vlgmr.msra.gmra.mxu1 %v3863_v18 }
 0x885   : > { %5213 = vmatprep.mubr.msk.bf16.mxu1 %vm6089_vm12, %v6087_v63  ;;  %5202 = vmatpush3.bf16.msra.mxu1 %v4332_v33 }
 0x886   : > { %5186 = vmatpush3.bf16.msra.mxu0 %v5975_v11  ;;  %5203 = vmatprep.subr.bf16.mxu1 %v6087_v63 }
 0x887   : > { %5187 = vmatprep.subr.bf16.mxu0 %v6087_v63 }
 0x889   : > { %5204 = vmatpush3.bf16.msra.mxu1 %v5982_v41 }
 0x88a   : > { %5188 = vmatpush3.bf16.msra.mxu0 %v5976_v61  ;;  %5205 = vmatprep.subr.bf16.mxu1 %v6087_v63 }
 0x88b   : > { %5189 = vmatprep.subr.bf16.mxu0 %v6087_v63 }
 0x88d   : > { %5206 = vmatpush3.bf16.msra.mxu1 %v5983_v47 }
 0x88e   : > { %5190 = vmatpush3.bf16.msra.mxu0 %v5977_v50  ;;  %5207 = vmatprep.subr.bf16.mxu1 %v6087_v63 }
 0x88f   : > { %5191 = vmatprep.subr.bf16.mxu0 %v6087_v63 }
 0x891   : > { %5208 = vmatpush3.bf16.msra.mxu1 %v5984_v39 }
 0x892   : > { %5192 = vmatpush3.bf16.msra.mxu0 %v5978_v22  ;;  %5209 = vmatprep.subr.bf16.mxu1 %v6087_v63 }
 0x893   : > { %5193 = vmatprep.subr.bf16.mxu0 %v6087_v63 }
 0x895   : > { %5210 = vmatpush3.bf16.msra.mxu1 %v5985_v20 }
 0x896   : > { %5194 = vmatpush3.bf16.msra.mxu0 %v5979_v44  ;;  %5211 = vmatprep.subr.bf16.mxu1 %v6087_v63 }
 0x897   : > { %5195 = vmatprep.subr.bf16.mxu0 %v6087_v63  ;;  %v5986_v63 = vld [vmem:[%s7105_s28 + $0x2c] sm:$0xff]   ;;  %s5987_s28 = scalar_lea.vmem %s7583_s15, 256 }
 0x898   : > { %p5988_p11 = scmp.ne.s32.totalorder %s7583_s15, %s5987_s28 }
 0x899   : > { %5212 = vmatpush3.bf16.msra.mxu1 %v5986_v63 }
 0x89a   : > { %5196 = vmatpush3.bf16.msra.mxu0 %v5980_v10  ;;  %p5989_p12 = pnand %p5988_p11, %p6197_p5 }
 0x89c   : > { %p5990_p13 = pneg %p5989_p12 }
 0x93d   : > { %v5123_v21 = vpop.f32.mrf.mxu0 }
 0x93f   : > { %v5124_v34 = vpop.f32.mrf.mxu0 }
 0x940   : > { %v5125_v58 = vadd.f32 %v5124_v34, %v5123_v21 }
 0x941   : > { %v5126_v59 = vpop.f32.mrf.mxu0 }
 0x942   : > { %v4112_v49 = vadd.f32 %v5125_v58, %v4984_v46 }
 0x943   : > { %v5127_v15 = vpop.f32.mrf.mxu0 }
 0x944   : > { %v4151_v9 = vpop.f32.mrf.mxu1 }
 0x945   : > { %v4152_v19 = vadd.f32 %v4151_v9, %v4112_v49 }
 0x946   : > { %v4153_v0 = vpop.f32.mrf.mxu1 }
 0x947   : > { %v4157_v5 = vmax.f32 %v4152_v19, 0.0 }
 0x948   : > { %v4154_v1 = vpop.f32.mrf.mxu1 }
 0x949   : > { %v4158_v6 = vpack.c.bf16 %v4157_v5, %v4157_v5 }
 0x94a   : > { %v4155_v36 = vpop.f32.mrf.mxu1 }
 0x94b   : > { %5198 = vmatmul.mubr.msk.bf16.vlgmr.msra.gmra.mxu0 %vm2588_vm13, %v4158_v6 }
 0xa0b   : > { %v4268_v60 = vpop.f32.mrf.mxu0 }
 0xa0c   : > { %v4269_v14 = vadd.f32 %v5027_v38, %v4268_v60 }
 0xa0d   : > { %v5199_v31 = vpop.f32.mrf.mxu0 }
 0xa0e   : > { %v4274_v7 = vpack.c.bf16 %v4269_v14, %v4269_v14  ;;  %5057 = vst.msk [vmem:[%s7142_s5 + $0x8] sm:$0xff] %vm1600_vm4, %v4269_v14  ;;  %s5991_s5 = sshll.u32 %s6090_s30, 4  ;;  %s5992_s5 = int_to_ptr.vmem [resolvable:$false] %s5991_s5 }
 0xa0f   : > { %v4271_v55 = vpop.f32.mrf.mxu0  ;;  %s5993_s16 = scalar_lea.vmem %s5992_s5, 512  ;;  %p5994_p0 = scmp.lt.s32.totalorder %s7583_s15, %s5992_s5 }
 0xa10   : > { %5214 = vmatmul.mubr.msk.bf16.vlgmr.msra.gmra.mxu1 %vm1600_vm4, %v4274_v7  ;;  %p5995_p1 = scmp.lt.s32.totalorder %s5993_s16, %s5987_s28 }
 0xa11   : > { %v5200_v17 = vpop.f32.mrf.mxu0 }
 0xa12   : > { %p5996_p2 = por %p5995_p1, %p5994_p0 }
 0xa14   : > { %p5997_p3 = pnand %p5996_p2, %p5990_p13 }
 0xa16   : > { %6000 = shalt.err (!%p5997_p3)
}
 0xa17   : > { %s6001_s4 = scalar_lea.hbm %s7590_s2, 256  ;;  %s6005_s0 = scalar_lea.hbm %s7684_s12, 512 }
 0xa18   : > { %p6002_p4 = scmp.ne.s32.totalorder %s7590_s2, %s6001_s4  ;;  %p6006_p9 = scmp.lt.s32.totalorder %s7590_s2, %s7684_s12 }
 0xa19   : > { %p6007_p10 = scmp.lt.s32.totalorder %s6005_s0, %s6001_s4 }
 0xa1a   : > { %p6003_p7 = pnand %p6002_p4, %p6197_p5 }
 0xa1b   : > { %p6008_p11 = por %p6007_p10, %p6006_p9 }
 0xa1c   : > { %p6004_p8 = pneg %p6003_p7 }
 0xa1e   : > { %p6009_p12 = pnand %p6008_p11, %p6004_p8 }
 0xa20   : > { %6012 = shalt.err (!%p6009_p12)
}
 0xa21   : > { %s6091_s26 = smov 128   ;;  %s6092_s28 = smov 8   ;;  %v5049_v54 = vld [vmem:[%s7211_s3 + $0x1] ss:$0 sm:$0xff] }
 0xa22   : > { %5223 = dma.vmem_to_hbm [thread:$0]  (%p6197_p5), %s7583_s15, 256, %s7590_s2, %s4384_s17, %s6091_s26, %s6091_s26, %s6092_s28  }
 0xa23   : > { %s4397_s30 = sshll.u32 %s7216_s6, 4  ;;  %s7627_s4 = scalar_lea.hbm %s7683_s11, %s5067_s1  ;;  %s7620_s30 = int_to_ptr.vmem [resolvable:$true] %s4397_s30 }
 0xa24   : > { %s4379_s15 = scalar_lea.sflag [#allocation3], %s7129_s18  ;;  %s6013_s2 = scalar_lea.vmem %s7620_s30, 256 }
 0xa25   : > { %p6014_p13 = scmp.ne.s32.totalorder %s7620_s30, %s6013_s2  ;;  %s6093_s3 = smov [#allocation2]  }
 0xa26   : > { %s6017_s17 = sshll.u32 %s6093_s3, 4  ;;  %s6018_s17 = int_to_ptr.vmem [resolvable:$false] %s6017_s17 }
 0xa27   : > { %p6015_p0 = pnand %p6014_p13, %p6197_p5  ;;  %s6019_s29 = scalar_lea.vmem %s6018_s17, 512 }
 0xa28   : > { %p6020_p2 = scmp.lt.s32.totalorder %s7620_s30, %s6018_s17  ;;  %p6021_p3 = scmp.lt.s32.totalorder %s6019_s29, %s6013_s2 }
 0xa29   : > { %p6016_p1 = pneg %p6015_p0 }
 0xa2a   : > { %p6022_p4 = por %p6021_p3, %p6020_p2 }
 0xa2c   : > { %p6023_p7 = pnand %p6022_p4, %p6016_p1 }
 0xad0   : > { %v4368_v16 = vpop.f32.mrf.mxu1 }
 0xad1   : > { %v4369_v52 = vadd.f32 %v5049_v54, %v4368_v16 }
 0xad2   : > { %v5215_v4 = vpop.f32.mrf.mxu1 }
 0xad3   : > { %5058 = vst.msk [vmem:[%s7216_s6 + $0x8] sm:$0xff] %vm2735_vm14, %v4369_v52 }
 0xad4   : > { %v4371_v2 = vpop.f32.mrf.mxu1 }
 0xad5   : > { %6026 = shalt.err (!%p6023_p7)
}
 0xad6   : > { %s6027_s6 = scalar_lea.hbm %s7627_s4, 256  ;;  %s6031_s1 = scalar_lea.hbm %s7683_s11, 512 }
 0xad7   : > { %p6028_p8 = scmp.ne.s32.totalorder %s7627_s4, %s6027_s6  ;;  %p6032_p11 = scmp.lt.s32.totalorder %s7627_s4, %s7683_s11 }
 0xad8   : > { %p6033_p12 = scmp.lt.s32.totalorder %s6031_s1, %s6027_s6 }
 0xad9   : > { %p6029_p9 = pnand %p6028_p8, %p6197_p5 }
 0xada   : > { %p6034_p13 = por %p6033_p12, %p6032_p11 }
 0xadb   : > { %p6030_p10 = pneg %p6029_p9 }
 0xadd   : > { %p6035_p0 = pnand %p6034_p13, %p6030_p10 }
 0xadf   : > { %6038 = shalt.err (!%p6035_p0)
}
 0xae0   : > { %5222 = dma.vmem_to_hbm [thread:$0]  (%p6197_p5), %s7620_s30, 256, %s7627_s4, %s4379_s15, %s6091_s26, %s6091_s26, %s6092_s28   ;;  %v5216_v23 = vpop.f32.mrf.mxu1 }
 0xae1 PF: > { %p5233_p1 = scmp.ge.s32.totalorder %s6077_s24, 2  ;;  %s4428_s23 = sand.u32 1, %s6065_s21  }
 0xae2   : > { %s4429_s19 = scalar_lea.sflag [#allocation3], %s4428_s23 }
 0xae3   : > { %p5227_p2 = pnand %p5233_p1, %p6201_p6 }
 0xae5   : > { %p5228_p3 = pneg %p5227_p2 }
 0xae7   : > { %6056 = dma.done.wait (%p5228_p3), %s4429_s19, 256  }
 0xae8   : > { %6058 = vsyncadd (%p5228_p3), %s4429_s19, 4294967040  ;;  %s4438_s13 = scalar_lea.sflag [#allocation5], %s4428_s23 }
 0xae9   : > { %6060 = dma.done.wait (%p5228_p3), %s4438_s13, 256  }
 0xaea   : > { %6062 = vsyncadd (%p5228_p3), %s4438_s13, 4294967040  ;;  %s7730_s5 = sld [smem:[#allocation8_spill]]  ;;  %p26_p5 = scmp.ge.s32.totalorder %s6184_s27, 4  }
 0xaeb   : > { %s7731_s23 = sld [smem:[#allocation9_spill]]  ;;  %s7732_s21 = smov %s6069_s22 }
 0xaec   : > { %s7734_s24 = smov %s6184_s27  ;;  %28 = sbr.rel (!%p26_p5) target bundleno = 13 (0xd), region = 155 }
 0xaf0   : > { %s7733_s22 = smov %s7730_s5 }
 0xaf1   :  { %4443 = vsyncpa [#allocation3], 1 }
 0xaf2   :  { %4445 = vsyncpa [#allocation3 + $0x1], 1 }
 0xaf3   :  { %4446 = vsyncpa [#allocation5], 1 }
 0xaf4   :  { %4448 = vsyncpa [#allocation5 + $0x1], 1 }

</bundles_post_ra>
